<compile_context>
chip_gen: v7x
topology: tpu7x:2x2x1
jax: 0.10.0
libtpu: 0.0.40
codegen_flags: <defaults>
</compile_context>

<pallas_src>
import math
from functools import partial

import jax
import jax.numpy as jnp
from jax.experimental import pallas as pl
from jax.experimental.pallas import tpu as pltpu

LN_EPS = 1e-5  # torch.nn.LayerNorm default


# ------------------------------ small helpers -------------------------------

def _layernorm_f32(x, g, b):
    mu = jnp.mean(x, axis=-1, keepdims=True)
    xc = x - mu
    var = jnp.mean(xc * xc, axis=-1, keepdims=True)
    return xc * jax.lax.rsqrt(var + LN_EPS) * g + b


def _seq_tile(n, target=512):
    """Largest convenient tile <= target that divides n (falls back to n)."""
    if n <= target:
        return n
    for cand in (512, 256, 128, 64):
        if n % cand == 0:
            return cand
    # TODO(synk): mask partial K tiles for very large Nk with no nice divisor.
    return n


def _row_tile(m, target=512):
    return m if m <= target else target


def _deinterleave_perm(C, head_nums):
    """Per-head permutation mapping interleaved (re,im) pairs to half-split."""
    dh = C // head_nums
    half = dh // 2
    idx = []
    for h in range(head_nums):
        base = h * dh
        idx += [base + 2 * i for i in range(half)]
        idx += [base + 2 * i + 1 for i in range(half)]
    return jnp.asarray(idx, dtype=jnp.int32)


# ------------------------------ Pallas kernels ------------------------------

def _ln_qkv_kernel(x_ref, g_ref, b_ref, w_ref, bias_ref, q_ref, k_ref, v_ref, *, C):
    x = x_ref[...].astype(jnp.float32)
    xn = _layernorm_f32(x, g_ref[...], b_ref[...])
    y = jnp.dot(xn.astype(jnp.bfloat16), w_ref[...],
                preferred_element_type=jnp.float32) + bias_ref[...]
    q_ref[...] = y[:, 0 * C:1 * C].astype(q_ref.dtype)
    k_ref[...] = y[:, 1 * C:2 * C].astype(k_ref.dtype)
    v_ref[...] = y[:, 2 * C:3 * C].astype(v_ref.dtype)


def _ln_proj_kernel(x_ref, g_ref, b_ref, w_ref, bias_ref, o_ref):
    x = x_ref[...].astype(jnp.float32)
    xn = _layernorm_f32(x, g_ref[...], b_ref[...])
    y = jnp.dot(xn.astype(jnp.bfloat16), w_ref[...],
                preferred_element_type=jnp.float32) + bias_ref[...]
    o_ref[...] = y.astype(o_ref.dtype)


def _kv_proj_kernel(mem_ref, pos_ref, wk_ref, bk_ref, wv_ref, bv_ref, k_ref, v_ref):
    mem = mem_ref[...].astype(jnp.float32)
    mp = (mem + pos_ref[...].astype(jnp.float32)).astype(jnp.bfloat16)
    k = jnp.dot(mp, wk_ref[...], preferred_element_type=jnp.float32) + bk_ref[...]
    v = jnp.dot(mem.astype(jnp.bfloat16), wv_ref[...],
                preferred_element_type=jnp.float32) + bv_ref[...]
    k_ref[...] = k.astype(k_ref.dtype)
    v_ref[...] = v.astype(v_ref.dtype)


def _out_res_kernel(a_ref, w_ref, b_ref, res_ref, o_ref):
    y = jnp.dot(a_ref[...], w_ref[...], preferred_element_type=jnp.float32) + b_ref[...]
    o_ref[...] = (res_ref[...].astype(jnp.float32) + y).astype(o_ref.dtype)


def _ln_ffn_res_kernel(x_ref, g_ref, b_ref, w1_ref, b1_ref, w2_ref, b2_ref, o_ref):
    x = x_ref[...].astype(jnp.float32)
    xn = _layernorm_f32(x, g_ref[...], b_ref[...])
    h = jnp.dot(xn.astype(jnp.bfloat16), w1_ref[...],
                preferred_element_type=jnp.float32) + b1_ref[...]
    h = jnp.maximum(h, 0.0)  # ReLU
    y = jnp.dot(h.astype(jnp.bfloat16), w2_ref[...],
                preferred_element_type=jnp.float32) + b2_ref[...]
    o_ref[...] = (x + y).astype(o_ref.dtype)


def _flash_rope_attn_kernel(q_ref, k_ref, v_ref, cq_ref, sq_ref, ck_ref, sk_ref,
                            o_ref, m_ref, l_ref, acc_ref, *, head_nums, dh):
    kt = pl.program_id(2)

    @pl.when(kt == 0)
    def _():
        m_ref[...] = jnp.full(m_ref.shape, -jnp.inf, jnp.float32)
        l_ref[...] = jnp.zeros(l_ref.shape, jnp.float32)
        acc_ref[...] = jnp.zeros(acc_ref.shape, jnp.float32)

    q = q_ref[0].astype(jnp.float32)    # (tq, C)  (already scaled via cq/sq tables)
    k = k_ref[0].astype(jnp.float32)    # (tk, C)
    v = v_ref[0]                        # (tk, C) bf16
    cq = cq_ref[...]                    # (tq, dh)  cos * 1/sqrt(dh)
    sq = sq_ref[...]                    # (tq, dh)  signed sin * 1/sqrt(dh)
    ck = ck_ref[...]                    # (tk, dh)
    sk = sk_ref[...]
    half = dh // 2

    for h in range(head_nums):
        lo, hi = h * dh, (h + 1) * dh
        qh = q[:, lo:hi]
        kh = k[:, lo:hi]
        # rotate-half RoPE (weights were pre-permuted to half-split layout)
        qh_rot = qh * cq + jnp.concatenate([qh[:, half:], qh[:, :half]], axis=-1) * sq
        kh_rot = kh * ck + jnp.concatenate([kh[:, half:], kh[:, :half]], axis=-1) * sk

        s = jax.lax.dot_general(qh_rot.astype(jnp.bfloat16),
                                kh_rot.astype(jnp.bfloat16),
                                (((1,), (1,)), ((), ())),
                                preferred_element_type=jnp.float32)   # (tq, tk)

        m_prev = m_ref[:, h:h + 1]
        m_new = jnp.maximum(m_prev, jnp.max(s, axis=-1, keepdims=True))
        alpha = jnp.exp(m_prev - m_new)
        p = jnp.exp(s - m_new)
        l_ref[:, h:h + 1] = alpha * l_ref[:, h:h + 1] + jnp.sum(p, axis=-1, keepdims=True)
        acc_ref[:, lo:hi] = alpha * acc_ref[:, lo:hi] + jnp.dot(
            p.astype(jnp.bfloat16), v[:, lo:hi], preferred_element_type=jnp.float32)
        m_ref[:, h:h + 1] = m_new

    @pl.when(kt == pl.num_programs(2) - 1)
    def _():
        if head_nums == 1:
            inv = pl.reciprocal(l_ref[...], approx=True)          # (tq, 1)
            o_ref[0] = (acc_ref[...] * inv).astype(o_ref.dtype)
        else:
            for h in range(head_nums):
                lo, hi = h * dh, (h + 1) * dh
                inv = pl.reciprocal(l_ref[:, h:h + 1], approx=True)
                o_ref[0, :, lo:hi] = (acc_ref[:, lo:hi] * inv).astype(o_ref.dtype)


# ------------------------------ wrappers ------------------------------------

_PARALLEL_1D = pltpu.CompilerParams(dimension_semantics=("parallel",))


def pallas_ln_qkv(x, g, b, wqkv, bqkv):
    B, N, Cin = x.shape
    Cout = wqkv.shape[1] // 3
    M = B * N
    x2 = x.reshape(M, Cin)
    tm = _row_tile(M)
    q, k, v = pl.pallas_call(
        partial(_ln_qkv_kernel, C=Cout),
        grid=(pl.cdiv(M, tm),),
        in_specs=[
            pl.BlockSpec((tm, Cin), lambda i: (i, 0)),
            pl.BlockSpec((1, Cin), lambda i: (0, 0)),
            pl.BlockSpec((1, Cin), lambda i: (0, 0)),
            pl.BlockSpec((Cin, 3 * Cout), lambda i: (0, 0)),
            pl.BlockSpec((1, 3 * Cout), lambda i: (0, 0)),
        ],
        out_specs=[pl.BlockSpec((tm, Cout), lambda i: (i, 0))] * 3,
        out_shape=[jax.ShapeDtypeStruct((M, Cout), jnp.bfloat16)] * 3,
        compiler_params=_PARALLEL_1D,
    )(x2, g.reshape(1, Cin), b.reshape(1, Cin), wqkv, bqkv.reshape(1, 3 * Cout))
    return (q.reshape(B, N, Cout), k.reshape(B, N, Cout), v.reshape(B, N, Cout))


def pallas_ln_proj(x, g, b, w, bias):
    B, N, Cin = x.shape
    Dout = w.shape[1]
    M = B * N
    x2 = x.reshape(M, Cin)
    tm = _row_tile(M)
    out = pl.pallas_call(
        _ln_proj_kernel,
        grid=(pl.cdiv(M, tm),),
        in_specs=[
            pl.BlockSpec((tm, Cin), lambda i: (i, 0)),
            pl.BlockSpec((1, Cin), lambda i: (0, 0)),
            pl.BlockSpec((1, Cin), lambda i: (0, 0)),
            pl.BlockSpec((Cin, Dout), lambda i: (0, 0)),
            pl.BlockSpec((1, Dout), lambda i: (0, 0)),
        ],
        out_specs=pl.BlockSpec((tm, Dout), lambda i: (i, 0)),
        out_shape=jax.ShapeDtypeStruct((M, Dout), jnp.bfloat16),
        compiler_params=_PARALLEL_1D,
    )(x2, g.reshape(1, Cin), b.reshape(1, Cin), w, bias.reshape(1, Dout))
    return out.reshape(B, N, Dout)


def pallas_kv_proj(memory, pos, wk, bk, wv, bv):
    B, N, Ckv = memory.shape
    C = wk.shape[1]
    M = B * N
    m2 = memory.reshape(M, Ckv)
    p2 = pos.reshape(M, Ckv)
    tm = _row_tile(M)
    k, v = pl.pallas_call(
        _kv_proj_kernel,
        grid=(pl.cdiv(M, tm),),
        in_specs=[
            pl.BlockSpec((tm, Ckv), lambda i: (i, 0)),
            pl.BlockSpec((tm, Ckv), lambda i: (i, 0)),
            pl.BlockSpec((Ckv, C), lambda i: (0, 0)),
            pl.BlockSpec((1, C), lambda i: (0, 0)),
            pl.BlockSpec((Ckv, C), lambda i: (0, 0)),
            pl.BlockSpec((1, C), lambda i: (0, 0)),
        ],
        out_specs=[pl.BlockSpec((tm, C), lambda i: (i, 0))] * 2,
        out_shape=[jax.ShapeDtypeStruct((M, C), jnp.bfloat16)] * 2,
        compiler_params=_PARALLEL_1D,
    )(m2, p2, wk, bk.reshape(1, C), wv, bv.reshape(1, C))
    return k.reshape(B, N, C), v.reshape(B, N, C)


def pallas_out_residual(attn, wo, bo, res):
    B, N, C = res.shape
    M = B * N
    a2 = attn.reshape(M, C)
    r2 = res.reshape(M, C)
    tm = _row_tile(M)
    out = pl.pallas_call(
        _out_res_kernel,
        grid=(pl.cdiv(M, tm),),
        in_specs=[
            pl.BlockSpec((tm, C), lambda i: (i, 0)),
            pl.BlockSpec((C, C), lambda i: (0, 0)),
            pl.BlockSpec((1, C), lambda i: (0, 0)),
            pl.BlockSpec((tm, C), lambda i: (i, 0)),
        ],
        out_specs=pl.BlockSpec((tm, C), lambda i: (i, 0)),
        out_shape=jax.ShapeDtypeStruct((M, C), res.dtype),
        input_output_aliases={3: 0},
        compiler_params=_PARALLEL_1D,
    )(a2, wo, bo.reshape(1, C), r2)
    return out.reshape(B, N, C)


def pallas_ln_ffn_residual(x, g, b, w1, b1, w2, b2):
    B, N, C = x.shape
    F = w1.shape[1]
    M = B * N
    x2 = x.reshape(M, C)
    tm = _row_tile(M, 256)   # keep (tm, F) hidden activation modest for 64 MiB v7x VMEM
    out = pl.pallas_call(
        _ln_ffn_res_kernel,
        grid=(pl.cdiv(M, tm),),
        in_specs=[
            pl.BlockSpec((tm, C), lambda i: (i, 0)),
            pl.BlockSpec((1, C), lambda i: (0, 0)),
            pl.BlockSpec((1, C), lambda i: (0, 0)),
            pl.BlockSpec((C, F), lambda i: (0, 0)),
            pl.BlockSpec((1, F), lambda i: (0, 0)),
            pl.BlockSpec((F, C), lambda i: (0, 0)),
            pl.BlockSpec((1, C), lambda i: (0, 0)),
        ],
        out_specs=pl.BlockSpec((tm, C), lambda i: (i, 0)),
        out_shape=jax.ShapeDtypeStruct((M, C), x.dtype),
        input_output_aliases={0: 0},
        compiler_params=_PARALLEL_1D,
    )(x2, g.reshape(1, C), b.reshape(1, C), w1, b1.reshape(1, F), w2, b2.reshape(1, C))
    return out.reshape(B, N, C)


def pallas_flash_rope_attention(q, k, v, cos_q, sin_q, cos_k, sin_k, head_nums):
    """Flash-style attention with in-kernel rotate-half RoPE.
    q/k/v: (B, N, C) bf16.  cos/sin tables: (N, dh) f32 (q tables pre-scaled
    by 1/sqrt(dh), sin tables carry the rotation sign)."""
    B, Nq, C = q.shape
    Nk = k.shape[1]
    dh = C // head_nums
    tq = _seq_tile(Nq)
    tk = _seq_tile(Nk)
    grid = (B, pl.cdiv(Nq, tq), Nk // tk)
    kern = partial(_flash_rope_attn_kernel, head_nums=head_nums, dh=dh)
    out = pl.pallas_call(
        kern,
        grid=grid,
        in_specs=[
            pl.BlockSpec((1, tq, C), lambda b, qt, kt: (b, qt, 0)),
            pl.BlockSpec((1, tk, C), lambda b, qt, kt: (b, kt, 0)),
            pl.BlockSpec((1, tk, C), lambda b, qt, kt: (b, kt, 0)),
            pl.BlockSpec((tq, dh), lambda b, qt, kt: (qt, 0)),
            pl.BlockSpec((tq, dh), lambda b, qt, kt: (qt, 0)),
            pl.BlockSpec((tk, dh), lambda b, qt, kt: (kt, 0)),
            pl.BlockSpec((tk, dh), lambda b, qt, kt: (kt, 0)),
        ],
        out_specs=pl.BlockSpec((1, tq, C), lambda b, qt, kt: (b, qt, 0)),
        out_shape=jax.ShapeDtypeStruct((B, Nq, C), jnp.bfloat16),
        scratch_shapes=[
            pltpu.VMEM((tq, head_nums), jnp.float32),   # running max
            pltpu.VMEM((tq, head_nums), jnp.float32),   # running denom
            pltpu.VMEM((tq, C), jnp.float32),           # output accumulator
        ],
        compiler_params=pltpu.CompilerParams(
            dimension_semantics=("parallel", "parallel", "arbitrary")),
    )(q, k, v, cos_q, sin_q, cos_k, sin_k)
    return out


# --------------------- RoPE tables -------------------------------------------

def axial_rope_half_tables(dh, end_x, end_y, theta=10000.0):
    """Half-split (rotate-half) tables matching compute_axial_cis angles.
    Returns cos2 = [cos, cos], sin2 = [-sin, sin], each (N, dh)."""
    idx = jnp.arange(0, dh, 4, dtype=jnp.float32)[: dh // 4]
    freqs = 1.0 / theta ** (idx / dh)
    t = jnp.arange(end_x * end_y, dtype=jnp.float32)
    t_x = t % end_x
    t_y = jnp.floor(t / end_x)
    ang = jnp.concatenate([jnp.outer(t_x, freqs), jnp.outer(t_y, freqs)], axis=-1)
    cos = jnp.cos(ang)
    sin = jnp.sin(ang)
    cos2 = jnp.concatenate([cos, cos], axis=-1).astype(jnp.float32)
    sin2 = jnp.concatenate([-sin, sin], axis=-1).astype(jnp.float32)
    return cos2, sin2


def axial_rope_cos_sin(dim, end_x, end_y, theta=10000.0):
    """Interleaved tables (used only by the pure-JAX reference)."""
    idx = jnp.arange(0, dim, 4, dtype=jnp.float32)[: dim // 4]
    freqs = 1.0 / theta ** (idx / dim)
    t = jnp.arange(end_x * end_y, dtype=jnp.float32)
    t_x = t % end_x
    t_y = jnp.floor(t / end_x)
    ang = jnp.concatenate([jnp.outer(t_x, freqs), jnp.outer(t_y, freqs)], axis=-1)
    cos = jnp.repeat(jnp.cos(ang), 2, axis=-1)
    sin = jnp.repeat(jnp.sin(ang), 2, axis=-1)
    return cos.astype(jnp.float32), sin.astype(jnp.float32)


# --------------------------- full layer forward ------------------------------

@partial(jax.jit, static_argnames=("num_k_exclude_rope", "head_nums"))
def memory_attention_layer_forward(params, tgt, memory, pos, num_k_exclude_rope, head_nums):
    B, Nq, C = tgt.shape
    assert C % head_nums == 0
    dh = C // head_nums
    assert dh % 4 == 0
    side = int(round(math.sqrt(Nq)))
    assert side * side == Nq, "query length must be a perfect square (axial RoPE grid)"
    scale = 1.0 / math.sqrt(dh)

    cos, sin = axial_rope_half_tables(dh, side, side)       # (Nq, dh)
    cos_q = cos * scale                                      # fold 1/sqrt(dh) into q rotation
    sin_q = sin * scale

    Nk = memory.shape[1]
    num_k_rope = Nk - num_k_exclude_rope
    assert num_k_rope >= Nq and num_k_rope % Nq == 0, \
        "rope'd key length must be a positive multiple of the query length"
    r = num_k_rope // Nq
    cos_k_cross = jnp.tile(cos, (r, 1))
    sin_k_cross = jnp.tile(sin, (r, 1))
    if num_k_exclude_rope > 0:   # excluded tail: identity rotation
        cos_k_cross = jnp.concatenate(
            [cos_k_cross, jnp.ones((num_k_exclude_rope, dh), jnp.float32)], axis=0)
        sin_k_cross = jnp.concatenate(
            [sin_k_cross, jnp.zeros((num_k_exclude_rope, dh), jnp.float32)], axis=0)

    # ---- one-time weight prep: de-interleave q/k columns, cast to bf16 ------
    perm = _deinterleave_perm(C, head_nums)
    sa = params["self_attn"]
    wqkv_s = jnp.concatenate([sa["wq"][:, perm], sa["wk"][:, perm], sa["wv"]],
                             axis=1).astype(jnp.bfloat16)
    bqkv_s = jnp.concatenate([sa["bq"][perm], sa["bk"][perm], sa["bv"]], axis=0)
    wo_s = sa["wo"].astype(jnp.bfloat16)

    ca = params["cross_attn"]
    wq_c = ca["wq"][:, perm].astype(jnp.bfloat16)
    bq_c = ca["bq"][perm]
    wk_c = ca["wk"][:, perm].astype(jnp.bfloat16)
    bk_c = ca["bk"][perm]
    wv_c = ca["wv"].astype(jnp.bfloat16)
    wo_c = ca["wo"].astype(jnp.bfloat16)

    w1 = params["w1"].astype(jnp.bfloat16)
    w2 = params["w2"].astype(jnp.bfloat16)

    # ---- self-attention block: LN1 + QKV fused ----
    q, k, v = pallas_ln_qkv(tgt, params["ln1_g"], params["ln1_b"], wqkv_s, bqkv_s)
    attn = pallas_flash_rope_attention(q, k, v, cos_q, sin_q, cos, sin, head_nums)
    tgt = pallas_out_residual(attn, wo_s, sa["bo"], tgt)

    # ---- cross-attention block: LN2 + Q fused, K/V from memory(+pos) ----
    q = pallas_ln_proj(tgt, params["ln2_g"], params["ln2_b"], wq_c, bq_c)
    k, v = pallas_kv_proj(memory, pos, wk_c, bk_c, wv_c, ca["bv"])
    attn = pallas_flash_rope_attention(q, k, v, cos_q, sin_q,
                                       cos_k_cross, sin_k_cross, head_nums)
    tgt = pallas_out_residual(attn, wo_c, ca["bo"], tgt)

    # ---- feed-forward block: LN3 + FFN + residual fused ----
    tgt = pallas_ln_ffn_residual(tgt, params["ln3_g"], params["ln3_b"],
                                 w1, params["b1"], w2, params["b2"])
    return tgt


# ------------------------------ parameters -----------------------------------

def init_params(key, inplanes, kv_inplanes_cross, feedforward_planes):
    keys = iter(jax.random.split(key, 32))

    def lin(din, dout):
        w = jax.random.normal(next(keys), (din, dout), jnp.float32) / math.sqrt(din)
        b = 0.02 * jax.random.normal(next(keys), (dout,), jnp.float32)
        return w, b

    def attn(kv_dim):
        wq, bq = lin(inplanes, inplanes)
        wk, bk = lin(kv_dim, inplanes)
        wv, bv = lin(kv_dim, inplanes)
        wo, bo = lin(inplanes, inplanes)
        return dict(wq=wq, bq=bq, wk=wk, bk=bk, wv=wv, bv=bv, wo=wo, bo=bo)

    w1, b1 = lin(inplanes, feedforward_planes)
    w2, b2 = lin(feedforward_planes, inplanes)

    def ln():
        g = 1.0 + 0.1 * jax.random.normal(next(keys), (inplanes,), jnp.float32)
        b = 0.05 * jax.random.normal(next(keys), (inplanes,), jnp.float32)
        return g, b

    ln1_g, ln1_b = ln()
    ln2_g, ln2_b = ln()
    ln3_g, ln3_b = ln()
    return dict(
        self_attn=attn(inplanes),
        cross_attn=attn(kv_inplanes_cross),
        w1=w1, b1=b1, w2=w2, b2=b2,
        ln1_g=ln1_g, ln1_b=ln1_b,
        ln2_g=ln2_g, ln2_b=ln2_b,
        ln3_g=ln3_g, ln3_b=ln3_b,
    )


# --------------------------- pure-JAX reference -------------------------------

def ref_forward(params, tgt, memory, pos, num_k_exclude_rope, head_nums):
    PH = jax.lax.Precision.HIGHEST
    B, Nq, C = tgt.shape
    dh = C // head_nums
    side = int(round(math.sqrt(Nq)))
    cos_q, sin_q = axial_rope_cos_sin(dh, side, side)
    Nk = memory.shape[1]
    r = (Nk - num_k_exclude_rope) // Nq
    cos_k = jnp.tile(cos_q, (r, 1))
    sin_k = jnp.tile(sin_q, (r, 1))
    if num_k_exclude_rope > 0:
        cos_k = jnp.concatenate([cos_k, jnp.ones((num_k_exclude_rope, dh), jnp.float32)], 0)
        sin_k = jnp.concatenate([sin_k, jnp.zeros((num_k_exclude_rope, dh), jnp.float32)], 0)

    def ln(x, g, b):
        m = jnp.mean(x, -1, keepdims=True)
        v = jnp.mean((x - m) ** 2, -1, keepdims=True)
        return (x - m) / jnp.sqrt(v + LN_EPS) * g + b

    def rope(x, c, s):
        xr = x.reshape(x.shape[:-1] + (x.shape[-1] // 2, 2))
        xs = jnp.stack([-xr[..., 1], xr[..., 0]], -1).reshape(x.shape)
        return x * c + xs * s

    def attn(xq, xk, xv, p, cq, sq, ck, sk):
        q = jnp.dot(xq, p["wq"], precision=PH) + p["bq"]
        k = jnp.dot(xk, p["wk"], precision=PH) + p["bk"]
        v = jnp.dot(xv, p["wv"], precision=PH) + p["bv"]
        nq, nk = q.shape[1], k.shape[1]

        def sh(t, n):
            return t.reshape(B, n, head_nums, dh).transpose(0, 2, 1, 3)

        q, k, v = sh(q, nq), sh(k, nk), sh(v, nk)
        q, k = rope(q, cq, sq), rope(k, ck, sk)
        sc = jnp.einsum("bhqd,bhkd->bhqk", q, k, precision=PH) / math.sqrt(dh)
        pm = jax.nn.softmax(sc, axis=-1)
        o = jnp.einsum("bhqk,bhkd->bhqd", pm, v, precision=PH)
        o = o.transpose(0, 2, 1, 3).reshape(B, nq, C)
        return jnp.dot(o, p["wo"], precision=PH) + p["bo"]

    tgt2 = ln(tgt, params["ln1_g"], params["ln1_b"])
    tgt = tgt + attn(tgt2, tgt2, tgt2, params["self_attn"], cos_q, sin_q, cos_q, sin_q)
    tgt2 = ln(tgt, params["ln2_g"], params["ln2_b"])
    tgt = tgt + attn(tgt2, memory + pos, memory, params["cross_attn"],
                     cos_q, sin_q, cos_k, sin_k)
    tgt2 = ln(tgt, params["ln3_g"], params["ln3_b"])
    h = jnp.maximum(jnp.dot(tgt2, params["w1"], precision=PH) + params["b1"], 0.0)
    tgt = tgt + jnp.dot(h, params["w2"], precision=PH) + params["b2"]
    return tgt


# ---------------------------------- main --------------------------------------

if __name__ == "__main__":
    INPLANES = 64          # model dim (module default 256; small here)
    KV_INPLANES_CROSS = 64 # hardcoded 64 in MemoryAttentionLayer.cross_attn_image
    HEAD_NUMS = 1
    FEEDFORWARD = 128
    B, NQ, NK = 2, 16, 68  # NQ must be a perfect square (4x4 RoPE grid)
    NUM_K_EXCLUDE = 4      # (NK - NUM_K_EXCLUDE) must be a multiple of NQ

    key = jax.random.PRNGKey(0)
    kp, kt, km, kpos = jax.random.split(key, 4)
    params = init_params(kp, INPLANES, KV_INPLANES_CROSS, FEEDFORWARD)
    tgt = jax.random.normal(kt, (B, NQ, INPLANES), jnp.float32)
    memory = jax.random.normal(km, (B, NK, KV_INPLANES_CROSS), jnp.float32)
    pos = 0.1 * jax.random.normal(kpos, (B, NK, KV_INPLANES_CROSS), jnp.float32)

    out = memory_attention_layer_forward(params, tgt, memory, pos,
                                         num_k_exclude_rope=NUM_K_EXCLUDE,
                                         head_nums=HEAD_NUMS)
    out = jax.block_until_ready(out)

    ref = ref_forward(params, tgt, memory, pos, NUM_K_EXCLUDE, HEAD_NUMS)
    assert out.shape == tgt.shape and out.dtype == tgt.dtype
    max_err = float(jnp.max(jnp.abs(out - ref)))
    ref_scale = float(jnp.max(jnp.abs(ref)))
    # bf16 MXU inputs with f32 accumulation -> slightly looser tolerance than pure f32
    assert max_err < 6e-2 or max_err < 2e-2 * ref_scale, \
        f"kernel/reference mismatch: max abs err = {max_err} (ref scale {ref_scale})"
    print("KERNEL_OK")
</pallas_src>

<mosaic_0001>
module attributes {stable_mosaic.version = 11 : i64} {
  func.func @_ln_qkv_kernel(%arg0: i32, %arg1: memref<32x64xf32, #tpu.memory_space<vmem>>, %arg2: memref<1x64xf32, #tpu.memory_space<vmem>>, %arg3: memref<1x64xf32, #tpu.memory_space<vmem>>, %arg4: memref<64x192xbf16, #tpu.memory_space<vmem>>, %arg5: memref<1x192xf32, #tpu.memory_space<vmem>>, %arg6: memref<32x64xbf16, #tpu.memory_space<vmem>>, %arg7: memref<32x64xbf16, #tpu.memory_space<vmem>>, %arg8: memref<32x64xbf16, #tpu.memory_space<vmem>>) attributes {dimension_semantics = [#tpu.dimension_semantics<parallel>], iteration_bounds = array<i64: 1>, scalar_prefetch = 0 : i64, scratch_operands = 0 : i64, tpu.core_type = #tpu.core_type<tc>, window_params = [{transform_indices = @transform_0, window_bounds = array<i64: 32, 64>}, {pipeline_mode = #tpu.pipeline_mode<synchronous>, transform_indices = @transform_1, window_bounds = array<i64: 1, 64>}, {pipeline_mode = #tpu.pipeline_mode<synchronous>, transform_indices = @transform_2, window_bounds = array<i64: 1, 64>}, {pipeline_mode = #tpu.pipeline_mode<synchronous>, transform_indices = @transform_3, window_bounds = array<i64: 64, 192>}, {pipeline_mode = #tpu.pipeline_mode<synchronous>, transform_indices = @transform_4, window_bounds = array<i64: 1, 192>}, {transform_indices = @transform_5, window_bounds = array<i64: 32, 64>}, {transform_indices = @transform_6, window_bounds = array<i64: 32, 64>}, {transform_indices = @transform_7, window_bounds = array<i64: 32, 64>}]} {
    %c0 = arith.constant 0 : index
    %c0_0 = arith.constant 0 : index
    %0 = vector.load %arg1[%c0, %c0_0] : memref<32x64xf32, #tpu.memory_space<vmem>>, vector<32x64xf32>
    %c0_1 = arith.constant 0 : index
    %c0_2 = arith.constant 0 : index
    %1 = vector.load %arg2[%c0_1, %c0_2] : memref<1x64xf32, #tpu.memory_space<vmem>>, vector<1x64xf32>
    %c0_3 = arith.constant 0 : index
    %c0_4 = arith.constant 0 : index
    %2 = vector.load %arg3[%c0_3, %c0_4] : memref<1x64xf32, #tpu.memory_space<vmem>>, vector<1x64xf32>
    %cst = arith.constant dense<0.000000e+00> : vector<32xf32>
    %3 = vector.multi_reduction <add>, %0, %cst [1] : vector<32x64xf32> to vector<32xf32>
    %4 = vector.shape_cast %3 : vector<32xf32> to vector<32x1xf32>
    %cst_5 = arith.constant 6.400000e+01 : f32
    %5 = vector.broadcast %cst_5 : f32 to vector<32x1xf32>
    %6 = arith.divf %4, %5 : vector<32x1xf32>
    %7 = vector.broadcast %6 : vector<32x1xf32> to vector<32x64xf32>
    %8 = arith.subf %0, %7 : vector<32x64xf32>
    %9 = arith.mulf %8, %8 : vector<32x64xf32>
    %cst_6 = arith.constant dense<0.000000e+00> : vector<32xf32>
    %10 = vector.multi_reduction <add>, %9, %cst_6 [1] : vector<32x64xf32> to vector<32xf32>
    %11 = vector.shape_cast %10 : vector<32xf32> to vector<32x1xf32>
    %cst_7 = arith.constant 6.400000e+01 : f32
    %12 = vector.broadcast %cst_7 : f32 to vector<32x1xf32>
    %13 = arith.divf %11, %12 : vector<32x1xf32>
    %cst_8 = arith.constant 9.99999974E-6 : f32
    %14 = vector.broadcast %cst_8 : f32 to vector<32x1xf32>
    %15 = arith.addf %13, %14 : vector<32x1xf32>
    %16 = math.rsqrt %15 : vector<32x1xf32>
    %17 = vector.broadcast %16 : vector<32x1xf32> to vector<32x64xf32>
    %18 = arith.mulf %8, %17 : vector<32x64xf32>
    %19 = vector.broadcast %1 : vector<1x64xf32> to vector<32x64xf32>
    %20 = arith.mulf %18, %19 : vector<32x64xf32>
    %21 = vector.broadcast %2 : vector<1x64xf32> to vector<32x64xf32>
    %22 = arith.addf %20, %21 : vector<32x64xf32>
    %23 = arith.truncf %22 : vector<32x64xf32> to vector<32x64xbf16>
    %c0_9 = arith.constant 0 : index
    %c0_10 = arith.constant 0 : index
    %24 = vector.load %arg4[%c0_9, %c0_10] : memref<64x192xbf16, #tpu.memory_space<vmem>>, vector<64x192xbf16>
    %cst_11 = arith.constant dense<0.000000e+00> : vector<32x192xf32>
    %25 = tpu.matmul %23, %24, %cst_11 {dimension_numbers = #tpu.dot_dimension_numbers<[1], [0], [0], [1], [0, 0, 1, 1], [], []>} : vector<32x64xbf16>, vector<64x192xbf16>, vector<32x192xf32> -> vector<32x192xf32>
    %c0_12 = arith.constant 0 : index
    %c0_13 = arith.constant 0 : index
    %26 = vector.load %arg5[%c0_12, %c0_13] : memref<1x192xf32, #tpu.memory_space<vmem>>, vector<1x192xf32>
    %27 = vector.broadcast %26 : vector<1x192xf32> to vector<32x192xf32>
    %28 = arith.addf %25, %27 : vector<32x192xf32>
    %29 = vector.extract_strided_slice %28 {offsets = [0, 0], sizes = [32, 64], strides = [1, 1]} : vector<32x192xf32> to vector<32x64xf32>
    %30 = arith.truncf %29 : vector<32x64xf32> to vector<32x64xbf16>
    %c0_14 = arith.constant 0 : index
    %c0_15 = arith.constant 0 : index
    %31 = vector.load %arg6[%c0_14, %c0_15] : memref<32x64xbf16, #tpu.memory_space<vmem>>, vector<32x64xbf16>
    tpu.vector_store %arg6[%c0_14, %c0_15], %30 {strides = array<i32>} : memref<32x64xbf16, #tpu.memory_space<vmem>>, vector<32x64xbf16>,
    %32 = vector.extract_strided_slice %28 {offsets = [0, 64], sizes = [32, 64], strides = [1, 1]} : vector<32x192xf32> to vector<32x64xf32>
    %33 = arith.truncf %32 : vector<32x64xf32> to vector<32x64xbf16>
    %c0_16 = arith.constant 0 : index
    %c0_17 = arith.constant 0 : index
    %34 = vector.load %arg7[%c0_16, %c0_17] : memref<32x64xbf16, #tpu.memory_space<vmem>>, vector<32x64xbf16>
    tpu.vector_store %arg7[%c0_16, %c0_17], %33 {strides = array<i32>} : memref<32x64xbf16, #tpu.memory_space<vmem>>, vector<32x64xbf16>,
    %35 = vector.extract_strided_slice %28 {offsets = [0, 128], sizes = [32, 64], strides = [1, 1]} : vector<32x192xf32> to vector<32x64xf32>
    %36 = arith.truncf %35 : vector<32x64xf32> to vector<32x64xbf16>
    %c0_18 = arith.constant 0 : index
    %c0_19 = arith.constant 0 : index
    %37 = vector.load %arg8[%c0_18, %c0_19] : memref<32x64xbf16, #tpu.memory_space<vmem>>, vector<32x64xbf16>
    tpu.vector_store %arg8[%c0_18, %c0_19], %36 {strides = array<i32>} : memref<32x64xbf16, #tpu.memory_space<vmem>>, vector<32x64xbf16>,
    return
  }
  func.func @transform_0(%arg0: i32) -> (i32, i32) {
    %c0_i32 = arith.constant 0 : i32
    %c0_i32_0 = arith.constant 0 : i32
    return %arg0, %c0_i32 : i32, i32
  }
  func.func @transform_1(%arg0: i32) -> (i32, i32) {
    %c0_i32 = arith.constant 0 : i32
    %c0_i32_0 = arith.constant 0 : i32
    %c0_i32_1 = arith.constant 0 : i32
    return %c0_i32, %c0_i32_0 : i32, i32
  }
  func.func @transform_2(%arg0: i32) -> (i32, i32) {
    %c0_i32 = arith.constant 0 : i32
    %c0_i32_0 = arith.constant 0 : i32
    %c0_i32_1 = arith.constant 0 : i32
    return %c0_i32, %c0_i32_0 : i32, i32
  }
  func.func @transform_3(%arg0: i32) -> (i32, i32) {
    %c0_i32 = arith.constant 0 : i32
    %c0_i32_0 = arith.constant 0 : i32
    %c0_i32_1 = arith.constant 0 : i32
    return %c0_i32, %c0_i32_0 : i32, i32
  }
  func.func @transform_4(%arg0: i32) -> (i32, i32) {
    %c0_i32 = arith.constant 0 : i32
    %c0_i32_0 = arith.constant 0 : i32
    %c0_i32_1 = arith.constant 0 : i32
    return %c0_i32, %c0_i32_0 : i32, i32
  }
  func.func @transform_5(%arg0: i32) -> (i32, i32) {
    %c0_i32 = arith.constant 0 : i32
    %c0_i32_0 = arith.constant 0 : i32
    return %arg0, %c0_i32 : i32, i32
  }
  func.func @transform_6(%arg0: i32) -> (i32, i32) {
    %c0_i32 = arith.constant 0 : i32
    %c0_i32_0 = arith.constant 0 : i32
    return %arg0, %c0_i32 : i32, i32
  }
  func.func @transform_7(%arg0: i32) -> (i32, i32) {
    %c0_i32 = arith.constant 0 : i32
    %c0_i32_0 = arith.constant 0 : i32
    return %arg0, %c0_i32 : i32, i32
  }
}

module attributes {stable_mosaic.version = 11 : i64} {
  func.func @_out_res_kernel(%arg0: i32, %arg1: memref<32x64xbf16, #tpu.memory_space<vmem>>, %arg2: memref<64x64xbf16, #tpu.memory_space<vmem>>, %arg3: memref<1x64xf32, #tpu.memory_space<vmem>>, %arg4: memref<32x64xf32, #tpu.memory_space<vmem>>, %arg5: memref<32x64xf32, #tpu.memory_space<vmem>>) attributes {dimension_semantics = [#tpu.dimension_semantics<parallel>], iteration_bounds = array<i64: 1>, scalar_prefetch = 0 : i64, scratch_operands = 0 : i64, tpu.core_type = #tpu.core_type<tc>, window_params = [{transform_indices = @transform_0, window_bounds = array<i64: 32, 64>}, {pipeline_mode = #tpu.pipeline_mode<synchronous>, transform_indices = @transform_1, window_bounds = array<i64: 64, 64>}, {pipeline_mode = #tpu.pipeline_mode<synchronous>, transform_indices = @transform_2, window_bounds = array<i64: 1, 64>}, {transform_indices = @transform_3, window_bounds = array<i64: 32, 64>}, {transform_indices = @transform_4, window_bounds = array<i64: 32, 64>}]} {
    %c0 = arith.constant 0 : index
    %c0_0 = arith.constant 0 : index
    %0 = vector.load %arg1[%c0, %c0_0] : memref<32x64xbf16, #tpu.memory_space<vmem>>, vector<32x64xbf16>
    %c0_1 = arith.constant 0 : index
    %c0_2 = arith.constant 0 : index
    %1 = vector.load %arg2[%c0_1, %c0_2] : memref<64x64xbf16, #tpu.memory_space<vmem>>, vector<64x64xbf16>
    %cst = arith.constant dense<0.000000e+00> : vector<32x64xf32>
    %2 = tpu.matmul %0, %1, %cst {dimension_numbers = #tpu.dot_dimension_numbers<[1], [0], [0], [1], [0, 0, 1, 1], [], []>} : vector<32x64xbf16>, vector<64x64xbf16>, vector<32x64xf32> -> vector<32x64xf32>
    %c0_3 = arith.constant 0 : index
    %c0_4 = arith.constant 0 : index
    %3 = vector.load %arg3[%c0_3, %c0_4] : memref<1x64xf32, #tpu.memory_space<vmem>>, vector<1x64xf32>
    %4 = vector.broadcast %3 : vector<1x64xf32> to vector<32x64xf32>
    %5 = arith.addf %2, %4 : vector<32x64xf32>
    %c0_5 = arith.constant 0 : index
    %c0_6 = arith.constant 0 : index
    %6 = vector.load %arg4[%c0_5, %c0_6] : memref<32x64xf32, #tpu.memory_space<vmem>>, vector<32x64xf32>
    %7 = arith.addf %6, %5 : vector<32x64xf32>
    %c0_7 = arith.constant 0 : index
    %c0_8 = arith.constant 0 : index
    %8 = vector.load %arg5[%c0_7, %c0_8] : memref<32x64xf32, #tpu.memory_space<vmem>>, vector<32x64xf32>
    tpu.vector_store %arg5[%c0_7, %c0_8], %7 {strides = array<i32>} : memref<32x64xf32, #tpu.memory_space<vmem>>, vector<32x64xf32>,
    return
  }
  func.func @transform_0(%arg0: i32) -> (i32, i32) {
    %c0_i32 = arith.constant 0 : i32
    %c0_i32_0 = arith.constant 0 : i32
    return %arg0, %c0_i32 : i32, i32
  }
  func.func @transform_1(%arg0: i32) -> (i32, i32) {
    %c0_i32 = arith.constant 0 : i32
    %c0_i32_0 = arith.constant 0 : i32
    %c0_i32_1 = arith.constant 0 : i32
    return %c0_i32, %c0_i32_0 : i32, i32
  }
  func.func @transform_2(%arg0: i32) -> (i32, i32) {
    %c0_i32 = arith.constant 0 : i32
    %c0_i32_0 = arith.constant 0 : i32
    %c0_i32_1 = arith.constant 0 : i32
    return %c0_i32, %c0_i32_0 : i32, i32
  }
  func.func @transform_3(%arg0: i32) -> (i32, i32) {
    %c0_i32 = arith.constant 0 : i32
    %c0_i32_0 = arith.constant 0 : i32
    return %arg0, %c0_i32 : i32, i32
  }
  func.func @transform_4(%arg0: i32) -> (i32, i32) {
    %c0_i32 = arith.constant 0 : i32
    %c0_i32_0 = arith.constant 0 : i32
    return %arg0, %c0_i32 : i32, i32
  }
}

module attributes {stable_mosaic.version = 11 : i64} {
  func.func @_flash_rope_attn_kernel(%arg0: i32, %arg1: i32, %arg2: i32, %arg3: memref<1x16x64xbf16, #tpu.memory_space<vmem>>, %arg4: memref<1x16x64xbf16, #tpu.memory_space<vmem>>, %arg5: memref<1x16x64xbf16, #tpu.memory_space<vmem>>, %arg6: memref<16x64xf32, #tpu.memory_space<vmem>>, %arg7: memref<16x64xf32, #tpu.memory_space<vmem>>, %arg8: memref<16x64xf32, #tpu.memory_space<vmem>>, %arg9: memref<16x64xf32, #tpu.memory_space<vmem>>, %arg10: memref<1x16x64xbf16, #tpu.memory_space<vmem>>, %arg11: memref<16x1xf32, #tpu.memory_space<vmem>>, %arg12: memref<16x1xf32, #tpu.memory_space<vmem>>, %arg13: memref<16x64xf32, #tpu.memory_space<vmem>>) attributes {dimension_semantics = [#tpu.dimension_semantics<parallel>, #tpu.dimension_semantics<parallel>, #tpu.dimension_semantics<arbitrary>], iteration_bounds = array<i64: 2, 1, 1>, scalar_prefetch = 0 : i64, scratch_operands = 3 : i64, tpu.core_type = #tpu.core_type<tc>, window_params = [{transform_indices = @transform_0, window_bounds = array<i64: 1, 16, 64>}, {transform_indices = @transform_1, window_bounds = array<i64: 1, 16, 64>}, {transform_indices = @transform_2, window_bounds = array<i64: 1, 16, 64>}, {transform_indices = @transform_3, window_bounds = array<i64: 16, 64>}, {transform_indices = @transform_4, window_bounds = array<i64: 16, 64>}, {transform_indices = @transform_5, window_bounds = array<i64: 16, 64>}, {transform_indices = @transform_6, window_bounds = array<i64: 16, 64>}, {transform_indices = @transform_7, window_bounds = array<i64: 1, 16, 64>}]} {
    %c0_i32 = arith.constant 0 : i32
    %0 = arith.cmpi eq, %arg2, %c0_i32 : i32
    %1 = arith.extui %0 : i1 to i32
    %c0_i32_0 = arith.constant 0 : i32
    %2 = arith.cmpi ne, %1, %c0_i32_0 : i32
    scf.if %2 {
      %cst_34 = arith.constant 0xFF800000 : f32
      %56 = vector.broadcast %cst_34 : f32 to vector<16x1xf32>
      %c0_35 = arith.constant 0 : index
      %c0_36 = arith.constant 0 : index
      %57 = vector.load %arg11[%c0_35, %c0_36] : memref<16x1xf32, #tpu.memory_space<vmem>>, vector<16x1xf32>
      tpu.vector_store %arg11[%c0_35, %c0_36], %56 {strides = array<i32>} : memref<16x1xf32, #tpu.memory_space<vmem>>, vector<16x1xf32>,
      %cst_37 = arith.constant 0.000000e+00 : f32
      %58 = vector.broadcast %cst_37 : f32 to vector<16x1xf32>
      %c0_38 = arith.constant 0 : index
      %c0_39 = arith.constant 0 : index
      %59 = vector.load %arg12[%c0_38, %c0_39] : memref<16x1xf32, #tpu.memory_space<vmem>>, vector<16x1xf32>
      tpu.vector_store %arg12[%c0_38, %c0_39], %58 {strides = array<i32>} : memref<16x1xf32, #tpu.memory_space<vmem>>, vector<16x1xf32>,
      %cst_40 = arith.constant 0.000000e+00 : f32
      %60 = vector.broadcast %cst_40 : f32 to vector<16x64xf32>
      %c0_41 = arith.constant 0 : index
      %c0_42 = arith.constant 0 : index
      %61 = vector.load %arg13[%c0_41, %c0_42] : memref<16x64xf32, #tpu.memory_space<vmem>>, vector<16x64xf32>
      tpu.vector_store %arg13[%c0_41, %c0_42], %60 {strides = array<i32>} : memref<16x64xf32, #tpu.memory_space<vmem>>, vector<16x64xf32>,
    } else {
    }
    %c0 = arith.constant 0 : index
    %c0_1 = arith.constant 0 : index
    %c0_2 = arith.constant 0 : index
    %3 = vector.load %arg3[%c0, %c0_1, %c0_2] : memref<1x16x64xbf16, #tpu.memory_space<vmem>>, vector<1x16x64xbf16>
    %4 = vector.shape_cast %3 : vector<1x16x64xbf16> to vector<16x64xbf16>
    %5 = arith.extf %4 : vector<16x64xbf16> to vector<16x64xf32>
    %c0_3 = arith.constant 0 : index
    %c0_4 = arith.constant 0 : index
    %c0_5 = arith.constant 0 : index
    %6 = vector.load %arg4[%c0_3, %c0_4, %c0_5] : memref<1x16x64xbf16, #tpu.memory_space<vmem>>, vector<1x16x64xbf16>
    %7 = vector.shape_cast %6 : vector<1x16x64xbf16> to vector<16x64xbf16>
    %8 = arith.extf %7 : vector<16x64xbf16> to vector<16x64xf32>
    %c0_6 = arith.constant 0 : index
    %c0_7 = arith.constant 0 : index
    %c0_8 = arith.constant 0 : index
    %9 = vector.load %arg5[%c0_6, %c0_7, %c0_8] : memref<1x16x64xbf16, #tpu.memory_space<vmem>>, vector<1x16x64xbf16>
    %10 = vector.shape_cast %9 : vector<1x16x64xbf16> to vector<16x64xbf16>
    %c0_9 = arith.constant 0 : index
    %c0_10 = arith.constant 0 : index
    %11 = vector.load %arg6[%c0_9, %c0_10] : memref<16x64xf32, #tpu.memory_space<vmem>>, vector<16x64xf32>
    %c0_11 = arith.constant 0 : index
    %c0_12 = arith.constant 0 : index
    %12 = vector.load %arg7[%c0_11, %c0_12] : memref<16x64xf32, #tpu.memory_space<vmem>>, vector<16x64xf32>
    %c0_13 = arith.constant 0 : index
    %c0_14 = arith.constant 0 : index
    %13 = vector.load %arg8[%c0_13, %c0_14] : memref<16x64xf32, #tpu.memory_space<vmem>>, vector<16x64xf32>
    %c0_15 = arith.constant 0 : index
    %c0_16 = arith.constant 0 : index
    %14 = vector.load %arg9[%c0_15, %c0_16] : memref<16x64xf32, #tpu.memory_space<vmem>>, vector<16x64xf32>
    %15 = arith.mulf %5, %11 : vector<16x64xf32>
    %16 = vector.extract_strided_slice %5 {offsets = [0, 32], sizes = [16, 32], strides = [1, 1]} : vector<16x64xf32> to vector<16x32xf32>
    %17 = vector.extract_strided_slice %5 {offsets = [0, 0], sizes = [16, 32], strides = [1, 1]} : vector<16x64xf32> to vector<16x32xf32>
    %18 = tpu.concatenate %16, %17 in 1 : vector<16x32xf32>, vector<16x32xf32> -> vector<16x64xf32>
    %19 = arith.mulf %18, %12 : vector<16x64xf32>
    %20 = arith.addf %15, %19 : vector<16x64xf32>
    %21 = arith.mulf %8, %13 : vector<16x64xf32>
    %22 = vector.extract_strided_slice %8 {offsets = [0, 32], sizes = [16, 32], strides = [1, 1]} : vector<16x64xf32> to vector<16x32xf32>
    %23 = vector.extract_strided_slice %8 {offsets = [0, 0], sizes = [16, 32], strides = [1, 1]} : vector<16x64xf32> to vector<16x32xf32>
    %24 = tpu.concatenate %22, %23 in 1 : vector<16x32xf32>, vector<16x32xf32> -> vector<16x64xf32>
    %25 = arith.mulf %24, %14 : vector<16x64xf32>
    %26 = arith.addf %21, %25 : vector<16x64xf32>
    %27 = arith.truncf %20 : vector<16x64xf32> to vector<16x64xbf16>
    %28 = arith.truncf %26 : vector<16x64xf32> to vector<16x64xbf16>
    %cst = arith.constant dense<0.000000e+00> : vector<16x16xf32>
    %29 = tpu.matmul %27, %28, %cst {dimension_numbers = #tpu.dot_dimension_numbers<[1], [1], [0], [0], [0, 0, 1, 0], [], []>} : vector<16x64xbf16>, vector<16x64xbf16>, vector<16x16xf32> -> vector<16x16xf32>
    %c0_17 = arith.constant 0 : index
    %c0_18 = arith.constant 0 : index
    %30 = vector.load %arg11[%c0_17, %c0_18] : memref<16x1xf32, #tpu.memory_space<vmem>>, vector<16x1xf32>
    %cst_19 = arith.constant dense<0xFF800000> : vector<16xf32>
    %31 = vector.multi_reduction <maximumf>, %29, %cst_19 [1] : vector<16x16xf32> to vector<16xf32>
    %32 = vector.shape_cast %31 : vector<16xf32> to vector<16x1xf32>
    %33 = arith.maximumf %30, %32 : vector<16x1xf32>
    %34 = arith.subf %30, %33 : vector<16x1xf32>
    %35 = math.exp %34 : vector<16x1xf32>
    %36 = vector.broadcast %33 : vector<16x1xf32> to vector<16x16xf32>
    %37 = arith.subf %29, %36 : vector<16x16xf32>
    %38 = math.exp %37 : vector<16x16xf32>
    %c0_20 = arith.constant 0 : index
    %c0_21 = arith.constant 0 : index
    %39 = vector.load %arg12[%c0_20, %c0_21] : memref<16x1xf32, #tpu.memory_space<vmem>>, vector<16x1xf32>
    %40 = arith.mulf %35, %39 : vector<16x1xf32>
    %cst_22 = arith.constant dense<0.000000e+00> : vector<16xf32>
    %41 = vector.multi_reduction <add>, %38, %cst_22 [1] : vector<16x16xf32> to vector<16xf32>
    %42 = vector.shape_cast %41 : vector<16xf32> to vector<16x1xf32>
    %43 = arith.addf %40, %42 : vector<16x1xf32>
    %c0_23 = arith.constant 0 : index
    %c0_24 = arith.constant 0 : index
    %44 = vector.load %arg12[%c0_23, %c0_24] : memref<16x1xf32, #tpu.memory_space<vmem>>, vector<16x1xf32>
    tpu.vector_store %arg12[%c0_23, %c0_24], %43 {strides = array<i32>} : memref<16x1xf32, #tpu.memory_space<vmem>>, vector<16x1xf32>,
    %c0_25 = arith.constant 0 : index
    %c0_26 = arith.constant 0 : index
    %45 = vector.load %arg13[%c0_25, %c0_26] : memref<16x64xf32, #tpu.memory_space<vmem>>, vector<16x64xf32>
    %46 = vector.broadcast %35 : vector<16x1xf32> to vector<16x64xf32>
    %47 = arith.mulf %46, %45 : vector<16x64xf32>
    %48 = arith.truncf %38 : vector<16x16xf32> to vector<16x16xbf16>
    %cst_27 = arith.constant dense<0.000000e+00> : vector<16x64xf32>
    %49 = tpu.matmul %48, %10, %cst_27 {dimension_numbers = #tpu.dot_dimension_numbers<[1], [0], [0], [1], [0, 0, 1, 1], [], []>} : vector<16x16xbf16>, vector<16x64xbf16>, vector<16x64xf32> -> vector<16x64xf32>
    %50 = arith.addf %47, %49 : vector<16x64xf32>
    %c0_28 = arith.constant 0 : index
    %c0_29 = arith.constant 0 : index
    %51 = vector.load %arg13[%c0_28, %c0_29] : memref<16x64xf32, #tpu.memory_space<vmem>>, vector<16x64xf32>
    tpu.vector_store %arg13[%c0_28, %c0_29], %50 {strides = array<i32>} : memref<16x64xf32, #tpu.memory_space<vmem>>, vector<16x64xf32>,
    %c0_30 = arith.constant 0 : index
    %c0_31 = arith.constant 0 : index
    %52 = vector.load %arg11[%c0_30, %c0_31] : memref<16x1xf32, #tpu.memory_space<vmem>>, vector<16x1xf32>
    tpu.vector_store %arg11[%c0_30, %c0_31], %33 {strides = array<i32>} : memref<16x1xf32, #tpu.memory_space<vmem>>, vector<16x1xf32>,
    %c0_i32_32 = arith.constant 0 : i32
    %53 = arith.cmpi eq, %arg2, %c0_i32_32 : i32
    %54 = arith.extui %53 : i1 to i32
    %c0_i32_33 = arith.constant 0 : i32
    %55 = arith.cmpi ne, %54, %c0_i32_33 : i32
    scf.if %55 {
      %c0_34 = arith.constant 0 : index
      %c0_35 = arith.constant 0 : index
      %56 = vector.load %arg12[%c0_34, %c0_35] : memref<16x1xf32, #tpu.memory_space<vmem>>, vector<16x1xf32>
      %57 = tpu.reciprocal %56 {approx = true} : vector<16x1xf32> -> vector<16x1xf32>
      %c0_36 = arith.constant 0 : index
      %c0_37 = arith.constant 0 : index
      %58 = vector.load %arg13[%c0_36, %c0_37] : memref<16x64xf32, #tpu.memory_space<vmem>>, vector<16x64xf32>
      %59 = vector.broadcast %57 : vector<16x1xf32> to vector<16x64xf32>
      %60 = arith.mulf %58, %59 : vector<16x64xf32>
      %61 = arith.truncf %60 : vector<16x64xf32> to vector<16x64xbf16>
      %c0_38 = arith.constant 0 : index
      %c0_39 = arith.constant 0 : index
      %c0_40 = arith.constant 0 : index
      %62 = vector.load %arg10[%c0_38, %c0_39, %c0_40] : memref<1x16x64xbf16, #tpu.memory_space<vmem>>, vector<1x16x64xbf16>
      %63 = vector.shape_cast %62 : vector<1x16x64xbf16> to vector<16x64xbf16>
      %64 = vector.shape_cast %61 : vector<16x64xbf16> to vector<1x16x64xbf16>
      tpu.vector_store %arg10[%c0_38, %c0_39, %c0_40], %64 {strides = array<i32>} : memref<1x16x64xbf16, #tpu.memory_space<vmem>>, vector<1x16x64xbf16>,
    } else {
    }
    return
  }
  func.func @transform_0(%arg0: i32, %arg1: i32, %arg2: i32) -> (i32, i32, i32) {
    %c0_i32 = arith.constant 0 : i32
    %c0_i32_0 = arith.constant 0 : i32
    return %arg0, %arg1, %c0_i32 : i32, i32, i32
  }
  func.func @transform_1(%arg0: i32, %arg1: i32, %arg2: i32) -> (i32, i32, i32) {
    %c0_i32 = arith.constant 0 : i32
    %c0_i32_0 = arith.constant 0 : i32
    return %arg0, %arg2, %c0_i32 : i32, i32, i32
  }
  func.func @transform_2(%arg0: i32, %arg1: i32, %arg2: i32) -> (i32, i32, i32) {
    %c0_i32 = arith.constant 0 : i32
    %c0_i32_0 = arith.constant 0 : i32
    return %arg0, %arg2, %c0_i32 : i32, i32, i32
  }
  func.func @transform_3(%arg0: i32, %arg1: i32, %arg2: i32) -> (i32, i32) {
    %c0_i32 = arith.constant 0 : i32
    %c0_i32_0 = arith.constant 0 : i32
    return %arg1, %c0_i32 : i32, i32
  }
  func.func @transform_4(%arg0: i32, %arg1: i32, %arg2: i32) -> (i32, i32) {
    %c0_i32 = arith.constant 0 : i32
    %c0_i32_0 = arith.constant 0 : i32
    return %arg1, %c0_i32 : i32, i32
  }
  func.func @transform_5(%arg0: i32, %arg1: i32, %arg2: i32) -> (i32, i32) {
    %c0_i32 = arith.constant 0 : i32
    %c0_i32_0 = arith.constant 0 : i32
    return %arg2, %c0_i32 : i32, i32
  }
  func.func @transform_6(%arg0: i32, %arg1: i32, %arg2: i32) -> (i32, i32) {
    %c0_i32 = arith.constant 0 : i32
    %c0_i32_0 = arith.constant 0 : i32
    return %arg2, %c0_i32 : i32, i32
  }
  func.func @transform_7(%arg0: i32, %arg1: i32, %arg2: i32) -> (i32, i32, i32) {
    %c0_i32 = arith.constant 0 : i32
    %c0_i32_0 = arith.constant 0 : i32
    return %arg0, %arg1, %c0_i32 : i32, i32, i32
  }
}

module attributes {stable_mosaic.version = 11 : i64} {
  func.func @_ln_proj_kernel(%arg0: i32, %arg1: memref<32x64xf32, #tpu.memory_space<vmem>>, %arg2: memref<1x64xf32, #tpu.memory_space<vmem>>, %arg3: memref<1x64xf32, #tpu.memory_space<vmem>>, %arg4: memref<64x64xbf16, #tpu.memory_space<vmem>>, %arg5: memref<1x64xf32, #tpu.memory_space<vmem>>, %arg6: memref<32x64xbf16, #tpu.memory_space<vmem>>) attributes {dimension_semantics = [#tpu.dimension_semantics<parallel>], iteration_bounds = array<i64: 1>, scalar_prefetch = 0 : i64, scratch_operands = 0 : i64, tpu.core_type = #tpu.core_type<tc>, window_params = [{transform_indices = @transform_0, window_bounds = array<i64: 32, 64>}, {pipeline_mode = #tpu.pipeline_mode<synchronous>, transform_indices = @transform_1, window_bounds = array<i64: 1, 64>}, {pipeline_mode = #tpu.pipeline_mode<synchronous>, transform_indices = @transform_2, window_bounds = array<i64: 1, 64>}, {pipeline_mode = #tpu.pipeline_mode<synchronous>, transform_indices = @transform_3, window_bounds = array<i64: 64, 64>}, {pipeline_mode = #tpu.pipeline_mode<synchronous>, transform_indices = @transform_4, window_bounds = array<i64: 1, 64>}, {transform_indices = @transform_5, window_bounds = array<i64: 32, 64>}]} {
    %c0 = arith.constant 0 : index
    %c0_0 = arith.constant 0 : index
    %0 = vector.load %arg1[%c0, %c0_0] : memref<32x64xf32, #tpu.memory_space<vmem>>, vector<32x64xf32>
    %c0_1 = arith.constant 0 : index
    %c0_2 = arith.constant 0 : index
    %1 = vector.load %arg2[%c0_1, %c0_2] : memref<1x64xf32, #tpu.memory_space<vmem>>, vector<1x64xf32>
    %c0_3 = arith.constant 0 : index
    %c0_4 = arith.constant 0 : index
    %2 = vector.load %arg3[%c0_3, %c0_4] : memref<1x64xf32, #tpu.memory_space<vmem>>, vector<1x64xf32>
    %cst = arith.constant dense<0.000000e+00> : vector<32xf32>
    %3 = vector.multi_reduction <add>, %0, %cst [1] : vector<32x64xf32> to vector<32xf32>
    %4 = vector.shape_cast %3 : vector<32xf32> to vector<32x1xf32>
    %cst_5 = arith.constant 6.400000e+01 : f32
    %5 = vector.broadcast %cst_5 : f32 to vector<32x1xf32>
    %6 = arith.divf %4, %5 : vector<32x1xf32>
    %7 = vector.broadcast %6 : vector<32x1xf32> to vector<32x64xf32>
    %8 = arith.subf %0, %7 : vector<32x64xf32>
    %9 = arith.mulf %8, %8 : vector<32x64xf32>
    %cst_6 = arith.constant dense<0.000000e+00> : vector<32xf32>
    %10 = vector.multi_reduction <add>, %9, %cst_6 [1] : vector<32x64xf32> to vector<32xf32>
    %11 = vector.shape_cast %10 : vector<32xf32> to vector<32x1xf32>
    %cst_7 = arith.constant 6.400000e+01 : f32
    %12 = vector.broadcast %cst_7 : f32 to vector<32x1xf32>
    %13 = arith.divf %11, %12 : vector<32x1xf32>
    %cst_8 = arith.constant 9.99999974E-6 : f32
    %14 = vector.broadcast %cst_8 : f32 to vector<32x1xf32>
    %15 = arith.addf %13, %14 : vector<32x1xf32>
    %16 = math.rsqrt %15 : vector<32x1xf32>
    %17 = vector.broadcast %16 : vector<32x1xf32> to vector<32x64xf32>
    %18 = arith.mulf %8, %17 : vector<32x64xf32>
    %19 = vector.broadcast %1 : vector<1x64xf32> to vector<32x64xf32>
    %20 = arith.mulf %18, %19 : vector<32x64xf32>
    %21 = vector.broadcast %2 : vector<1x64xf32> to vector<32x64xf32>
    %22 = arith.addf %20, %21 : vector<32x64xf32>
    %23 = arith.truncf %22 : vector<32x64xf32> to vector<32x64xbf16>
    %c0_9 = arith.constant 0 : index
    %c0_10 = arith.constant 0 : index
    %24 = vector.load %arg4[%c0_9, %c0_10] : memref<64x64xbf16, #tpu.memory_space<vmem>>, vector<64x64xbf16>
    %cst_11 = arith.constant dense<0.000000e+00> : vector<32x64xf32>
    %25 = tpu.matmul %23, %24, %cst_11 {dimension_numbers = #tpu.dot_dimension_numbers<[1], [0], [0], [1], [0, 0, 1, 1], [], []>} : vector<32x64xbf16>, vector<64x64xbf16>, vector<32x64xf32> -> vector<32x64xf32>
    %c0_12 = arith.constant 0 : index
    %c0_13 = arith.constant 0 : index
    %26 = vector.load %arg5[%c0_12, %c0_13] : memref<1x64xf32, #tpu.memory_space<vmem>>, vector<1x64xf32>
    %27 = vector.broadcast %26 : vector<1x64xf32> to vector<32x64xf32>
    %28 = arith.addf %25, %27 : vector<32x64xf32>
    %29 = arith.truncf %28 : vector<32x64xf32> to vector<32x64xbf16>
    %c0_14 = arith.constant 0 : index
    %c0_15 = arith.constant 0 : index
    %30 = vector.load %arg6[%c0_14, %c0_15] : memref<32x64xbf16, #tpu.memory_space<vmem>>, vector<32x64xbf16>
    tpu.vector_store %arg6[%c0_14, %c0_15], %29 {strides = array<i32>} : memref<32x64xbf16, #tpu.memory_space<vmem>>, vector<32x64xbf16>,
    return
  }
  func.func @transform_0(%arg0: i32) -> (i32, i32) {
    %c0_i32 = arith.constant 0 : i32
    %c0_i32_0 = arith.constant 0 : i32
    return %arg0, %c0_i32 : i32, i32
  }
  func.func @transform_1(%arg0: i32) -> (i32, i32) {
    %c0_i32 = arith.constant 0 : i32
    %c0_i32_0 = arith.constant 0 : i32
    %c0_i32_1 = arith.constant 0 : i32
    return %c0_i32, %c0_i32_0 : i32, i32
  }
  func.func @transform_2(%arg0: i32) -> (i32, i32) {
    %c0_i32 = arith.constant 0 : i32
    %c0_i32_0 = arith.constant 0 : i32
    %c0_i32_1 = arith.constant 0 : i32
    return %c0_i32, %c0_i32_0 : i32, i32
  }
  func.func @transform_3(%arg0: i32) -> (i32, i32) {
    %c0_i32 = arith.constant 0 : i32
    %c0_i32_0 = arith.constant 0 : i32
    %c0_i32_1 = arith.constant 0 : i32
    return %c0_i32, %c0_i32_0 : i32, i32
  }
  func.func @transform_4(%arg0: i32) -> (i32, i32) {
    %c0_i32 = arith.constant 0 : i32
    %c0_i32_0 = arith.constant 0 : i32
    %c0_i32_1 = arith.constant 0 : i32
    return %c0_i32, %c0_i32_0 : i32, i32
  }
  func.func @transform_5(%arg0: i32) -> (i32, i32) {
    %c0_i32 = arith.constant 0 : i32
    %c0_i32_0 = arith.constant 0 : i32
    return %arg0, %c0_i32 : i32, i32
  }
}

module attributes {stable_mosaic.version = 11 : i64} {
  func.func @_kv_proj_kernel(%arg0: i32, %arg1: memref<136x64xf32, #tpu.memory_space<vmem>>, %arg2: memref<136x64xf32, #tpu.memory_space<vmem>>, %arg3: memref<64x64xbf16, #tpu.memory_space<vmem>>, %arg4: memref<1x64xf32, #tpu.memory_space<vmem>>, %arg5: memref<64x64xbf16, #tpu.memory_space<vmem>>, %arg6: memref<1x64xf32, #tpu.memory_space<vmem>>, %arg7: memref<136x64xbf16, #tpu.memory_space<vmem>>, %arg8: memref<136x64xbf16, #tpu.memory_space<vmem>>) attributes {dimension_semantics = [#tpu.dimension_semantics<parallel>], iteration_bounds = array<i64: 1>, scalar_prefetch = 0 : i64, scratch_operands = 0 : i64, tpu.core_type = #tpu.core_type<tc>, window_params = [{transform_indices = @transform_0, window_bounds = array<i64: 136, 64>}, {transform_indices = @transform_1, window_bounds = array<i64: 136, 64>}, {pipeline_mode = #tpu.pipeline_mode<synchronous>, transform_indices = @transform_2, window_bounds = array<i64: 64, 64>}, {pipeline_mode = #tpu.pipeline_mode<synchronous>, transform_indices = @transform_3, window_bounds = array<i64: 1, 64>}, {pipeline_mode = #tpu.pipeline_mode<synchronous>, transform_indices = @transform_4, window_bounds = array<i64: 64, 64>}, {pipeline_mode = #tpu.pipeline_mode<synchronous>, transform_indices = @transform_5, window_bounds = array<i64: 1, 64>}, {transform_indices = @transform_6, window_bounds = array<i64: 136, 64>}, {transform_indices = @transform_7, window_bounds = array<i64: 136, 64>}]} {
    %c0 = arith.constant 0 : index
    %c0_0 = arith.constant 0 : index
    %0 = vector.load %arg1[%c0, %c0_0] : memref<136x64xf32, #tpu.memory_space<vmem>>, vector<136x64xf32>
    %c0_1 = arith.constant 0 : index
    %c0_2 = arith.constant 0 : index
    %1 = vector.load %arg2[%c0_1, %c0_2] : memref<136x64xf32, #tpu.memory_space<vmem>>, vector<136x64xf32>
    %2 = arith.addf %0, %1 : vector<136x64xf32>
    %3 = arith.truncf %2 : vector<136x64xf32> to vector<136x64xbf16>
    %c0_3 = arith.constant 0 : index
    %c0_4 = arith.constant 0 : index
    %4 = vector.load %arg3[%c0_3, %c0_4] : memref<64x64xbf16, #tpu.memory_space<vmem>>, vector<64x64xbf16>
    %cst = arith.constant dense<0.000000e+00> : vector<136x64xf32>
    %5 = tpu.matmul %3, %4, %cst {dimension_numbers = #tpu.dot_dimension_numbers<[1], [0], [0], [1], [0, 0, 1, 1], [], []>} : vector<136x64xbf16>, vector<64x64xbf16>, vector<136x64xf32> -> vector<136x64xf32>
    %c0_5 = arith.constant 0 : index
    %c0_6 = arith.constant 0 : index
    %6 = vector.load %arg4[%c0_5, %c0_6] : memref<1x64xf32, #tpu.memory_space<vmem>>, vector<1x64xf32>
    %7 = vector.broadcast %6 : vector<1x64xf32> to vector<136x64xf32>
    %8 = arith.addf %5, %7 : vector<136x64xf32>
    %9 = arith.truncf %0 : vector<136x64xf32> to vector<136x64xbf16>
    %c0_7 = arith.constant 0 : index
    %c0_8 = arith.constant 0 : index
    %10 = vector.load %arg5[%c0_7, %c0_8] : memref<64x64xbf16, #tpu.memory_space<vmem>>, vector<64x64xbf16>
    %cst_9 = arith.constant dense<0.000000e+00> : vector<136x64xf32>
    %11 = tpu.matmul %9, %10, %cst_9 {dimension_numbers = #tpu.dot_dimension_numbers<[1], [0], [0], [1], [0, 0, 1, 1], [], []>} : vector<136x64xbf16>, vector<64x64xbf16>, vector<136x64xf32> -> vector<136x64xf32>
    %c0_10 = arith.constant 0 : index
    %c0_11 = arith.constant 0 : index
    %12 = vector.load %arg6[%c0_10, %c0_11] : memref<1x64xf32, #tpu.memory_space<vmem>>, vector<1x64xf32>
    %13 = vector.broadcast %12 : vector<1x64xf32> to vector<136x64xf32>
    %14 = arith.addf %11, %13 : vector<136x64xf32>
    %15 = arith.truncf %8 : vector<136x64xf32> to vector<136x64xbf16>
    %c0_12 = arith.constant 0 : index
    %c0_13 = arith.constant 0 : index
    %16 = vector.load %arg7[%c0_12, %c0_13] : memref<136x64xbf16, #tpu.memory_space<vmem>>, vector<136x64xbf16>
    tpu.vector_store %arg7[%c0_12, %c0_13], %15 {strides = array<i32>} : memref<136x64xbf16, #tpu.memory_space<vmem>>, vector<136x64xbf16>,
    %17 = arith.truncf %14 : vector<136x64xf32> to vector<136x64xbf16>
    %c0_14 = arith.constant 0 : index
    %c0_15 = arith.constant 0 : index
    %18 = vector.load %arg8[%c0_14, %c0_15] : memref<136x64xbf16, #tpu.memory_space<vmem>>, vector<136x64xbf16>
    tpu.vector_store %arg8[%c0_14, %c0_15], %17 {strides = array<i32>} : memref<136x64xbf16, #tpu.memory_space<vmem>>, vector<136x64xbf16>,
    return
  }
  func.func @transform_0(%arg0: i32) -> (i32, i32) {
    %c0_i32 = arith.constant 0 : i32
    %c0_i32_0 = arith.constant 0 : i32
    return %arg0, %c0_i32 : i32, i32
  }
  func.func @transform_1(%arg0: i32) -> (i32, i32) {
    %c0_i32 = arith.constant 0 : i32
    %c0_i32_0 = arith.constant 0 : i32
    return %arg0, %c0_i32 : i32, i32
  }
  func.func @transform_2(%arg0: i32) -> (i32, i32) {
    %c0_i32 = arith.constant 0 : i32
    %c0_i32_0 = arith.constant 0 : i32
    %c0_i32_1 = arith.constant 0 : i32
    return %c0_i32, %c0_i32_0 : i32, i32
  }
  func.func @transform_3(%arg0: i32) -> (i32, i32) {
    %c0_i32 = arith.constant 0 : i32
    %c0_i32_0 = arith.constant 0 : i32
    %c0_i32_1 = arith.constant 0 : i32
    return %c0_i32, %c0_i32_0 : i32, i32
  }
  func.func @transform_4(%arg0: i32) -> (i32, i32) {
    %c0_i32 = arith.constant 0 : i32
    %c0_i32_0 = arith.constant 0 : i32
    %c0_i32_1 = arith.constant 0 : i32
    return %c0_i32, %c0_i32_0 : i32, i32
  }
  func.func @transform_5(%arg0: i32) -> (i32, i32) {
    %c0_i32 = arith.constant 0 : i32
    %c0_i32_0 = arith.constant 0 : i32
    %c0_i32_1 = arith.constant 0 : i32
    return %c0_i32, %c0_i32_0 : i32, i32
  }
  func.func @transform_6(%arg0: i32) -> (i32, i32) {
    %c0_i32 = arith.constant 0 : i32
    %c0_i32_0 = arith.constant 0 : i32
    return %arg0, %c0_i32 : i32, i32
  }
  func.func @transform_7(%arg0: i32) -> (i32, i32) {
    %c0_i32 = arith.constant 0 : i32
    %c0_i32_0 = arith.constant 0 : i32
    return %arg0, %c0_i32 : i32, i32
  }
}

module attributes {stable_mosaic.version = 11 : i64} {
  func.func @_flash_rope_attn_kernel(%arg0: i32, %arg1: i32, %arg2: i32, %arg3: memref<1x16x64xbf16, #tpu.memory_space<vmem>>, %arg4: memref<1x68x64xbf16, #tpu.memory_space<vmem>>, %arg5: memref<1x68x64xbf16, #tpu.memory_space<vmem>>, %arg6: memref<16x64xf32, #tpu.memory_space<vmem>>, %arg7: memref<16x64xf32, #tpu.memory_space<vmem>>, %arg8: memref<68x64xf32, #tpu.memory_space<vmem>>, %arg9: memref<68x64xf32, #tpu.memory_space<vmem>>, %arg10: memref<1x16x64xbf16, #tpu.memory_space<vmem>>, %arg11: memref<16x1xf32, #tpu.memory_space<vmem>>, %arg12: memref<16x1xf32, #tpu.memory_space<vmem>>, %arg13: memref<16x64xf32, #tpu.memory_space<vmem>>) attributes {dimension_semantics = [#tpu.dimension_semantics<parallel>, #tpu.dimension_semantics<parallel>, #tpu.dimension_semantics<arbitrary>], iteration_bounds = array<i64: 2, 1, 1>, scalar_prefetch = 0 : i64, scratch_operands = 3 : i64, tpu.core_type = #tpu.core_type<tc>, window_params = [{transform_indices = @transform_0, window_bounds = array<i64: 1, 16, 64>}, {transform_indices = @transform_1, window_bounds = array<i64: 1, 68, 64>}, {transform_indices = @transform_2, window_bounds = array<i64: 1, 68, 64>}, {transform_indices = @transform_3, window_bounds = array<i64: 16, 64>}, {transform_indices = @transform_4, window_bounds = array<i64: 16, 64>}, {transform_indices = @transform_5, window_bounds = array<i64: 68, 64>}, {transform_indices = @transform_6, window_bounds = array<i64: 68, 64>}, {transform_indices = @transform_7, window_bounds = array<i64: 1, 16, 64>}]} {
    %c0_i32 = arith.constant 0 : i32
    %0 = arith.cmpi eq, %arg2, %c0_i32 : i32
    %1 = arith.extui %0 : i1 to i32
    %c0_i32_0 = arith.constant 0 : i32
    %2 = arith.cmpi ne, %1, %c0_i32_0 : i32
    scf.if %2 {
      %cst_34 = arith.constant 0xFF800000 : f32
      %56 = vector.broadcast %cst_34 : f32 to vector<16x1xf32>
      %c0_35 = arith.constant 0 : index
      %c0_36 = arith.constant 0 : index
      %57 = vector.load %arg11[%c0_35, %c0_36] : memref<16x1xf32, #tpu.memory_space<vmem>>, vector<16x1xf32>
      tpu.vector_store %arg11[%c0_35, %c0_36], %56 {strides = array<i32>} : memref<16x1xf32, #tpu.memory_space<vmem>>, vector<16x1xf32>,
      %cst_37 = arith.constant 0.000000e+00 : f32
      %58 = vector.broadcast %cst_37 : f32 to vector<16x1xf32>
      %c0_38 = arith.constant 0 : index
      %c0_39 = arith.constant 0 : index
      %59 = vector.load %arg12[%c0_38, %c0_39] : memref<16x1xf32, #tpu.memory_space<vmem>>, vector<16x1xf32>
      tpu.vector_store %arg12[%c0_38, %c0_39], %58 {strides = array<i32>} : memref<16x1xf32, #tpu.memory_space<vmem>>, vector<16x1xf32>,
      %cst_40 = arith.constant 0.000000e+00 : f32
      %60 = vector.broadcast %cst_40 : f32 to vector<16x64xf32>
      %c0_41 = arith.constant 0 : index
      %c0_42 = arith.constant 0 : index
      %61 = vector.load %arg13[%c0_41, %c0_42] : memref<16x64xf32, #tpu.memory_space<vmem>>, vector<16x64xf32>
      tpu.vector_store %arg13[%c0_41, %c0_42], %60 {strides = array<i32>} : memref<16x64xf32, #tpu.memory_space<vmem>>, vector<16x64xf32>,
    } else {
    }
    %c0 = arith.constant 0 : index
    %c0_1 = arith.constant 0 : index
    %c0_2 = arith.constant 0 : index
    %3 = vector.load %arg3[%c0, %c0_1, %c0_2] : memref<1x16x64xbf16, #tpu.memory_space<vmem>>, vector<1x16x64xbf16>
    %4 = vector.shape_cast %3 : vector<1x16x64xbf16> to vector<16x64xbf16>
    %5 = arith.extf %4 : vector<16x64xbf16> to vector<16x64xf32>
    %c0_3 = arith.constant 0 : index
    %c0_4 = arith.constant 0 : index
    %c0_5 = arith.constant 0 : index
    %6 = vector.load %arg4[%c0_3, %c0_4, %c0_5] : memref<1x68x64xbf16, #tpu.memory_space<vmem>>, vector<1x68x64xbf16>
    %7 = vector.shape_cast %6 : vector<1x68x64xbf16> to vector<68x64xbf16>
    %8 = arith.extf %7 : vector<68x64xbf16> to vector<68x64xf32>
    %c0_6 = arith.constant 0 : index
    %c0_7 = arith.constant 0 : index
    %c0_8 = arith.constant 0 : index
    %9 = vector.load %arg5[%c0_6, %c0_7, %c0_8] : memref<1x68x64xbf16, #tpu.memory_space<vmem>>, vector<1x68x64xbf16>
    %10 = vector.shape_cast %9 : vector<1x68x64xbf16> to vector<68x64xbf16>
    %c0_9 = arith.constant 0 : index
    %c0_10 = arith.constant 0 : index
    %11 = vector.load %arg6[%c0_9, %c0_10] : memref<16x64xf32, #tpu.memory_space<vmem>>, vector<16x64xf32>
    %c0_11 = arith.constant 0 : index
    %c0_12 = arith.constant 0 : index
    %12 = vector.load %arg7[%c0_11, %c0_12] : memref<16x64xf32, #tpu.memory_space<vmem>>, vector<16x64xf32>
    %c0_13 = arith.constant 0 : index
    %c0_14 = arith.constant 0 : index
    %13 = vector.load %arg8[%c0_13, %c0_14] : memref<68x64xf32, #tpu.memory_space<vmem>>, vector<68x64xf32>
    %c0_15 = arith.constant 0 : index
    %c0_16 = arith.constant 0 : index
    %14 = vector.load %arg9[%c0_15, %c0_16] : memref<68x64xf32, #tpu.memory_space<vmem>>, vector<68x64xf32>
    %15 = arith.mulf %5, %11 : vector<16x64xf32>
    %16 = vector.extract_strided_slice %5 {offsets = [0, 32], sizes = [16, 32], strides = [1, 1]} : vector<16x64xf32> to vector<16x32xf32>
    %17 = vector.extract_strided_slice %5 {offsets = [0, 0], sizes = [16, 32], strides = [1, 1]} : vector<16x64xf32> to vector<16x32xf32>
    %18 = tpu.concatenate %16, %17 in 1 : vector<16x32xf32>, vector<16x32xf32> -> vector<16x64xf32>
    %19 = arith.mulf %18, %12 : vector<16x64xf32>
    %20 = arith.addf %15, %19 : vector<16x64xf32>
    %21 = arith.mulf %8, %13 : vector<68x64xf32>
    %22 = vector.extract_strided_slice %8 {offsets = [0, 32], sizes = [68, 32], strides = [1, 1]} : vector<68x64xf32> to vector<68x32xf32>
    %23 = vector.extract_strided_slice %8 {offsets = [0, 0], sizes = [68, 32], strides = [1, 1]} : vector<68x64xf32> to vector<68x32xf32>
    %24 = tpu.concatenate %22, %23 in 1 : vector<68x32xf32>, vector<68x32xf32> -> vector<68x64xf32>
    %25 = arith.mulf %24, %14 : vector<68x64xf32>
    %26 = arith.addf %21, %25 : vector<68x64xf32>
    %27 = arith.truncf %20 : vector<16x64xf32> to vector<16x64xbf16>
    %28 = arith.truncf %26 : vector<68x64xf32> to vector<68x64xbf16>
    %cst = arith.constant dense<0.000000e+00> : vector<16x68xf32>
    %29 = tpu.matmul %27, %28, %cst {dimension_numbers = #tpu.dot_dimension_numbers<[1], [1], [0], [0], [0, 0, 1, 0], [], []>} : vector<16x64xbf16>, vector<68x64xbf16>, vector<16x68xf32> -> vector<16x68xf32>
    %c0_17 = arith.constant 0 : index
    %c0_18 = arith.constant 0 : index
    %30 = vector.load %arg11[%c0_17, %c0_18] : memref<16x1xf32, #tpu.memory_space<vmem>>, vector<16x1xf32>
    %cst_19 = arith.constant dense<0xFF800000> : vector<16xf32>
    %31 = vector.multi_reduction <maximumf>, %29, %cst_19 [1] : vector<16x68xf32> to vector<16xf32>
    %32 = vector.shape_cast %31 : vector<16xf32> to vector<16x1xf32>
    %33 = arith.maximumf %30, %32 : vector<16x1xf32>
    %34 = arith.subf %30, %33 : vector<16x1xf32>
    %35 = math.exp %34 : vector<16x1xf32>
    %36 = vector.broadcast %33 : vector<16x1xf32> to vector<16x68xf32>
    %37 = arith.subf %29, %36 : vector<16x68xf32>
    %38 = math.exp %37 : vector<16x68xf32>
    %c0_20 = arith.constant 0 : index
    %c0_21 = arith.constant 0 : index
    %39 = vector.load %arg12[%c0_20, %c0_21] : memref<16x1xf32, #tpu.memory_space<vmem>>, vector<16x1xf32>
    %40 = arith.mulf %35, %39 : vector<16x1xf32>
    %cst_22 = arith.constant dense<0.000000e+00> : vector<16xf32>
    %41 = vector.multi_reduction <add>, %38, %cst_22 [1] : vector<16x68xf32> to vector<16xf32>
    %42 = vector.shape_cast %41 : vector<16xf32> to vector<16x1xf32>
    %43 = arith.addf %40, %42 : vector<16x1xf32>
    %c0_23 = arith.constant 0 : index
    %c0_24 = arith.constant 0 : index
    %44 = vector.load %arg12[%c0_23, %c0_24] : memref<16x1xf32, #tpu.memory_space<vmem>>, vector<16x1xf32>
    tpu.vector_store %arg12[%c0_23, %c0_24], %43 {strides = array<i32>} : memref<16x1xf32, #tpu.memory_space<vmem>>, vector<16x1xf32>,
    %c0_25 = arith.constant 0 : index
    %c0_26 = arith.constant 0 : index
    %45 = vector.load %arg13[%c0_25, %c0_26] : memref<16x64xf32, #tpu.memory_space<vmem>>, vector<16x64xf32>
    %46 = vector.broadcast %35 : vector<16x1xf32> to vector<16x64xf32>
    %47 = arith.mulf %46, %45 : vector<16x64xf32>
    %48 = arith.truncf %38 : vector<16x68xf32> to vector<16x68xbf16>
    %cst_27 = arith.constant dense<0.000000e+00> : vector<16x64xf32>
    %49 = tpu.matmul %48, %10, %cst_27 {dimension_numbers = #tpu.dot_dimension_numbers<[1], [0], [0], [1], [0, 0, 1, 1], [], []>} : vector<16x68xbf16>, vector<68x64xbf16>, vector<16x64xf32> -> vector<16x64xf32>
    %50 = arith.addf %47, %49 : vector<16x64xf32>
    %c0_28 = arith.constant 0 : index
    %c0_29 = arith.constant 0 : index
    %51 = vector.load %arg13[%c0_28, %c0_29] : memref<16x64xf32, #tpu.memory_space<vmem>>, vector<16x64xf32>
    tpu.vector_store %arg13[%c0_28, %c0_29], %50 {strides = array<i32>} : memref<16x64xf32, #tpu.memory_space<vmem>>, vector<16x64xf32>,
    %c0_30 = arith.constant 0 : index
    %c0_31 = arith.constant 0 : index
    %52 = vector.load %arg11[%c0_30, %c0_31] : memref<16x1xf32, #tpu.memory_space<vmem>>, vector<16x1xf32>
    tpu.vector_store %arg11[%c0_30, %c0_31], %33 {strides = array<i32>} : memref<16x1xf32, #tpu.memory_space<vmem>>, vector<16x1xf32>,
    %c0_i32_32 = arith.constant 0 : i32
    %53 = arith.cmpi eq, %arg2, %c0_i32_32 : i32
    %54 = arith.extui %53 : i1 to i32
    %c0_i32_33 = arith.constant 0 : i32
    %55 = arith.cmpi ne, %54, %c0_i32_33 : i32
    scf.if %55 {
      %c0_34 = arith.constant 0 : index
      %c0_35 = arith.constant 0 : index
      %56 = vector.load %arg12[%c0_34, %c0_35] : memref<16x1xf32, #tpu.memory_space<vmem>>, vector<16x1xf32>
      %57 = tpu.reciprocal %56 {approx = true} : vector<16x1xf32> -> vector<16x1xf32>
      %c0_36 = arith.constant 0 : index
      %c0_37 = arith.constant 0 : index
      %58 = vector.load %arg13[%c0_36, %c0_37] : memref<16x64xf32, #tpu.memory_space<vmem>>, vector<16x64xf32>
      %59 = vector.broadcast %57 : vector<16x1xf32> to vector<16x64xf32>
      %60 = arith.mulf %58, %59 : vector<16x64xf32>
      %61 = arith.truncf %60 : vector<16x64xf32> to vector<16x64xbf16>
      %c0_38 = arith.constant 0 : index
      %c0_39 = arith.constant 0 : index
      %c0_40 = arith.constant 0 : index
      %62 = vector.load %arg10[%c0_38, %c0_39, %c0_40] : memref<1x16x64xbf16, #tpu.memory_space<vmem>>, vector<1x16x64xbf16>
      %63 = vector.shape_cast %62 : vector<1x16x64xbf16> to vector<16x64xbf16>
      %64 = vector.shape_cast %61 : vector<16x64xbf16> to vector<1x16x64xbf16>
      tpu.vector_store %arg10[%c0_38, %c0_39, %c0_40], %64 {strides = array<i32>} : memref<1x16x64xbf16, #tpu.memory_space<vmem>>, vector<1x16x64xbf16>,
    } else {
    }
    return
  }
  func.func @transform_0(%arg0: i32, %arg1: i32, %arg2: i32) -> (i32, i32, i32) {
    %c0_i32 = arith.constant 0 : i32
    %c0_i32_0 = arith.constant 0 : i32
    return %arg0, %arg1, %c0_i32 : i32, i32, i32
  }
  func.func @transform_1(%arg0: i32, %arg1: i32, %arg2: i32) -> (i32, i32, i32) {
    %c0_i32 = arith.constant 0 : i32
    %c0_i32_0 = arith.constant 0 : i32
    return %arg0, %arg2, %c0_i32 : i32, i32, i32
  }
  func.func @transform_2(%arg0: i32, %arg1: i32, %arg2: i32) -> (i32, i32, i32) {
    %c0_i32 = arith.constant 0 : i32
    %c0_i32_0 = arith.constant 0 : i32
    return %arg0, %arg2, %c0_i32 : i32, i32, i32
  }
  func.func @transform_3(%arg0: i32, %arg1: i32, %arg2: i32) -> (i32, i32) {
    %c0_i32 = arith.constant 0 : i32
    %c0_i32_0 = arith.constant 0 : i32
    return %arg1, %c0_i32 : i32, i32
  }
  func.func @transform_4(%arg0: i32, %arg1: i32, %arg2: i32) -> (i32, i32) {
    %c0_i32 = arith.constant 0 : i32
    %c0_i32_0 = arith.constant 0 : i32
    return %arg1, %c0_i32 : i32, i32
  }
  func.func @transform_5(%arg0: i32, %arg1: i32, %arg2: i32) -> (i32, i32) {
    %c0_i32 = arith.constant 0 : i32
    %c0_i32_0 = arith.constant 0 : i32
    return %arg2, %c0_i32 : i32, i32
  }
  func.func @transform_6(%arg0: i32, %arg1: i32, %arg2: i32) -> (i32, i32) {
    %c0_i32 = arith.constant 0 : i32
    %c0_i32_0 = arith.constant 0 : i32
    return %arg2, %c0_i32 : i32, i32
  }
  func.func @transform_7(%arg0: i32, %arg1: i32, %arg2: i32) -> (i32, i32, i32) {
    %c0_i32 = arith.constant 0 : i32
    %c0_i32_0 = arith.constant 0 : i32
    return %arg0, %arg1, %c0_i32 : i32, i32, i32
  }
}

module attributes {stable_mosaic.version = 11 : i64} {
  func.func @_ln_ffn_res_kernel(%arg0: i32, %arg1: memref<32x64xf32, #tpu.memory_space<vmem>>, %arg2: memref<1x64xf32, #tpu.memory_space<vmem>>, %arg3: memref<1x64xf32, #tpu.memory_space<vmem>>, %arg4: memref<64x128xbf16, #tpu.memory_space<vmem>>, %arg5: memref<1x128xf32, #tpu.memory_space<vmem>>, %arg6: memref<128x64xbf16, #tpu.memory_space<vmem>>, %arg7: memref<1x64xf32, #tpu.memory_space<vmem>>, %arg8: memref<32x64xf32, #tpu.memory_space<vmem>>) attributes {dimension_semantics = [#tpu.dimension_semantics<parallel>], iteration_bounds = array<i64: 1>, scalar_prefetch = 0 : i64, scratch_operands = 0 : i64, tpu.core_type = #tpu.core_type<tc>, window_params = [{transform_indices = @transform_0, window_bounds = array<i64: 32, 64>}, {pipeline_mode = #tpu.pipeline_mode<synchronous>, transform_indices = @transform_1, window_bounds = array<i64: 1, 64>}, {pipeline_mode = #tpu.pipeline_mode<synchronous>, transform_indices = @transform_2, window_bounds = array<i64: 1, 64>}, {pipeline_mode = #tpu.pipeline_mode<synchronous>, transform_indices = @transform_3, window_bounds = array<i64: 64, 128>}, {pipeline_mode = #tpu.pipeline_mode<synchronous>, transform_indices = @transform_4, window_bounds = array<i64: 1, 128>}, {pipeline_mode = #tpu.pipeline_mode<synchronous>, transform_indices = @transform_5, window_bounds = array<i64: 128, 64>}, {pipeline_mode = #tpu.pipeline_mode<synchronous>, transform_indices = @transform_6, window_bounds = array<i64: 1, 64>}, {transform_indices = @transform_7, window_bounds = array<i64: 32, 64>}]} {
    %c0 = arith.constant 0 : index
    %c0_0 = arith.constant 0 : index
    %0 = vector.load %arg1[%c0, %c0_0] : memref<32x64xf32, #tpu.memory_space<vmem>>, vector<32x64xf32>
    %c0_1 = arith.constant 0 : index
    %c0_2 = arith.constant 0 : index
    %1 = vector.load %arg2[%c0_1, %c0_2] : memref<1x64xf32, #tpu.memory_space<vmem>>, vector<1x64xf32>
    %c0_3 = arith.constant 0 : index
    %c0_4 = arith.constant 0 : index
    %2 = vector.load %arg3[%c0_3, %c0_4] : memref<1x64xf32, #tpu.memory_space<vmem>>, vector<1x64xf32>
    %cst = arith.constant dense<0.000000e+00> : vector<32xf32>
    %3 = vector.multi_reduction <add>, %0, %cst [1] : vector<32x64xf32> to vector<32xf32>
    %4 = vector.shape_cast %3 : vector<32xf32> to vector<32x1xf32>
    %cst_5 = arith.constant 6.400000e+01 : f32
    %5 = vector.broadcast %cst_5 : f32 to vector<32x1xf32>
    %6 = arith.divf %4, %5 : vector<32x1xf32>
    %7 = vector.broadcast %6 : vector<32x1xf32> to vector<32x64xf32>
    %8 = arith.subf %0, %7 : vector<32x64xf32>
    %9 = arith.mulf %8, %8 : vector<32x64xf32>
    %cst_6 = arith.constant dense<0.000000e+00> : vector<32xf32>
    %10 = vector.multi_reduction <add>, %9, %cst_6 [1] : vector<32x64xf32> to vector<32xf32>
    %11 = vector.shape_cast %10 : vector<32xf32> to vector<32x1xf32>
    %cst_7 = arith.constant 6.400000e+01 : f32
    %12 = vector.broadcast %cst_7 : f32 to vector<32x1xf32>
    %13 = arith.divf %11, %12 : vector<32x1xf32>
    %cst_8 = arith.constant 9.99999974E-6 : f32
    %14 = vector.broadcast %cst_8 : f32 to vector<32x1xf32>
    %15 = arith.addf %13, %14 : vector<32x1xf32>
    %16 = math.rsqrt %15 : vector<32x1xf32>
    %17 = vector.broadcast %16 : vector<32x1xf32> to vector<32x64xf32>
    %18 = arith.mulf %8, %17 : vector<32x64xf32>
    %19 = vector.broadcast %1 : vector<1x64xf32> to vector<32x64xf32>
    %20 = arith.mulf %18, %19 : vector<32x64xf32>
    %21 = vector.broadcast %2 : vector<1x64xf32> to vector<32x64xf32>
    %22 = arith.addf %20, %21 : vector<32x64xf32>
    %23 = arith.truncf %22 : vector<32x64xf32> to vector<32x64xbf16>
    %c0_9 = arith.constant 0 : index
    %c0_10 = arith.constant 0 : index
    %24 = vector.load %arg4[%c0_9, %c0_10] : memref<64x128xbf16, #tpu.memory_space<vmem>>, vector<64x128xbf16>
    %cst_11 = arith.constant dense<0.000000e+00> : vector<32x128xf32>
    %25 = tpu.matmul %23, %24, %cst_11 {dimension_numbers = #tpu.dot_dimension_numbers<[1], [0], [0], [1], [0, 0, 1, 1], [], []>} : vector<32x64xbf16>, vector<64x128xbf16>, vector<32x128xf32> -> vector<32x128xf32>
    %c0_12 = arith.constant 0 : index
    %c0_13 = arith.constant 0 : index
    %26 = vector.load %arg5[%c0_12, %c0_13] : memref<1x128xf32, #tpu.memory_space<vmem>>, vector<1x128xf32>
    %27 = vector.broadcast %26 : vector<1x128xf32> to vector<32x128xf32>
    %28 = arith.addf %25, %27 : vector<32x128xf32>
    %cst_14 = arith.constant 0.000000e+00 : f32
    %29 = vector.broadcast %cst_14 : f32 to vector<32x128xf32>
    %30 = arith.maximumf %28, %29 : vector<32x128xf32>
    %31 = arith.truncf %30 : vector<32x128xf32> to vector<32x128xbf16>
    %c0_15 = arith.constant 0 : index
    %c0_16 = arith.constant 0 : index
    %32 = vector.load %arg6[%c0_15, %c0_16] : memref<128x64xbf16, #tpu.memory_space<vmem>>, vector<128x64xbf16>
    %cst_17 = arith.constant dense<0.000000e+00> : vector<32x64xf32>
    %33 = tpu.matmul %31, %32, %cst_17 {dimension_numbers = #tpu.dot_dimension_numbers<[1], [0], [0], [1], [0, 0, 1, 1], [], []>} : vector<32x128xbf16>, vector<128x64xbf16>, vector<32x64xf32> -> vector<32x64xf32>
    %c0_18 = arith.constant 0 : index
    %c0_19 = arith.constant 0 : index
    %34 = vector.load %arg7[%c0_18, %c0_19] : memref<1x64xf32, #tpu.memory_space<vmem>>, vector<1x64xf32>
    %35 = vector.broadcast %34 : vector<1x64xf32> to vector<32x64xf32>
    %36 = arith.addf %33, %35 : vector<32x64xf32>
    %37 = arith.addf %0, %36 : vector<32x64xf32>
    %c0_20 = arith.constant 0 : index
    %c0_21 = arith.constant 0 : index
    %38 = vector.load %arg8[%c0_20, %c0_21] : memref<32x64xf32, #tpu.memory_space<vmem>>, vector<32x64xf32>
    tpu.vector_store %arg8[%c0_20, %c0_21], %37 {strides = array<i32>} : memref<32x64xf32, #tpu.memory_space<vmem>>, vector<32x64xf32>,
    return
  }
  func.func @transform_0(%arg0: i32) -> (i32, i32) {
    %c0_i32 = arith.constant 0 : i32
    %c0_i32_0 = arith.constant 0 : i32
    return %arg0, %c0_i32 : i32, i32
  }
  func.func @transform_1(%arg0: i32) -> (i32, i32) {
    %c0_i32 = arith.constant 0 : i32
    %c0_i32_0 = arith.constant 0 : i32
    %c0_i32_1 = arith.constant 0 : i32
    return %c0_i32, %c0_i32_0 : i32, i32
  }
  func.func @transform_2(%arg0: i32) -> (i32, i32) {
    %c0_i32 = arith.constant 0 : i32
    %c0_i32_0 = arith.constant 0 : i32
    %c0_i32_1 = arith.constant 0 : i32
    return %c0_i32, %c0_i32_0 : i32, i32
  }
  func.func @transform_3(%arg0: i32) -> (i32, i32) {
    %c0_i32 = arith.constant 0 : i32
    %c0_i32_0 = arith.constant 0 : i32
    %c0_i32_1 = arith.constant 0 : i32
    return %c0_i32, %c0_i32_0 : i32, i32
  }
  func.func @transform_4(%arg0: i32) -> (i32, i32) {
    %c0_i32 = arith.constant 0 : i32
    %c0_i32_0 = arith.constant 0 : i32
    %c0_i32_1 = arith.constant 0 : i32
    return %c0_i32, %c0_i32_0 : i32, i32
  }
  func.func @transform_5(%arg0: i32) -> (i32, i32) {
    %c0_i32 = arith.constant 0 : i32
    %c0_i32_0 = arith.constant 0 : i32
    %c0_i32_1 = arith.constant 0 : i32
    return %c0_i32, %c0_i32_0 : i32, i32
  }
  func.func @transform_6(%arg0: i32) -> (i32, i32) {
    %c0_i32 = arith.constant 0 : i32
    %c0_i32_0 = arith.constant 0 : i32
    %c0_i32_1 = arith.constant 0 : i32
    return %c0_i32, %c0_i32_0 : i32, i32
  }
  func.func @transform_7(%arg0: i32) -> (i32, i32) {
    %c0_i32 = arith.constant 0 : i32
    %c0_i32_0 = arith.constant 0 : i32
    return %arg0, %c0_i32 : i32, i32
  }
}

</mosaic_0001>

<bundles_post_ra>
// kernel: memory_attention_layer_forward.8
= control target key start
LH: loop header
LB: loop body
LE: loop exit
PB: predicated region body
PF: predicated region fallthrough
CT: control target
= control target key end

     0   :  { %vm30_vm0 = vcmask 523264   ;;  %v352_v36 = vmov 0   ;;  %vm241_vm1 = vcmask 519168   ;;  %s517_s0 = inlined_call_operand.vmem [shape: f32[32,64], index: 0, kind: input, shape index: {}]   ;;  %s518_s3 = inlined_call_operand.vmem [shape: bf16[64,192], index: 3, kind: input, shape index: {}]   ;;  %s519_s1 = inlined_call_operand.vmem [shape: f32[1,64], index: 1, kind: input, shape index: {}]   ;;  %s520_s2 = inlined_call_operand.vmem [shape: f32[1,64], index: 2, kind: input, shape index: {}]   ;;  %s521_s4 = inlined_call_operand.vmem [shape: f32[1,192], index: 4, kind: input, shape index: {}]   ;;  %s522_s5 = inlined_call_operand.vmem [shape: bf16[32,64], index: 5, kind: output, shape index: {0}]   ;;  %s523_s7 = inlined_call_operand.vmem [shape: bf16[32,64], index: 7, kind: output, shape index: {2}]   ;;  %s524_s6 = inlined_call_operand.vmem [shape: bf16[32,64], index: 6, kind: output, shape index: {1}]  }
   0x1   :  { %v24_v0 = vld [vmem:[%s517_s0] sm:$0xff]  ;;  %v26_v1 = vld [vmem:[%s517_s0 + $0x10] sm:$0xff]  ;;  %v25_v2 = vld [vmem:[%s517_s0 + $0x8] sm:$0xff]  ;;  %204 = vmatprep.mubr.bf16.mxu0 %v352_v36  ;;  %214 = vmatprep.mubr.bf16.mxu1 %v352_v36 }
   0x2   :  { %v31_v3 = vsel %vm30_vm0, %v24_v0, 0.0  ;;  %v37_v4 = vsel %vm30_vm0, %v26_v1, 0.0  ;;  %v27_v5 = vld [vmem:[%s517_s0 + $0x18] sm:$0xff]  ;;  %v34_v6 = vsel %vm30_vm0, %v25_v2, 0.0  ;;  %v332_v28 = vld [vmem:[%s518_s3 + $0x4] ss:$8 sps:$4 sm:$0xff]  }
   0x3   :  { %32 = vadd.xlane.f32.xlu0 %v31_v3  ;;  %38 = vadd.xlane.f32.xlu1 %v37_v4  ;;  %v40_v7 = vsel %vm30_vm0, %v27_v5, 0.0  ;;  %v334_v29 = vld [vmem:[%s518_s3] ss:$8 sps:$4 sm:$0xff]   ;;  %v335_v30 = vld [vmem:[%s518_s3 + $0x14] ss:$8 sps:$4 sm:$0xff]  }
   0x4   :  { %172 = vmatprep.subr.bf16.mxu0 %v332_v28  ;;  %322 = vmatprep.subr.bf16.mxu1 %v332_v28  ;;  %v337_v31 = vld [vmem:[%s518_s3 + $0x10] ss:$8 sps:$4 sm:$0xff]   ;;  %v338_v32 = vld [vmem:[%s518_s3 + $0x24] ss:$8 sps:$4 sm:$0xff]   ;;  %v340_v33 = vld [vmem:[%s518_s3 + $0x20] ss:$8 sps:$4 sm:$0xff]  }
   0x5   :  { %173 = vmatpush1.bf16.msra.mxu0 %v334_v29  ;;  %326 = vmatpush1.bf16.msra.mxu1 %v334_v29  ;;  %v341_v34 = vld [vmem:[%s518_s3 + $0x34] ss:$8 sps:$4 sm:$0xff]   ;;  %v343_v35 = vld [vmem:[%s518_s3 + $0x30] ss:$8 sps:$4 sm:$0xff]   ;;  %v294_v51 = vld [vmem:[%s519_s1] ss:$0 sm:$0xff] }
   0x6   :  { %174 = vmatprep.subr.bf16.mxu0 %v335_v30  ;;  %323 = vmatprep.subr.bf16.mxu1 %v335_v30  ;;  %v295_v57 = vld [vmem:[%s520_s2] ss:$0 sm:$0xff] }
   0x7   :  { %35 = vadd.xlane.f32.xlu0 %v34_v6  ;;  %41 = vadd.xlane.f32.xlu1 %v40_v7 }
   0x9   :  { %175 = vmatpush1.bf16.msra.mxu0 %v337_v31  ;;  %327 = vmatpush1.bf16.msra.mxu1 %v337_v31 }
   0xa   :  { %176 = vmatprep.subr.bf16.mxu0 %v338_v32  ;;  %324 = vmatprep.subr.bf16.mxu1 %v338_v32 }
   0xd   :  { %177 = vmatpush1.bf16.msra.mxu0 %v340_v33  ;;  %328 = vmatpush1.bf16.msra.mxu1 %v340_v33 }
   0xe   :  { %178 = vmatprep.subr.bf16.mxu0 %v341_v34  ;;  %325 = vmatprep.subr.bf16.mxu1 %v341_v34 }
  0x11   :  { %179 = vmatpush1.bf16.msra.mxu0 %v343_v35  ;;  %329 = vmatpush1.bf16.msra.mxu1 %v343_v35 }
  0x90   :  { %v33_v8 = vpop.xlane.xlu0 %32  ;;  %v39_v9 = vpop.xlane.xlu1 %38 }
  0x91   :  { %v44_v10 = vmul.f32 0.015625, %v33_v8  ;;  %v46_v11 = vmul.f32 0.015625, %v39_v9  ;;  %v114_v8 = vld [vmem:[%s521_s4] sm:$0x3]  ;;  %s353_s4 = smov 64  }
  0x93   :  { %v410_v12 = vsub.f32 %v24_v0, %v44_v10  ;;  %v412_v13 = vsub.f32 %v26_v1, %v46_v11 }
  0x94   :  { %v36_v14 = vpop.xlane.xlu0 %35  ;;  %v42_v15 = vpop.xlane.xlu1 %41 }
  0x95   :  { %v45_v16 = vmul.f32 0.015625, %v36_v14  ;;  %v47_v17 = vmul.f32 0.015625, %v42_v15  ;;  %v52_v18 = vmul.f32 %v410_v12, %v410_v12  ;;  %v54_v19 = vmul.f32 %v412_v13, %v412_v13 }
  0x97   :  { %v418_v20 = vsub.f32 %v25_v2, %v45_v16  ;;  %v420_v21 = vsub.f32 %v27_v5, %v47_v17  ;;  %v56_v22 = vsel %vm30_vm0, %v52_v18, 0.0  ;;  %v62_v23 = vsel %vm30_vm0, %v54_v19, 0.0 }
  0x98   :  { %57 = vadd.xlane.f32.xlu0 %v56_v22  ;;  %v116_v5 = vlaneseq }
  0x99   :  { %v53_v24 = vmul.f32 %v418_v20, %v418_v20  ;;  %v55_v25 = vmul.f32 %v420_v21, %v420_v21 }
  0x9a   :  { %v117_v6 = vshrl.u32 %v116_v5, 7 }
  0x9b   :  { %v59_v26 = vsel %vm30_vm0, %v53_v24, 0.0  ;;  %v65_v27 = vsel %vm30_vm0, %v55_v25, 0.0 }
  0x9c   :  { %63 = vadd.xlane.f32.xlu0 %v62_v23  ;;  %60 = vadd.xlane.f32.xlu1 %v59_v26  ;;  %v118_v7 = vsub.s32 0, %v117_v6  ;;  %v122_v9 = vsub.s32 1, %v117_v6 }
  0x9e   :  { %v119_v10 = vrot.slane %v114_v8, %v118_v7  ;;  %v123_v11 = vrot.slane %v114_v8, %v122_v9 }
  0xa0   :  { %66 = vadd.xlane.f32.xlu1 %v65_v27 }
 0x125   :  { %v58_v37 = vpop.xlane.xlu0 %57 }
 0x126   :  { %v68_v38 = vmul.f32 0.015625, %v58_v37 }
 0x128   :  { %v72_v39 = vadd.f32 1e-05, %v68_v38 }
 0x129   :  { %v61_v40 = vpop.xlane.xlu1 %60  ;;  %v64_v41 = vpop.xlane.xlu0 %63 }
 0x12a   :  { %344 = vrsqrt.f32 %v72_v39  ;;  %v69_v42 = vmul.f32 0.015625, %v61_v40  ;;  %v70_v43 = vmul.f32 0.015625, %v64_v41 }
 0x12c   :  { %v73_v44 = vadd.f32 1e-05, %v69_v42  ;;  %v74_v45 = vadd.f32 1e-05, %v70_v43 }
 0x12d   :  { %v67_v46 = vpop.xlane.xlu1 %66 }
 0x12e   :  { %346 = vrsqrt.f32 %v73_v44  ;;  %v71_v47 = vmul.f32 0.015625, %v67_v46 }
 0x12f   :  { %348 = vrsqrt.f32 %v74_v45 }
 0x130   :  { %v75_v48 = vadd.f32 1e-05, %v71_v47 }
 0x132   :  { %350 = vrsqrt.f32 %v75_v48 }
 0x134   :  { %v345_v49 = vpop.eup %344 }
 0x135   :  { %v80_v50 = vmul.f32 %v345_v49, %v410_v12 }
 0x137   :  { %v90_v55 = vmul.f32 %v294_v51, %v80_v50 }
 0x138   :  { %v347_v52 = vpop.eup %346 }
 0x139   :  { %v349_v53 = vpop.eup %348  ;;  %v81_v54 = vmul.f32 %v347_v52, %v418_v20  ;;  %v100_v61 = vadd.f32 %v295_v57, %v90_v55 }
 0x13a   :  { %v82_v56 = vmul.f32 %v349_v53, %v412_v13 }
 0x13b   :  { %v91_v58 = vmul.f32 %v294_v51, %v81_v54 }
 0x13c   :  { %v351_v59 = vpop.eup %350  ;;  %v92_v63 = vmul.f32 %v294_v51, %v82_v56 }
 0x13d   :  { %v83_v60 = vmul.f32 %v351_v59, %v420_v21  ;;  %v101_v62 = vadd.f32 %v295_v57, %v91_v58 }
 0x13e   :  { %v102_v2 = vadd.f32 %v295_v57, %v92_v63 }
 0x13f   :  { %v104_v0 = vpack.c.bf16 %v101_v62, %v100_v61  ;;  %v93_v1 = vmul.f32 %v294_v51, %v83_v60 }
 0x141   :  { %304 = vmatmul.mubr.msk.bf16.vlgmr.msra.gmra.mrb[0].mxu0 %vm30_vm0, %v104_v0  ;;  %v103_v3 = vadd.f32 %v295_v57, %v93_v1 }
 0x143   :  { %v105_v4 = vpack.c.bf16 %v103_v3, %v102_v2 }
 0x145   :  { %305 = vmatmul.mubr.msk.bf16.vlgmr.msra.gmra.mrb[0].mxu1 %vm30_vm0, %v105_v4 }
 0x214   :  { %v206_v12 = vpop.f32.mrb[0].mxu0 }
 0x215   :  { %v207_v13 = vadd.f32 %v206_v12, %v119_v10  ;;  %v208_v14 = vpop.f32.mrb[1].mxu0 }
 0x216   :  { %v209_v15 = vadd.f32 %v208_v14, %v123_v11  ;;  %v210_v16 = vpop.f32.mrb[2].mxu0 }
 0x217   :  { %v314_v17 = vpack.c.bf16 %v207_v13, %v207_v13  ;;  %v211_v18 = vadd.f32 %v210_v16, %v119_v10  ;;  %v212_v19 = vpop.f32.mrb[3].mxu0 }
 0x218   :  { %v318_v20 = vpack.c.bf16 %v209_v15, %v209_v15  ;;  %v213_v21 = vadd.f32 %v212_v19, %v123_v11  ;;  %v216_v22 = vpop.f32.mrb[0].mxu1 }
 0x219   :  { %242 = vst.msk [vmem:[%s522_s5] sm:$0xf] %vm241_vm1, %v314_v17  ;;  %v315_v23 = vpack.c.bf16 %v211_v18, %v211_v18  ;;  %v217_v24 = vadd.f32 %v216_v22, %v119_v10  ;;  %246 = vrot.lane.b32.xlu0 %v314_v17, %s353_s4  ;;  %v218_v25 = vpop.f32.mrb[1].mxu1 }
 0x21a   :  { %278 = vst.msk [vmem:[%s523_s7] sm:$0xf] %vm241_vm1, %v318_v20  ;;  %v319_v26 = vpack.c.bf16 %v213_v21, %v213_v21  ;;  %v219_v27 = vadd.f32 %v218_v25, %v123_v11  ;;  %v220_v28 = vpop.f32.mrb[2].mxu1 }
 0x21b   :  { %243 = vst.msk [vmem:[%s522_s5 + $0x4] sm:$0xf] %vm241_vm1, %v315_v23  ;;  %v316_v29 = vpack.c.bf16 %v217_v24, %v217_v24  ;;  %v221_v30 = vadd.f32 %v220_v28, %v119_v10  ;;  %v222_v31 = vpop.f32.mrb[3].mxu1 }
 0x21c   :  { %279 = vst.msk [vmem:[%s523_s7 + $0x4] sm:$0xf] %vm241_vm1, %v319_v26  ;;  %v320_v32 = vpack.c.bf16 %v219_v27, %v219_v27  ;;  %v223_v33 = vadd.f32 %v222_v31, %v123_v11 }
 0x21d   :  { %244 = vst.msk [vmem:[%s522_s5 + $0x8] sm:$0xf] %vm241_vm1, %v316_v29  ;;  %v317_v34 = vpack.c.bf16 %v221_v30, %v221_v30  ;;  %250 = vrot.lane.b32.xlu1 %v316_v29, %s353_s4 }
 0x21e   :  { %280 = vst.msk [vmem:[%s523_s7 + $0x8] sm:$0xf] %vm241_vm1, %v320_v32  ;;  %v321_v35 = vpack.c.bf16 %v223_v33, %v223_v33 }
 0x21f   :  { %245 = vst.msk [vmem:[%s522_s5 + $0xc] sm:$0xf] %vm241_vm1, %v317_v34 }
 0x220   :  { %281 = vst.msk [vmem:[%s523_s7 + $0xc] sm:$0xf] %vm241_vm1, %v321_v35 }
 0x221   :  { %248 = vrot.lane.b32.xlu1 %v315_v23, %s353_s4 }
 0x225   :  { %252 = vrot.lane.b32.xlu1 %v317_v34, %s353_s4 }
 0x28b   :  { %v247_v36 = vpop.permute.xlu0 %246 }
 0x28c   :  { %258 = vst.msk [vmem:[%s524_s6] sm:$0xf] %vm241_vm1, %v247_v36 }
 0x28f   :  { %v251_v37 = vpop.permute.xlu1 %250 }
 0x290   :  { %260 = vst.msk [vmem:[%s524_s6 + $0x8] sm:$0xf] %vm241_vm1, %v251_v37 }
 0x293   :  { %v249_v38 = vpop.permute.xlu1 %248 }
 0x294   :  { %259 = vst.msk [vmem:[%s524_s6 + $0x4] sm:$0xf] %vm241_vm1, %v249_v38 }
 0x297   :  { %v253_v39 = vpop.permute.xlu1 %252 }
 0x298   :  { %261 = vst.msk [vmem:[%s524_s6 + $0xc] sm:$0xf] %vm241_vm1, %v253_v39 }

// kernel: memory_attention_layer_forward.10
= control target key start
LH: loop header
LB: loop body
LE: loop exit
PB: predicated region body
PF: predicated region fallthrough
CT: control target
= control target key end

     0   :  { %vm71_vm0 = vcmask 523264   ;;  %s252_s1 = inlined_call_operand.vmem [shape: bf16[64,64], index: 1, kind: input, shape index: {}]   ;;  %s253_s0 = inlined_call_operand.vmem [shape: bf16[32,64], index: 0, kind: input, shape index: {}]   ;;  %s254_s2 = inlined_call_operand.vmem [shape: f32[1,64], index: 2, kind: input, shape index: {}]   ;;  %s255_s3 = inlined_call_operand.vmem [shape: f32[32,64], index: 3, kind: input, shape index: {}, may-alias: {3,4}]   ;;  %s256_s4 = inlined_call_operand.vmem [shape: f32[32,64], index: 4, kind: output, shape index: {}, may-alias: {3,4}]  }
   0x1   :  { %v170_v0 = vld [vmem:[%s252_s1] sm:$0xff]   ;;  %v171_v1 = vld [vmem:[%s252_s1 + $0x8] sm:$0xff]   ;;  %v172_v2 = vld [vmem:[%s252_s1 + $0x10] sm:$0xff]  }
   0x2   :  { %158 = vmatprep.subr.bf16.mxu0 %v170_v0  ;;  %v174_v3 = vld [vmem:[%s253_s0] sm:$0xff]   ;;  %v173_v4 = vld [vmem:[%s252_s1 + $0x18] sm:$0xff]   ;;  %v175_v5 = vld [vmem:[%s253_s0 + $0x8] sm:$0xff]  }
   0x3   :  { %159 = vmatpush3.bf16.msra.mxu0 %v170_v0  ;;  %166 = vmatprep.mubr.msk.bf16.mxu0 %vm71_vm0, %v174_v3  ;;  %v143_v6 = vld [vmem:[%s254_s2] ss:$0 sm:$0xff]  ;;  %v129_v8 = vld [vmem:[%s255_s3 + $0x10] sm:$0xff]  ;;  %v130_v14 = vld [vmem:[%s255_s3 + $0x18] sm:$0xff] }
   0x4   :  { %160 = vmatprep.subr.bf16.mxu0 %v171_v1  ;;  %v127_v11 = vld [vmem:[%s255_s3] sm:$0xff]  ;;  %v128_v18 = vld [vmem:[%s255_s3 + $0x8] sm:$0xff] }
   0x7   :  { %161 = vmatpush3.bf16.msra.mxu0 %v171_v1 }
   0x8   :  { %162 = vmatprep.subr.bf16.mxu0 %v172_v2 }
   0xb   :  { %163 = vmatpush3.bf16.msra.mxu0 %v172_v2 }
   0xc   :  { %164 = vmatprep.subr.bf16.mxu0 %v173_v4 }
   0xf   :  { %165 = vmatpush3.bf16.msra.mxu0 %v173_v4 }
  0x12   :  { %167 = vmatmul.mubr.msk.bf16.vlgmr.msra.gmra.mrb[0].mxu0 %vm71_vm0, %v175_v5 }
  0xe5   :  { %v168_v7 = vpop.f32.mrb[0].mxu0 }
  0xe6   :  { %v121_v9 = vadd.f32 %v168_v7, %v143_v6  ;;  %v112_v10 = vpop.f32.mrb[1].mxu0 }
  0xe7   :  { %v113_v12 = vadd.f32 %v143_v6, %v112_v10  ;;  %v169_v13 = vpop.f32.mrb[2].mxu0 }
  0xe8   :  { %v133_v15 = vadd.f32 %v129_v8, %v121_v9  ;;  %v124_v16 = vadd.f32 %v169_v13, %v143_v6  ;;  %v115_v17 = vpop.f32.mrb[3].mxu0 }
  0xe9   :  { %v131_v19 = vadd.f32 %v127_v11, %v113_v12  ;;  %v116_v20 = vadd.f32 %v143_v6, %v115_v17 }
  0xea   :  { %137 = vst.msk [vmem:[%s256_s4 + $0x10] sm:$0xff] %vm71_vm0, %v133_v15  ;;  %v134_v21 = vadd.f32 %v130_v14, %v124_v16 }
  0xeb   :  { %135 = vst.msk [vmem:[%s256_s4] sm:$0xff] %vm71_vm0, %v131_v19  ;;  %v132_v22 = vadd.f32 %v128_v18, %v116_v20 }
  0xec   :  { %138 = vst.msk [vmem:[%s256_s4 + $0x18] sm:$0xff] %vm71_vm0, %v134_v21 }
  0xed   :  { %136 = vst.msk [vmem:[%s256_s4 + $0x8] sm:$0xff] %vm71_vm0, %v132_v22 }

// kernel: memory_attention_layer_forward.9
= control target key start
LH: loop header
LB: loop body
LE: loop exit
PB: predicated region body
PF: predicated region fallthrough
CT: control target
= control target key end

     0   :  { %s1137_s24 = smov 0   ;;  %s1139_s25 = smov 0   ;;  %s1229_s0 = inlined_call_operand.vmem [shape: bf16[2,16,64], index: 0, kind: input, shape index: {}]   ;;  %s1230_s1 = inlined_call_operand.vmem [shape: bf16[2,16,64], index: 1, kind: input, shape index: {}]   ;;  %s1231_s2 = inlined_call_operand.vmem [shape: bf16[2,16,64], index: 2, kind: input, shape index: {}]   ;;  %s1232_s3 = inlined_call_operand.vmem [shape: f32[16,64], index: 3, kind: input, shape index: {}]   ;;  %s1233_s4 = inlined_call_operand.vmem [shape: f32[16,64], index: 4, kind: input, shape index: {}]   ;;  %s1234_s5 = inlined_call_operand.vmem [shape: f32[16,64], index: 5, kind: input, shape index: {}]   ;;  %s1235_s6 = inlined_call_operand.vmem [shape: f32[16,64], index: 6, kind: input, shape index: {}]   ;;  %s1236_s7 = inlined_call_operand.vmem [shape: bf16[2,16,64], index: 7, kind: output, shape index: {}]  }
   0x1   :  { %s1141_s26 = smov 0  }
   0x2 LB: > { %s36_s27 = sadd.s32 1, %s1085_s25  ;;  %p956_p0 = scmp.ge.s32.totalorder %s1089_s26, 1  ;;  %s1089_s26 = sphi %s1141_s26, %s17_s26   ;;  %s1085_s25 = sphi %s1139_s25, %s1238_s25   ;;  %s1081_s24 = sphi %s1137_s24, %s1237_s24  }
   0x3   : > { %p38_p1 = scmp.ge.s32.totalorder %s36_s27, 2  ;;  %p343_p2 = scmp.lt.s32.totalorder %s1089_s26, 3 }
   0x5   : > { %s1240_s27 = smov (%p38_p1, %s36_s27), 0  ;;  %p344_p3 = pnand %p956_p0, %p343_p2 }
   0x6   : > { %p422_p4 = scmp.lt.s32.totalorder (!%p344_p3), %s1081_s24, 1  ;;  %vm495_vm0 = vcmask (!%p344_p3), 523264   ;;  %v1091_v8 = vmov (!%p344_p3), 0.0   ;;  %s1092_s12 = smov (!%p344_p3), 96   ;;  %vm1093_vm1 = vmmov (!%p344_p3), 0   ;;  %v508_v11 = vld [vmem:[%s1232_s3] sm:$0xff] (!%p344_p3) }
   0x7   : > { %347 = sbr.rel (%p344_p3) target bundleno = 959 (0x3bf), region = 48  ;;  %990 = vmatprep.subr.bf16.mxu0 (!%p344_p3), %v1091_v8  ;;  %496 = vst.msk [vmem:[#allocation4] sm:$0xff] (!%p344_p3), %vm495_vm0, %v1091_v8  ;;  %497 = vst.msk [vmem:[#allocation4 + $0x8] sm:$0xff] (!%p344_p3), %vm495_vm0, %v1091_v8  ;;  %996 = vmatprep.subr.bf16.mxu1 (!%p344_p3), %v1091_v8  ;;  %s1094_s13 = smov (!%p344_p3), 32   ;;  %v509_v12 = vld [vmem:[%s1232_s3 + $0x8] sm:$0xff] (!%p344_p3)  ;;  %v512_v15 = vld [vmem:[%s1234_s5] sm:$0xff] (!%p344_p3) }
   0x8   : > { %992 = vmatprep.mubr.msk.bf16.mxu0 (!%p344_p3), %vm1093_vm1, %v1091_v8  ;;  %998 = vmatprep.mubr.msk.bf16.mxu1 (!%p344_p3), %vm1093_vm1, %v1091_v8  ;;  %v513_v16 = vld [vmem:[%s1234_s5 + $0x8] sm:$0xff] (!%p344_p3)  ;;  %vm532_vm2 = vcmask (!%p344_p3), 261120   ;;  %v510_v20 = vld [vmem:[%s1233_s4] sm:$0xff] (!%p344_p3)  ;;  %vm490_vm3 = vcmask (!%p344_p3), 7168   ;;  %v1095_v48 = vmov (!%p344_p3), -inf   ;;  %vm613_vm4 = vcmask (!%p344_p3), 130048  }
   0x9   : > { %v511_v24 = vld [vmem:[%s1233_s4 + $0x8] sm:$0xff] (!%p344_p3)  ;;  %v514_v27 = vld [vmem:[%s1235_s6] sm:$0xff] (!%p344_p3)  ;;  %491 = vst.msk [vmem:[#allocation2] sm:$0xff] (!%p344_p3), %vm490_vm3, %v1095_v48  ;;  %492 = vst.msk [vmem:[#allocation2 + $0x8] sm:$0xff] (!%p344_p3), %vm490_vm3, %v1095_v48  ;;  %v1096_v55 = vmov (!%p344_p3), 0   ;;  %vm759_vm5 = vcmask (!%p344_p3), 519168  }
   0xa   : > { %v515_v28 = vld [vmem:[%s1235_s6 + $0x8] sm:$0xff] (!%p344_p3)  ;;  %493 = vst.msk [vmem:[#allocation3] sm:$0xff] (!%p344_p3), %vm490_vm3, %v1091_v8  ;;  %494 = vst.msk [vmem:[#allocation3 + $0x8] sm:$0xff] (!%p344_p3), %vm490_vm3, %v1091_v8  ;;  %1052 = vset.pattern.permute.xlu0 (!%p344_p3), %v1096_v55  ;;  %1053 = vset.pattern.permute.xlu1 (!%p344_p3), %v1096_v55 }
   0xe   : > { %s1242_s24 = smov (!%p422_p4, %s1081_s24), 1 }
   0xf   : > { %s1155_s28 = sshll.u32 %s1242_s24, 3 }
  0x10   : > { %s439_s8 = scalar_lea.vmem %s1230_s1, %s1155_s28  ;;  %s429_s11 = scalar_lea.vmem %s1229_s0, %s1155_s28  ;;  %v611_v56 = vld [vmem:[#allocation2] sm:$0xff]  ;;  %v612_v58 = vld [vmem:[#allocation2 + $0x8] sm:$0xff] }
  0x11   : > { %v983_v0 = vld [vmem:[%s439_s8] sm:$0xff]   ;;  %s483_s16 = scalar_lea.vmem %s1236_s7, %s1155_s28 }
  0x12   : > { %v979_v1 = vld [vmem:[%s429_s11] sm:$0xff]   ;;  %v984_v2 = vunpack.c.l.bf16 %v983_v0  ;;  %v985_v3 = vunpack.c.h.bf16 %v983_v0 }
  0x13   : > { %v980_v4 = vunpack.c.l.bf16 %v979_v1  ;;  %v981_v5 = vunpack.c.h.bf16 %v979_v1 }
  0x14   : > { %v1032_v6 = vpack.i.bf16 %v985_v3, %v984_v2  ;;  %v539_v31 = vmul.f32 %v984_v2, %v512_v15  ;;  %v540_v32 = vmul.f32 %v985_v3, %v513_v16  ;;  %v644_v16 = vld [vmem:[#allocation3] sm:$0xff] }
  0x15   : > { %v1042_v7 = vpack.i.bf16 %v981_v5, %v980_v4  ;;  %v517_v29 = vmul.f32 %v981_v5, %v509_v12  ;;  %v516_v30 = vmul.f32 %v980_v4, %v508_v11 }
  0x16   : > { %1033 = vrot.lane.b32.xlu0 %v1032_v6, %s1092_s12 }
  0x17   : > { %1043 = vrot.lane.b32.xlu1 %v1042_v7, %s1092_s12 }
  0x1a   : > { %1038 = vrot.lane.b32.xlu0 %v1032_v6, %s1094_s13 }
  0x1b   : > { %1048 = vrot.lane.b32.xlu1 %v1042_v7, %s1094_s13  ;;  %s449_s13 = scalar_lea.vmem %s1231_s2, %s1155_s28 }
  0x1c   : > { %v1054_v0 = vld [vmem:[%s449_s13] sm:$0xff]  }
  0x1d   : > { %997 = vmatpush3.bf16.msra.mxu1 %v1054_v0 }
  0x88   : > { %v1034_v9 = vpop.permute.xlu0 %1033 }
  0x89   : > { %v1044_v10 = vpop.permute.xlu1 %1043  ;;  %v1036_v17 = vunpack.i.h.bf16 %v1034_v9  ;;  %v1035_v18 = vunpack.i.l.bf16 %v1034_v9 }
  0x8a   : > { %v1046_v13 = vunpack.i.h.bf16 %v1044_v10  ;;  %v1045_v14 = vunpack.i.l.bf16 %v1044_v10 }
  0x8c   : > { %v1039_v19 = vpop.permute.xlu0 %1038 }
  0x8d   : > { %v1049_v21 = vpop.permute.xlu1 %1048  ;;  %v1041_v22 = vunpack.i.h.bf16 %v1039_v19  ;;  %v1040_v23 = vunpack.i.l.bf16 %v1039_v19 }
  0x8e   : > { %v1051_v25 = vunpack.i.h.bf16 %v1049_v21  ;;  %v1050_v26 = vunpack.i.l.bf16 %v1049_v21 }
  0x8f   : > { %v555_v33 = vsel %vm532_vm2, %v1035_v18, %v1040_v23  ;;  %v556_v34 = vsel %vm532_vm2, %v1036_v17, %v1041_v22  ;;  %v645_v17 = vld [vmem:[#allocation3 + $0x8] sm:$0xff] }
  0x90   : > { %v533_v35 = vsel %vm532_vm2, %v1045_v14, %v1050_v26  ;;  %v534_v36 = vsel %vm532_vm2, %v1046_v13, %v1051_v25  ;;  %v557_v39 = vmul.f32 %v555_v33, %v514_v27  ;;  %v558_v40 = vmul.f32 %v556_v34, %v515_v28  ;;  %v659_v28 = vld [vmem:[#allocation4] sm:$0xff] }
  0x91   : > { %v535_v37 = vmul.f32 %v533_v35, %v510_v20  ;;  %v536_v38 = vmul.f32 %v534_v36, %v511_v24 }
  0x92   : > { %v559_v43 = vadd.f32 %v557_v39, %v539_v31  ;;  %v560_v44 = vadd.f32 %v558_v40, %v540_v32 }
  0x93   : > { %v537_v41 = vadd.f32 %v535_v37, %v516_v30  ;;  %v538_v42 = vadd.f32 %v536_v38, %v517_v29  ;;  %v660_v30 = vld [vmem:[#allocation4 + $0x8] sm:$0xff] }
  0x94   : > { %v562_v45 = vpack.c.bf16 %v560_v44, %v559_v43 }
  0x95   : > { %v561_v46 = vpack.c.bf16 %v538_v42, %v537_v41 }
  0x96   : > { %v568_v47 = vsel %vm495_vm0, %v562_v45, 0 }
  0x97   : > { %991 = vmatpush3.bf16.xpose.msra.mxu0 %v568_v47 }
  0x9e   : > { %993 = vmatmul.mubr.msk.bf16.vlgmr.msra.gmra.mrb[0].mxu0 %vm495_vm0, %v561_v46 }
 0x171   : > { %v604_v49 = vpop.f32.mrb[0].mxu0 }
 0x172   : > { %v994_v50 = vpop.f32.mrb[1].mxu0  ;;  %v614_v51 = vsel %vm613_vm4, %v604_v49, -inf }
 0x173   : > { %615 = vmax.xlane.f32.xlu0 %v614_v51  ;;  %v607_v52 = vpop.f32.mrb[2].mxu0 }
 0x174   : > { %v995_v53 = vpop.f32.mrb[3].mxu0  ;;  %v617_v54 = vsel %vm613_vm4, %v607_v52, -inf }
 0x175   : > { %618 = vmax.xlane.f32.xlu1 %v617_v54 }
 0x200   : > { %v616_v57 = vpop.xlane.xlu0 %615 }
 0x201   : > { %v620_v59 = vmax.f32 %v611_v56, %v616_v57 }
 0x202   : > { %v619_v60 = vpop.xlane.xlu1 %618 }
 0x203   : > { %v622_v61 = vsub.f32 %v611_v56, %v620_v59  ;;  %728 = vst.msk [vmem:[#allocation2] sm:$0xff] %vm490_vm3, %v620_v59  ;;  %v621_v62 = vmax.f32 %v612_v58, %v619_v60  ;;  %630 = vperm.xlu0 %1052, %v620_v59  }
 0x205   : > { %v623_v63 = vsub.f32 %v612_v58, %v621_v62  ;;  %729 = vst.msk [vmem:[#allocation2 + $0x8] sm:$0xff] %vm490_vm3, %v621_v62  ;;  %635 = vperm.xlu1 %1053, %v621_v62   ;;  %v624_v12 = vmul.f32 1.442695, %v622_v61 }
 0x207   : > { %v626_v13 = vmul.f32 1.442695, %v623_v63 }
 0x282   : > { %v631_v1 = vpop.permute.xlu0 %630 }
 0x283   : > { %v638_v2 = vsub.f32 %v604_v49, %v631_v1 }
 0x284   : > { %v636_v3 = vpop.permute.xlu1 %635 }
 0x285   : > { %v640_v4 = vmul.f32 1.442695, %v638_v2  ;;  %v639_v5 = vsub.f32 %v607_v52, %v636_v3 }
 0x287   : > { %1055 = vpow2.f32 %v640_v4  ;;  %v642_v6 = vmul.f32 1.442695, %v639_v5 }
 0x289   : > { %1057 = vpow2.f32 %v642_v6 }
 0x28a   : > { %1059 = vpow2.f32 %v624_v12 }
 0x28b   : > { %1061 = vpow2.f32 %v626_v13 }
 0x291   : > { %v1056_v7 = vpop.eup %1055 }
 0x292   : > { %v648_v8 = vsel %vm613_vm4, %v1056_v7, 0.0 }
 0x293   : > { %v1058_v9 = vpop.eup %1057  ;;  %649 = vadd.xlane.f32.xlu1 %v648_v8 }
 0x294   : > { %v651_v10 = vsel %vm613_vm4, %v1058_v9, 0.0  ;;  %v673_v11 = vpack.c.bf16 %v1058_v9, %v1056_v7  ;;  %v1060_v14 = vpop.eup %1059 }
 0x295   : > { %652 = vadd.xlane.f32.xlu0 %v651_v10  ;;  %v1062_v15 = vpop.eup %1061  ;;  %v646_v18 = vmul.f32 %v1060_v14, %v644_v16 }
 0x296   : > { %999 = vmatmul.mubr.msk.bf16.vlgmr.msra.gmra.mrb[0].mxu1 %vm613_vm4, %v673_v11  ;;  %v647_v21 = vmul.f32 %v1062_v15, %v645_v17 }
 0x2a4   : > { %663 = vperm.xlu1 %1053, %v1060_v14  }
 0x2ab   : > { %668 = vperm.xlu0 %1052, %v1062_v15  }
 0x320   : > { %v650_v19 = vpop.xlane.xlu1 %649 }
 0x321   : > { %v654_v20 = vadd.f32 %v650_v19, %v646_v18 }
 0x322   : > { %v653_v22 = vpop.xlane.xlu0 %652 }
 0x323   : > { %657 = vst.msk [vmem:[#allocation3] sm:$0xff] %vm490_vm3, %v654_v20  ;;  %v655_v23 = vadd.f32 %v653_v22, %v647_v21 }
 0x324   : > { %v664_v29 = vpop.permute.xlu1 %663 }
 0x325   : > { %658 = vst.msk [vmem:[#allocation3 + $0x8] sm:$0xff] %vm490_vm3, %v655_v23  ;;  %v671_v32 = vmul.f32 %v664_v29, %v659_v28 }
 0x32a   : > { %v733_v24 = vld [vmem:[#allocation3] sm:$0xff]  ;;  %v669_v31 = vpop.permute.xlu0 %668 }
 0x32b   : > { %1063 = vrcp.f32 %v733_v24  ;;  %v672_v34 = vmul.f32 %v669_v31, %v660_v30 }
 0x32c   : > { %v734_v25 = vld [vmem:[#allocation3 + $0x8] sm:$0xff] }
 0x32d   : > { %1065 = vrcp.f32 %v734_v25 }
 0x335   : > { %v1064_v26 = vpop.eup %1063 }
 0x336   : > { %741 = vperm.xlu1 %1053, %v1064_v26  }
 0x337   : > { %v1066_v27 = vpop.eup %1065 }
 0x33a   : > { %746 = vperm.xlu1 %1053, %v1066_v27  }
 0x369   : > { %v717_v33 = vpop.f32.mrb[0].mxu1 }
 0x36a   : > { %v724_v35 = vadd.f32 %v717_v33, %v671_v32  ;;  %v1000_v36 = vpop.f32.mrb[1].mxu1 }
 0x36b   : > { %v720_v37 = vpop.f32.mrb[2].mxu1 }
 0x36c   : > { %726 = vst.msk [vmem:[#allocation4] sm:$0xff] %vm495_vm0, %v724_v35  ;;  %v725_v38 = vadd.f32 %v720_v37, %v672_v34  ;;  %v1001_v39 = vpop.f32.mrb[3].mxu1 }
 0x36e   : > { %727 = vst.msk [vmem:[#allocation4 + $0x8] sm:$0xff] %vm495_vm0, %v725_v38 }
 0x373   : > { %v737_v40 = vld [vmem:[#allocation4] sm:$0xff] }
 0x375   : > { %v738_v44 = vld [vmem:[#allocation4 + $0x8] sm:$0xff] }
 0x3b5   : > { %v742_v41 = vpop.permute.xlu1 %741 }
 0x3b6   : > { %v749_v42 = vmul.f32 %v742_v41, %v737_v40 }
 0x3b8   : > { %v976_v43 = vpack.c.bf16 %v749_v42, %v749_v42 }
 0x3b9   : > { %v747_v45 = vpop.permute.xlu1 %746 }
 0x3ba   : > { %760 = vst.msk [vmem:[%s483_s16] sm:$0xf] %vm759_vm5, %v976_v43  ;;  %v750_v46 = vmul.f32 %v747_v45, %v738_v44 }
 0x3bc   : > { %v977_v47 = vpack.c.bf16 %v750_v46, %v750_v46 }
 0x3be   : > { %761 = vst.msk [vmem:[%s483_s16 + $0x4] sm:$0xf] %vm759_vm5, %v977_v47 }
 0x3bf PF: > { %s17_s26 = sadd.s32 1, %s1089_s26   ;;  %s1237_s24 = smov %s1085_s25 }
 0x3c0   : > { %p14_p5 = scmp.ge.s32.totalorder %s17_s26, 4   ;;  %s1238_s25 = smov %s1240_s27 }
 0x3c2   :  { %16 = sbr.rel (!%p14_p5) target bundleno = 2 (0x2), region = 104 }

// kernel: memory_attention_layer_forward.11
= control target key start
LH: loop header
LB: loop body
LE: loop exit
PB: predicated region body
PF: predicated region fallthrough
CT: control target
= control target key end

     0   :  { %vm27_vm0 = vcmask 523264   ;;  %vm213_vm1 = vcmask 519168   ;;  %s354_s0 = inlined_call_operand.vmem [shape: f32[32,64], index: 0, kind: input, shape index: {}]   ;;  %s355_s3 = inlined_call_operand.vmem [shape: bf16[64,64], index: 3, kind: input, shape index: {}]   ;;  %s356_s1 = inlined_call_operand.vmem [shape: f32[1,64], index: 1, kind: input, shape index: {}]   ;;  %s357_s2 = inlined_call_operand.vmem [shape: f32[1,64], index: 2, kind: input, shape index: {}]   ;;  %s358_s4 = inlined_call_operand.vmem [shape: f32[1,64], index: 4, kind: input, shape index: {}]   ;;  %s359_s5 = inlined_call_operand.vmem [shape: bf16[32,64], index: 5, kind: output, shape index: {}]  }
   0x1   :  { %v21_v0 = vld [vmem:[%s354_s0] sm:$0xff]  ;;  %v23_v1 = vld [vmem:[%s354_s0 + $0x10] sm:$0xff]  ;;  %v22_v2 = vld [vmem:[%s354_s0 + $0x8] sm:$0xff] }
   0x2   :  { %v28_v3 = vsel %vm27_vm0, %v21_v0, 0.0  ;;  %v34_v4 = vsel %vm27_vm0, %v23_v1, 0.0  ;;  %v24_v5 = vld [vmem:[%s354_s0 + $0x18] sm:$0xff]  ;;  %v31_v6 = vsel %vm27_vm0, %v22_v2, 0.0  ;;  %v257_v28 = vld [vmem:[%s355_s3] sm:$0xff]   ;;  %v258_v29 = vld [vmem:[%s355_s3 + $0x8] sm:$0xff]  }
   0x3   :  { %29 = vadd.xlane.f32.xlu0 %v28_v3  ;;  %35 = vadd.xlane.f32.xlu1 %v34_v4  ;;  %v37_v7 = vsel %vm27_vm0, %v24_v5, 0.0  ;;  %v259_v30 = vld [vmem:[%s355_s3 + $0x10] sm:$0xff]   ;;  %v260_v31 = vld [vmem:[%s355_s3 + $0x18] sm:$0xff]   ;;  %v222_v46 = vld [vmem:[%s356_s1] ss:$0 sm:$0xff] }
   0x4   :  { %245 = vmatprep.subr.bf16.mxu0 %v257_v28  ;;  %v223_v52 = vld [vmem:[%s357_s2] ss:$0 sm:$0xff] }
   0x5   :  { %246 = vmatpush3.bf16.msra.mxu0 %v257_v28 }
   0x6   :  { %247 = vmatprep.subr.bf16.mxu0 %v258_v29 }
   0x7   :  { %32 = vadd.xlane.f32.xlu0 %v31_v6  ;;  %38 = vadd.xlane.f32.xlu1 %v37_v7 }
   0x9   :  { %248 = vmatpush3.bf16.msra.mxu0 %v258_v29 }
   0xa   :  { %249 = vmatprep.subr.bf16.mxu0 %v259_v30 }
   0xd   :  { %250 = vmatpush3.bf16.msra.mxu0 %v259_v30 }
   0xe   :  { %251 = vmatprep.subr.bf16.mxu0 %v260_v31 }
  0x11   :  { %252 = vmatpush3.bf16.msra.mxu0 %v260_v31 }
  0x90   :  { %v30_v8 = vpop.xlane.xlu0 %29  ;;  %v36_v9 = vpop.xlane.xlu1 %35 }
  0x91   :  { %v41_v10 = vmul.f32 0.015625, %v30_v8  ;;  %v43_v11 = vmul.f32 0.015625, %v36_v9 }
  0x93   :  { %v45_v12 = vsub.f32 %v21_v0, %v41_v10  ;;  %v47_v13 = vsub.f32 %v23_v1, %v43_v11  ;;  %v224_v0 = vld [vmem:[%s358_s4] ss:$0 sm:$0xff] }
  0x94   :  { %v33_v14 = vpop.xlane.xlu0 %32  ;;  %v39_v15 = vpop.xlane.xlu1 %38 }
  0x95   :  { %v42_v16 = vmul.f32 0.015625, %v33_v14  ;;  %v44_v17 = vmul.f32 0.015625, %v39_v15  ;;  %v49_v18 = vmul.f32 %v45_v12, %v45_v12  ;;  %v51_v19 = vmul.f32 %v47_v13, %v47_v13 }
  0x97   :  { %v46_v20 = vsub.f32 %v22_v2, %v42_v16  ;;  %v48_v21 = vsub.f32 %v24_v5, %v44_v17  ;;  %v53_v22 = vsel %vm27_vm0, %v49_v18, 0.0  ;;  %v59_v23 = vsel %vm27_vm0, %v51_v19, 0.0 }
  0x98   :  { %54 = vadd.xlane.f32.xlu0 %v53_v22 }
  0x99   :  { %v50_v24 = vmul.f32 %v46_v20, %v46_v20  ;;  %v52_v25 = vmul.f32 %v48_v21, %v48_v21 }
  0x9b   :  { %v56_v26 = vsel %vm27_vm0, %v50_v24, 0.0  ;;  %v62_v27 = vsel %vm27_vm0, %v52_v25, 0.0 }
  0x9c   :  { %60 = vadd.xlane.f32.xlu0 %v59_v23  ;;  %57 = vadd.xlane.f32.xlu1 %v56_v26 }
  0xa0   :  { %63 = vadd.xlane.f32.xlu1 %v62_v27 }
 0x125   :  { %v55_v32 = vpop.xlane.xlu0 %54 }
 0x126   :  { %v65_v33 = vmul.f32 0.015625, %v55_v32 }
 0x128   :  { %v69_v34 = vadd.f32 1e-05, %v65_v33 }
 0x129   :  { %v58_v35 = vpop.xlane.xlu1 %57  ;;  %v61_v36 = vpop.xlane.xlu0 %60 }
 0x12a   :  { %261 = vrsqrt.f32 %v69_v34  ;;  %v66_v37 = vmul.f32 0.015625, %v58_v35  ;;  %v67_v38 = vmul.f32 0.015625, %v61_v36 }
 0x12c   :  { %v70_v39 = vadd.f32 1e-05, %v66_v37  ;;  %v71_v40 = vadd.f32 1e-05, %v67_v38 }
 0x12d   :  { %v64_v41 = vpop.xlane.xlu1 %63 }
 0x12e   :  { %263 = vrsqrt.f32 %v70_v39  ;;  %v68_v42 = vmul.f32 0.015625, %v64_v41 }
 0x12f   :  { %265 = vrsqrt.f32 %v71_v40 }
 0x130   :  { %v72_v43 = vadd.f32 1e-05, %v68_v42 }
 0x132   :  { %267 = vrsqrt.f32 %v72_v43 }
 0x134   :  { %v262_v44 = vpop.eup %261 }
 0x135   :  { %v77_v45 = vmul.f32 %v262_v44, %v45_v12 }
 0x137   :  { %v87_v50 = vmul.f32 %v222_v46, %v77_v45 }
 0x138   :  { %v264_v47 = vpop.eup %263 }
 0x139   :  { %v266_v48 = vpop.eup %265  ;;  %v78_v49 = vmul.f32 %v264_v47, %v46_v20  ;;  %v97_v56 = vadd.f32 %v223_v52, %v87_v50 }
 0x13a   :  { %v79_v51 = vmul.f32 %v266_v48, %v47_v13 }
 0x13b   :  { %v88_v53 = vmul.f32 %v222_v46, %v78_v49 }
 0x13c   :  { %v268_v54 = vpop.eup %267  ;;  %v89_v58 = vmul.f32 %v222_v46, %v79_v51 }
 0x13d   :  { %v80_v55 = vmul.f32 %v268_v54, %v48_v21  ;;  %v98_v57 = vadd.f32 %v223_v52, %v88_v53 }
 0x13e   :  { %v99_v61 = vadd.f32 %v223_v52, %v89_v58 }
 0x13f   :  { %v101_v59 = vpack.c.bf16 %v98_v57, %v97_v56  ;;  %v90_v60 = vmul.f32 %v222_v46, %v80_v55 }
 0x141   :  { %253 = vmatprep.mubr.msk.bf16.mxu0 %vm27_vm0, %v101_v59  ;;  %v100_v62 = vadd.f32 %v223_v52, %v90_v60 }
 0x143   :  { %v102_v63 = vpack.c.bf16 %v100_v62, %v99_v61 }
 0x145   :  { %254 = vmatmul.mubr.msk.bf16.vlgmr.msra.gmra.mrb[0].mxu0 %vm27_vm0, %v102_v63 }
 0x218   :  { %v255_v1 = vpop.f32.mrb[0].mxu0 }
 0x219   :  { %v191_v2 = vadd.f32 %v255_v1, %v224_v0  ;;  %v182_v3 = vpop.f32.mrb[1].mxu0 }
 0x21a   :  { %v183_v4 = vadd.f32 %v224_v0, %v182_v3  ;;  %v256_v5 = vpop.f32.mrb[2].mxu0 }
 0x21b   :  { %v237_v6 = vpack.c.bf16 %v191_v2, %v191_v2  ;;  %v194_v7 = vadd.f32 %v256_v5, %v224_v0  ;;  %v185_v8 = vpop.f32.mrb[3].mxu0 }
 0x21c   :  { %v235_v9 = vpack.c.bf16 %v183_v4, %v183_v4  ;;  %v186_v10 = vadd.f32 %v224_v0, %v185_v8 }
 0x21d   :  { %216 = vst.msk [vmem:[%s359_s5 + $0x8] sm:$0xf] %vm213_vm1, %v237_v6  ;;  %v238_v11 = vpack.c.bf16 %v194_v7, %v194_v7 }
 0x21e   :  { %214 = vst.msk [vmem:[%s359_s5] sm:$0xf] %vm213_vm1, %v235_v9  ;;  %v236_v12 = vpack.c.bf16 %v186_v10, %v186_v10 }
 0x21f   :  { %217 = vst.msk [vmem:[%s359_s5 + $0xc] sm:$0xf] %vm213_vm1, %v238_v11 }
 0x220   :  { %215 = vst.msk [vmem:[%s359_s5 + $0x4] sm:$0xf] %vm213_vm1, %v236_v12 }

// kernel: memory_attention_layer_forward.12
= control target key start
LH: loop header
LB: loop body
LE: loop exit
PB: predicated region body
PF: predicated region fallthrough
CT: control target
= control target key end

     0   :  { %v837_v0 = vmov 0.0   ;;  %vm838_vm0 = vmmov 0   ;;  %vm125_vm1 = vcmask 523264   ;;  %vm505_vm2 = vcmask 519168   ;;  %s1256_s2 = inlined_call_operand.vmem [shape: bf16[64,64], index: 2, kind: input, shape index: {}]   ;;  %s1257_s4 = inlined_call_operand.vmem [shape: bf16[64,64], index: 4, kind: input, shape index: {}]   ;;  %s1258_s0 = inlined_call_operand.vmem [shape: f32[136,64], index: 0, kind: input, shape index: {}]   ;;  %s1259_s1 = inlined_call_operand.vmem [shape: f32[136,64], index: 1, kind: input, shape index: {}]   ;;  %s1260_s3 = inlined_call_operand.vmem [shape: f32[1,64], index: 3, kind: input, shape index: {}]   ;;  %s1261_s5 = inlined_call_operand.vmem [shape: f32[1,64], index: 5, kind: input, shape index: {}]   ;;  %s1262_s6 = inlined_call_operand.vmem [shape: bf16[136,64], index: 6, kind: output, shape index: {0}]   ;;  %s1263_s7 = inlined_call_operand.vmem [shape: bf16[136,64], index: 7, kind: output, shape index: {1}]  }
   0x1   :  { %739 = vmatprep.subr.bf16.mxu0 %v837_v0  ;;  %783 = vmatprep.subr.bf16.mxu1 %v837_v0  ;;  %v829_v1 = vld [vmem:[%s1256_s2] sm:$0xff]   ;;  %v831_v3 = vld [vmem:[%s1256_s2 + $0x8] sm:$0xff]   ;;  %v833_v5 = vld [vmem:[%s1256_s2 + $0x10] sm:$0xff]  }
   0x2   :  { %v830_v2 = vld [vmem:[%s1257_s4] sm:$0xff]   ;;  %747 = vmatprep.mubr.msk.bf16.mxu0 %vm838_vm0, %v837_v0  ;;  %791 = vmatprep.mubr.msk.bf16.mxu1 %vm838_vm0, %v837_v0  ;;  %v832_v4 = vld [vmem:[%s1257_s4 + $0x8] sm:$0xff]   ;;  %v834_v6 = vld [vmem:[%s1257_s4 + $0x10] sm:$0xff]  }
   0x3   :  { %740 = vmatpush3.bf16.msra.mxu0 %v829_v1  ;;  %784 = vmatpush3.bf16.msra.mxu1 %v830_v2  ;;  %v26_v7 = vld [vmem:[%s1258_s0] sm:$0xff]  ;;  %v27_v8 = vld [vmem:[%s1258_s0 + $0x8] sm:$0xff]  ;;  %v835_v12 = vld [vmem:[%s1256_s2 + $0x18] sm:$0xff]  }
   0x4   :  { %741 = vmatprep.subr.bf16.mxu0 %v837_v0  ;;  %785 = vmatprep.subr.bf16.mxu1 %v837_v0  ;;  %v43_v9 = vld [vmem:[%s1259_s1] sm:$0xff]  ;;  %v44_v10 = vld [vmem:[%s1259_s1 + $0x8] sm:$0xff]  ;;  %v836_v14 = vld [vmem:[%s1257_s4 + $0x18] sm:$0xff]   ;;  %v257_v17 = vpack.c.bf16 %v27_v8, %v26_v7 }
   0x5   :  { %v60_v11 = vadd.f32 %v43_v9, %v26_v7  ;;  %v61_v13 = vadd.f32 %v44_v10, %v27_v8  ;;  %v28_v16 = vld [vmem:[%s1258_s0 + $0x10] sm:$0xff]  ;;  %v29_v18 = vld [vmem:[%s1258_s0 + $0x18] sm:$0xff]  ;;  %v946_v23 = vld [vmem:[%s1258_s0 + $0x80] sm:$0xff] }
   0x6   :  { %v45_v19 = vld [vmem:[%s1259_s1 + $0x10] sm:$0xff]  ;;  %v46_v20 = vld [vmem:[%s1259_s1 + $0x18] sm:$0xff]  ;;  %v59_v24 = vld [vmem:[%s1259_s1 + $0x80] sm:$0xff]  ;;  %v258_v28 = vpack.c.bf16 %v29_v18, %v28_v16 }
   0x7   :  { %742 = vmatpush3.bf16.msra.mxu0 %v831_v3  ;;  %786 = vmatpush3.bf16.msra.mxu1 %v832_v4  ;;  %v77_v15 = vpack.c.bf16 %v61_v13, %v60_v11  ;;  %v62_v21 = vadd.f32 %v45_v19, %v28_v16  ;;  %v63_v22 = vadd.f32 %v46_v20, %v29_v18  ;;  %v30_v27 = vld [vmem:[%s1258_s0 + $0x20] sm:$0xff]  ;;  %v31_v29 = vld [vmem:[%s1258_s0 + $0x28] sm:$0xff]  ;;  %v32_v35 = vld [vmem:[%s1258_s0 + $0x30] sm:$0xff] }
   0x8   :  { %743 = vmatprep.subr.bf16.mxu0 %v837_v0  ;;  %787 = vmatprep.subr.bf16.mxu1 %v837_v0  ;;  %v954_v25 = vadd.f32 %v59_v24, %v946_v23  ;;  %v47_v30 = vld [vmem:[%s1259_s1 + $0x20] sm:$0xff]  ;;  %v48_v31 = vld [vmem:[%s1259_s1 + $0x28] sm:$0xff]  ;;  %v259_v36 = vpack.c.bf16 %v31_v29, %v30_v27  ;;  %v33_v37 = vld [vmem:[%s1258_s0 + $0x38] sm:$0xff] }
   0x9   :  { %v78_v26 = vpack.c.bf16 %v63_v22, %v62_v21  ;;  %v64_v32 = vadd.f32 %v47_v30, %v30_v27  ;;  %v65_v33 = vadd.f32 %v48_v31, %v31_v29  ;;  %v49_v38 = vld [vmem:[%s1259_s1 + $0x30] sm:$0xff]  ;;  %v50_v39 = vld [vmem:[%s1259_s1 + $0x38] sm:$0xff]  ;;  %v34_v43 = vld [vmem:[%s1258_s0 + $0x40] sm:$0xff]  ;;  %v260_v44 = vpack.c.bf16 %v33_v37, %v32_v35 }
   0xa   :  { %v66_v40 = vadd.f32 %v49_v38, %v32_v35  ;;  %v67_v41 = vadd.f32 %v50_v39, %v33_v37  ;;  %v35_v45 = vld [vmem:[%s1258_s0 + $0x48] sm:$0xff]  ;;  %v51_v46 = vld [vmem:[%s1259_s1 + $0x40] sm:$0xff]  ;;  %v36_v51 = vld [vmem:[%s1258_s0 + $0x50] sm:$0xff]  ;;  %v85_v13 = vpack.c.bf16 %v954_v25, %v954_v25 }
   0xb   :  { %744 = vmatpush3.bf16.msra.mxu0 %v833_v5  ;;  %788 = vmatpush3.bf16.msra.mxu1 %v834_v6  ;;  %v79_v34 = vpack.c.bf16 %v65_v33, %v64_v32  ;;  %v52_v47 = vld [vmem:[%s1259_s1 + $0x48] sm:$0xff]  ;;  %v68_v48 = vadd.f32 %v51_v46, %v34_v43  ;;  %v261_v52 = vpack.c.bf16 %v35_v45, %v34_v43  ;;  %v37_v53 = vld [vmem:[%s1258_s0 + $0x58] sm:$0xff]  ;;  %v53_v54 = vld [vmem:[%s1259_s1 + $0x50] sm:$0xff] }
   0xc   :  { %745 = vmatprep.subr.bf16.mxu0 %v837_v0  ;;  %789 = vmatprep.subr.bf16.mxu1 %v837_v0  ;;  %v80_v42 = vpack.c.bf16 %v67_v41, %v66_v40  ;;  %v69_v49 = vadd.f32 %v52_v47, %v35_v45  ;;  %v54_v55 = vld [vmem:[%s1259_s1 + $0x58] sm:$0xff]  ;;  %v70_v56 = vadd.f32 %v53_v54, %v36_v51  ;;  %v38_v59 = vld [vmem:[%s1258_s0 + $0x60] sm:$0xff]  ;;  %v39_v61 = vld [vmem:[%s1258_s0 + $0x68] sm:$0xff] }
   0xd   :  { %v71_v57 = vadd.f32 %v54_v55, %v37_v53  ;;  %v262_v60 = vpack.c.bf16 %v37_v53, %v36_v51  ;;  %v55_v62 = vld [vmem:[%s1259_s1 + $0x60] sm:$0xff]  ;;  %v56_v63 = vld [vmem:[%s1259_s1 + $0x68] sm:$0xff]  ;;  %v40_v4 = vld [vmem:[%s1258_s0 + $0x70] sm:$0xff]  ;;  %v263_v5 = vpack.c.bf16 %v39_v61, %v38_v59 }
   0xe   :  { %v81_v50 = vpack.c.bf16 %v69_v49, %v68_v48  ;;  %v72_v1 = vadd.f32 %v55_v62, %v38_v59  ;;  %v73_v2 = vadd.f32 %v56_v63, %v39_v61  ;;  %v41_v6 = vld [vmem:[%s1258_s0 + $0x78] sm:$0xff]  ;;  %v57_v7 = vld [vmem:[%s1259_s1 + $0x70] sm:$0xff]  ;;  %v1084_v16 = vld [vmem:[%s1261_s5] ss:$0 sm:$0xff] }
   0xf   :  { %746 = vmatpush3.bf16.msra.mxu0 %v835_v12  ;;  %790 = vmatpush3.bf16.msra.mxu1 %v836_v14  ;;  %v82_v58 = vpack.c.bf16 %v71_v57, %v70_v56  ;;  %v58_v8 = vld [vmem:[%s1259_s1 + $0x78] sm:$0xff]  ;;  %v74_v9 = vadd.f32 %v57_v7, %v40_v4  ;;  %v264_v12 = vpack.c.bf16 %v41_v6, %v40_v4 }
  0x10   :  { %v83_v3 = vpack.c.bf16 %v73_v2, %v72_v1  ;;  %v75_v10 = vadd.f32 %v58_v8, %v41_v6  ;;  %v265_v14 = vpack.c.bf16 %v946_v23, %v946_v23 }
  0x12   :  { %748 = vmatmul.mubr.msk.bf16.vlgmr.msra.gmra.mrb[0].mxu0 %vm125_vm1, %v77_v15  ;;  %792 = vmatmul.mubr.msk.bf16.vlgmr.msra.gmra.mrb[0].mxu1 %vm125_vm1, %v257_v17  ;;  %v84_v11 = vpack.c.bf16 %v75_v10, %v74_v9  ;;  %v1079_v15 = vld [vmem:[%s1260_s3] ss:$0 sm:$0xff] }
  0x13   :  { %751 = vmatprep.mubr.msk.bf16.mxu0 %vm838_vm0, %v837_v0  ;;  %795 = vmatprep.mubr.msk.bf16.mxu1 %vm838_vm0, %v837_v0 }
  0x1a   :  { %752 = vmatmul.mubr.msk.bf16.gmra.mrb[4].mxu0 %vm125_vm1, %v78_v26  ;;  %796 = vmatmul.mubr.msk.bf16.gmra.mrb[4].mxu1 %vm125_vm1, %v258_v28 }
  0x1b   :  { %755 = vmatprep.mubr.msk.bf16.mxu0 %vm838_vm0, %v837_v0  ;;  %799 = vmatprep.mubr.msk.bf16.mxu1 %vm838_vm0, %v837_v0 }
  0x22   :  { %756 = vmatmul.mubr.msk.bf16.gmra.mrb[8].mxu0 %vm125_vm1, %v79_v34  ;;  %800 = vmatmul.mubr.msk.bf16.gmra.mrb[8].mxu1 %vm125_vm1, %v259_v36 }
  0x23   :  { %759 = vmatprep.mubr.msk.bf16.mxu0 %vm838_vm0, %v837_v0  ;;  %803 = vmatprep.mubr.msk.bf16.mxu1 %vm838_vm0, %v837_v0 }
  0x2a   :  { %760 = vmatmul.mubr.msk.bf16.gmra.mrb[12].mxu0 %vm125_vm1, %v80_v42  ;;  %804 = vmatmul.mubr.msk.bf16.gmra.mrb[12].mxu1 %vm125_vm1, %v260_v44 }
  0x2b   :  { %763 = vmatprep.mubr.msk.bf16.mxu0 %vm838_vm0, %v837_v0  ;;  %807 = vmatprep.mubr.msk.bf16.mxu1 %vm838_vm0, %v837_v0 }
  0x32   :  { %764 = vmatmul.mubr.msk.bf16.gmra.mrb[16].mxu0 %vm125_vm1, %v81_v50  ;;  %808 = vmatmul.mubr.msk.bf16.gmra.mrb[16].mxu1 %vm125_vm1, %v261_v52 }
  0x33   :  { %767 = vmatprep.mubr.msk.bf16.mxu0 %vm838_vm0, %v837_v0  ;;  %811 = vmatprep.mubr.msk.bf16.mxu1 %vm838_vm0, %v837_v0 }
  0x3a   :  { %768 = vmatmul.mubr.msk.bf16.gmra.mrb[20].mxu0 %vm125_vm1, %v82_v58  ;;  %812 = vmatmul.mubr.msk.bf16.gmra.mrb[20].mxu1 %vm125_vm1, %v262_v60 }
  0x3b   :  { %771 = vmatprep.mubr.msk.bf16.mxu0 %vm838_vm0, %v837_v0  ;;  %815 = vmatprep.mubr.msk.bf16.mxu1 %vm838_vm0, %v837_v0 }
  0x42   :  { %772 = vmatmul.mubr.msk.bf16.gmra.mrb[24].mxu0 %vm125_vm1, %v83_v3  ;;  %816 = vmatmul.mubr.msk.bf16.gmra.mrb[24].mxu1 %vm125_vm1, %v263_v5 }
  0x43   :  { %775 = vmatprep.mubr.msk.bf16.mxu0 %vm838_vm0, %v837_v0  ;;  %819 = vmatprep.mubr.msk.bf16.mxu1 %vm838_vm0, %v837_v0 }
  0x4a   :  { %776 = vmatmul.mubr.msk.bf16.gmra.mrb[28].mxu0 %vm125_vm1, %v84_v11  ;;  %820 = vmatmul.mubr.msk.bf16.gmra.mrb[28].mxu1 %vm125_vm1, %v264_v12 }
  0x4b   :  { %779 = vmatprep.mubr.msk.bf16.mxu0 %vm838_vm0, %v837_v0  ;;  %823 = vmatprep.mubr.msk.bf16.mxu1 %vm838_vm0, %v837_v0 }
  0x52   :  { %780 = vmatmul.mubr.msk.bf16.gmra.mrb[32].mxu0 %vm125_vm1, %v85_v13  ;;  %824 = vmatmul.mubr.msk.bf16.gmra.mrb[32].mxu1 %vm125_vm1, %v265_v14 }
  0xe5   :  { %v187_v0 = vpop.f32.mrb[0].mxu0  ;;  %v366_v18 = vpop.f32.mrb[0].mxu1 }
  0xe6   :  { %v188_v17 = vadd.f32 %v1079_v15, %v187_v0  ;;  %v749_v19 = vpop.f32.mrb[1].mxu0  ;;  %v367_v20 = vadd.f32 %v1084_v16, %v366_v18  ;;  %v793_v21 = vpop.f32.mrb[1].mxu1 }
  0xe7   :  { %v190_v22 = vpop.f32.mrb[2].mxu0  ;;  %v369_v25 = vpop.f32.mrb[2].mxu1 }
  0xe8   :  { %v679_v23 = vpack.c.bf16 %v188_v17, %v188_v17  ;;  %v191_v24 = vadd.f32 %v1079_v15, %v190_v22  ;;  %v750_v26 = vpop.f32.mrb[3].mxu0  ;;  %v696_v27 = vpack.c.bf16 %v367_v20, %v367_v20  ;;  %v370_v28 = vadd.f32 %v1084_v16, %v369_v25  ;;  %v794_v29 = vpop.f32.mrb[3].mxu1 }
  0xea   :  { %506 = vst.msk [vmem:[%s1262_s6] sm:$0xf] %vm505_vm2, %v679_v23  ;;  %v680_v30 = vpack.c.bf16 %v191_v24, %v191_v24  ;;  %592 = vst.msk [vmem:[%s1263_s7] sm:$0xf] %vm505_vm2, %v696_v27  ;;  %v697_v31 = vpack.c.bf16 %v370_v28, %v370_v28 }
  0xec   :  { %507 = vst.msk [vmem:[%s1262_s6 + $0x4] sm:$0xf] %vm505_vm2, %v680_v30  ;;  %593 = vst.msk [vmem:[%s1263_s7 + $0x4] sm:$0xf] %vm505_vm2, %v697_v31 }
  0xed   :  { %v195_v32 = vpop.f32.mrb[4].mxu0  ;;  %v374_v34 = vpop.f32.mrb[4].mxu1 }
  0xee   :  { %v196_v33 = vadd.f32 %v1079_v15, %v195_v32  ;;  %v753_v35 = vpop.f32.mrb[5].mxu0  ;;  %v375_v36 = vadd.f32 %v1084_v16, %v374_v34  ;;  %v797_v37 = vpop.f32.mrb[5].mxu1 }
  0xef   :  { %v198_v38 = vpop.f32.mrb[6].mxu0  ;;  %v377_v41 = vpop.f32.mrb[6].mxu1 }
  0xf0   :  { %v681_v39 = vpack.c.bf16 %v196_v33, %v196_v33  ;;  %v199_v40 = vadd.f32 %v1079_v15, %v198_v38  ;;  %v754_v42 = vpop.f32.mrb[7].mxu0  ;;  %v698_v43 = vpack.c.bf16 %v375_v36, %v375_v36  ;;  %v378_v44 = vadd.f32 %v1084_v16, %v377_v41  ;;  %v798_v45 = vpop.f32.mrb[7].mxu1 }
  0xf2   :  { %508 = vst.msk [vmem:[%s1262_s6 + $0x8] sm:$0xf] %vm505_vm2, %v681_v39  ;;  %v682_v46 = vpack.c.bf16 %v199_v40, %v199_v40  ;;  %594 = vst.msk [vmem:[%s1263_s7 + $0x8] sm:$0xf] %vm505_vm2, %v698_v43  ;;  %v699_v47 = vpack.c.bf16 %v378_v44, %v378_v44 }
  0xf4   :  { %509 = vst.msk [vmem:[%s1262_s6 + $0xc] sm:$0xf] %vm505_vm2, %v682_v46  ;;  %595 = vst.msk [vmem:[%s1263_s7 + $0xc] sm:$0xf] %vm505_vm2, %v699_v47 }
  0xf5   :  { %v203_v48 = vpop.f32.mrb[8].mxu0  ;;  %v382_v50 = vpop.f32.mrb[8].mxu1 }
  0xf6   :  { %v204_v49 = vadd.f32 %v1079_v15, %v203_v48  ;;  %v757_v51 = vpop.f32.mrb[9].mxu0  ;;  %v383_v52 = vadd.f32 %v1084_v16, %v382_v50  ;;  %v801_v53 = vpop.f32.mrb[9].mxu1 }
  0xf7   :  { %v206_v54 = vpop.f32.mrb[10].mxu0  ;;  %v385_v57 = vpop.f32.mrb[10].mxu1 }
  0xf8   :  { %v683_v55 = vpack.c.bf16 %v204_v49, %v204_v49  ;;  %v207_v56 = vadd.f32 %v1079_v15, %v206_v54  ;;  %v758_v58 = vpop.f32.mrb[11].mxu0  ;;  %v700_v59 = vpack.c.bf16 %v383_v52, %v383_v52  ;;  %v386_v60 = vadd.f32 %v1084_v16, %v385_v57  ;;  %v802_v61 = vpop.f32.mrb[11].mxu1 }
  0xfa   :  { %510 = vst.msk [vmem:[%s1262_s6 + $0x10] sm:$0xf] %vm505_vm2, %v683_v55  ;;  %v684_v62 = vpack.c.bf16 %v207_v56, %v207_v56  ;;  %596 = vst.msk [vmem:[%s1263_s7 + $0x10] sm:$0xf] %vm505_vm2, %v700_v59  ;;  %v701_v63 = vpack.c.bf16 %v386_v60, %v386_v60 }
  0xfc   :  { %511 = vst.msk [vmem:[%s1262_s6 + $0x14] sm:$0xf] %vm505_vm2, %v684_v62  ;;  %597 = vst.msk [vmem:[%s1263_s7 + $0x14] sm:$0xf] %vm505_vm2, %v701_v63 }
  0xfd   :  { %v211_v1 = vpop.f32.mrb[12].mxu0  ;;  %v390_v3 = vpop.f32.mrb[12].mxu1 }
  0xfe   :  { %v212_v2 = vadd.f32 %v1079_v15, %v211_v1  ;;  %v761_v4 = vpop.f32.mrb[13].mxu0  ;;  %v391_v5 = vadd.f32 %v1084_v16, %v390_v3  ;;  %v805_v6 = vpop.f32.mrb[13].mxu1 }
  0xff   :  { %v214_v7 = vpop.f32.mrb[14].mxu0  ;;  %v393_v10 = vpop.f32.mrb[14].mxu1 }
 0x100   :  { %v685_v8 = vpack.c.bf16 %v212_v2, %v212_v2  ;;  %v215_v9 = vadd.f32 %v1079_v15, %v214_v7  ;;  %v762_v11 = vpop.f32.mrb[15].mxu0  ;;  %v702_v12 = vpack.c.bf16 %v391_v5, %v391_v5  ;;  %v394_v13 = vadd.f32 %v1084_v16, %v393_v10  ;;  %v806_v14 = vpop.f32.mrb[15].mxu1 }
 0x102   :  { %512 = vst.msk [vmem:[%s1262_s6 + $0x18] sm:$0xf] %vm505_vm2, %v685_v8  ;;  %v686_v0 = vpack.c.bf16 %v215_v9, %v215_v9  ;;  %598 = vst.msk [vmem:[%s1263_s7 + $0x18] sm:$0xf] %vm505_vm2, %v702_v12  ;;  %v703_v17 = vpack.c.bf16 %v394_v13, %v394_v13 }
 0x104   :  { %513 = vst.msk [vmem:[%s1262_s6 + $0x1c] sm:$0xf] %vm505_vm2, %v686_v0  ;;  %599 = vst.msk [vmem:[%s1263_s7 + $0x1c] sm:$0xf] %vm505_vm2, %v703_v17 }
 0x105   :  { %v219_v18 = vpop.f32.mrb[16].mxu0  ;;  %v398_v20 = vpop.f32.mrb[16].mxu1 }
 0x106   :  { %v220_v19 = vadd.f32 %v1079_v15, %v219_v18  ;;  %v765_v21 = vpop.f32.mrb[17].mxu0  ;;  %v399_v22 = vadd.f32 %v1084_v16, %v398_v20  ;;  %v809_v23 = vpop.f32.mrb[17].mxu1 }
 0x107   :  { %v222_v24 = vpop.f32.mrb[18].mxu0  ;;  %v401_v27 = vpop.f32.mrb[18].mxu1 }
 0x108   :  { %v687_v25 = vpack.c.bf16 %v220_v19, %v220_v19  ;;  %v223_v26 = vadd.f32 %v1079_v15, %v222_v24  ;;  %v766_v28 = vpop.f32.mrb[19].mxu0  ;;  %v704_v29 = vpack.c.bf16 %v399_v22, %v399_v22  ;;  %v402_v30 = vadd.f32 %v1084_v16, %v401_v27  ;;  %v810_v31 = vpop.f32.mrb[19].mxu1 }
 0x10a   :  { %514 = vst.msk [vmem:[%s1262_s6 + $0x20] sm:$0xf] %vm505_vm2, %v687_v25  ;;  %v688_v32 = vpack.c.bf16 %v223_v26, %v223_v26  ;;  %600 = vst.msk [vmem:[%s1263_s7 + $0x20] sm:$0xf] %vm505_vm2, %v704_v29  ;;  %v705_v33 = vpack.c.bf16 %v402_v30, %v402_v30 }
 0x10c   :  { %515 = vst.msk [vmem:[%s1262_s6 + $0x24] sm:$0xf] %vm505_vm2, %v688_v32  ;;  %601 = vst.msk [vmem:[%s1263_s7 + $0x24] sm:$0xf] %vm505_vm2, %v705_v33 }
 0x10d   :  { %v227_v34 = vpop.f32.mrb[20].mxu0  ;;  %v406_v36 = vpop.f32.mrb[20].mxu1 }
 0x10e   :  { %v228_v35 = vadd.f32 %v1079_v15, %v227_v34  ;;  %v769_v37 = vpop.f32.mrb[21].mxu0  ;;  %v407_v38 = vadd.f32 %v1084_v16, %v406_v36  ;;  %v813_v39 = vpop.f32.mrb[21].mxu1 }
 0x10f   :  { %v230_v40 = vpop.f32.mrb[22].mxu0  ;;  %v409_v43 = vpop.f32.mrb[22].mxu1 }
 0x110   :  { %v689_v41 = vpack.c.bf16 %v228_v35, %v228_v35  ;;  %v231_v42 = vadd.f32 %v1079_v15, %v230_v40  ;;  %v770_v44 = vpop.f32.mrb[23].mxu0  ;;  %v706_v45 = vpack.c.bf16 %v407_v38, %v407_v38  ;;  %v410_v46 = vadd.f32 %v1084_v16, %v409_v43  ;;  %v814_v47 = vpop.f32.mrb[23].mxu1 }
 0x112   :  { %516 = vst.msk [vmem:[%s1262_s6 + $0x28] sm:$0xf] %vm505_vm2, %v689_v41  ;;  %v690_v48 = vpack.c.bf16 %v231_v42, %v231_v42  ;;  %602 = vst.msk [vmem:[%s1263_s7 + $0x28] sm:$0xf] %vm505_vm2, %v706_v45  ;;  %v707_v49 = vpack.c.bf16 %v410_v46, %v410_v46 }
 0x114   :  { %517 = vst.msk [vmem:[%s1262_s6 + $0x2c] sm:$0xf] %vm505_vm2, %v690_v48  ;;  %603 = vst.msk [vmem:[%s1263_s7 + $0x2c] sm:$0xf] %vm505_vm2, %v707_v49 }
 0x115   :  { %v235_v50 = vpop.f32.mrb[24].mxu0  ;;  %v414_v52 = vpop.f32.mrb[24].mxu1 }
 0x116   :  { %v236_v51 = vadd.f32 %v1079_v15, %v235_v50  ;;  %v773_v53 = vpop.f32.mrb[25].mxu0  ;;  %v415_v54 = vadd.f32 %v1084_v16, %v414_v52  ;;  %v817_v55 = vpop.f32.mrb[25].mxu1 }
 0x117   :  { %v238_v56 = vpop.f32.mrb[26].mxu0  ;;  %v417_v59 = vpop.f32.mrb[26].mxu1 }
 0x118   :  { %v691_v57 = vpack.c.bf16 %v236_v51, %v236_v51  ;;  %v239_v58 = vadd.f32 %v1079_v15, %v238_v56  ;;  %v774_v60 = vpop.f32.mrb[27].mxu0  ;;  %v708_v61 = vpack.c.bf16 %v415_v54, %v415_v54  ;;  %v418_v62 = vadd.f32 %v1084_v16, %v417_v59  ;;  %v818_v63 = vpop.f32.mrb[27].mxu1 }
 0x11a   :  { %518 = vst.msk [vmem:[%s1262_s6 + $0x30] sm:$0xf] %vm505_vm2, %v691_v57  ;;  %v692_v1 = vpack.c.bf16 %v239_v58, %v239_v58  ;;  %604 = vst.msk [vmem:[%s1263_s7 + $0x30] sm:$0xf] %vm505_vm2, %v708_v61  ;;  %v709_v2 = vpack.c.bf16 %v418_v62, %v418_v62 }
 0x11c   :  { %519 = vst.msk [vmem:[%s1262_s6 + $0x34] sm:$0xf] %vm505_vm2, %v692_v1  ;;  %605 = vst.msk [vmem:[%s1263_s7 + $0x34] sm:$0xf] %vm505_vm2, %v709_v2 }
 0x11d   :  { %v243_v3 = vpop.f32.mrb[28].mxu0  ;;  %v422_v5 = vpop.f32.mrb[28].mxu1 }
 0x11e   :  { %v244_v4 = vadd.f32 %v1079_v15, %v243_v3  ;;  %v777_v6 = vpop.f32.mrb[29].mxu0  ;;  %v423_v7 = vadd.f32 %v1084_v16, %v422_v5  ;;  %v821_v8 = vpop.f32.mrb[29].mxu1 }
 0x11f   :  { %v246_v9 = vpop.f32.mrb[30].mxu0  ;;  %v425_v12 = vpop.f32.mrb[30].mxu1 }
 0x120   :  { %v693_v10 = vpack.c.bf16 %v244_v4, %v244_v4  ;;  %v247_v11 = vadd.f32 %v1079_v15, %v246_v9  ;;  %v778_v13 = vpop.f32.mrb[31].mxu0  ;;  %v710_v14 = vpack.c.bf16 %v423_v7, %v423_v7  ;;  %v426_v0 = vadd.f32 %v1084_v16, %v425_v12  ;;  %v822_v17 = vpop.f32.mrb[31].mxu1 }
 0x122   :  { %520 = vst.msk [vmem:[%s1262_s6 + $0x38] sm:$0xf] %vm505_vm2, %v693_v10  ;;  %v694_v18 = vpack.c.bf16 %v247_v11, %v247_v11  ;;  %606 = vst.msk [vmem:[%s1263_s7 + $0x38] sm:$0xf] %vm505_vm2, %v710_v14  ;;  %v711_v19 = vpack.c.bf16 %v426_v0, %v426_v0 }
 0x124   :  { %521 = vst.msk [vmem:[%s1262_s6 + $0x3c] sm:$0xf] %vm505_vm2, %v694_v18  ;;  %607 = vst.msk [vmem:[%s1263_s7 + $0x3c] sm:$0xf] %vm505_vm2, %v711_v19 }
 0x125   :  { %v251_v20 = vpop.f32.mrb[32].mxu0  ;;  %v430_v22 = vpop.f32.mrb[32].mxu1 }
 0x126   :  { %v252_v21 = vadd.f32 %v1079_v15, %v251_v20  ;;  %v781_v23 = vpop.f32.mrb[33].mxu0  ;;  %v431_v24 = vadd.f32 %v1084_v16, %v430_v22  ;;  %v825_v25 = vpop.f32.mrb[33].mxu1 }
 0x127   :  { %v254_v26 = vpop.f32.mrb[34].mxu0  ;;  %v433_v28 = vpop.f32.mrb[34].mxu1 }
 0x128   :  { %v695_v27 = vpack.c.bf16 %v252_v21, %v252_v21  ;;  %v782_v29 = vpop.f32.mrb[35].mxu0  ;;  %v712_v30 = vpack.c.bf16 %v431_v24, %v431_v24  ;;  %v826_v31 = vpop.f32.mrb[35].mxu1 }
 0x12a   :  { %522 = vst.msk [vmem:[%s1262_s6 + $0x40] sm:$0xf] %vm505_vm2, %v695_v27  ;;  %608 = vst.msk [vmem:[%s1263_s7 + $0x40] sm:$0xf] %vm505_vm2, %v712_v30 }

// kernel: memory_attention_layer_forward.13
= control target key start
LH: loop header
LB: loop body
LE: loop exit
PB: predicated region body
PF: predicated region fallthrough
CT: control target
= control target key end

     0   :  { %s1364_s24 = smov 0   ;;  %s1366_s25 = smov 0   ;;  %s1582_s0 = inlined_call_operand.vmem [shape: bf16[2,16,64], index: 0, kind: input, shape index: {}]   ;;  %s1583_s1 = inlined_call_operand.vmem [shape: bf16[2,68,64], index: 1, kind: input, shape index: {}]   ;;  %s1584_s2 = inlined_call_operand.vmem [shape: bf16[2,68,64], index: 2, kind: input, shape index: {}]   ;;  %s1585_s3 = inlined_call_operand.vmem [shape: f32[16,64], index: 3, kind: input, shape index: {}]   ;;  %s1586_s4 = inlined_call_operand.vmem [shape: f32[16,64], index: 4, kind: input, shape index: {}]   ;;  %s1587_s5 = inlined_call_operand.vmem [shape: f32[68,64], index: 5, kind: input, shape index: {}]   ;;  %s1588_s6 = inlined_call_operand.vmem [shape: f32[68,64], index: 6, kind: input, shape index: {}]   ;;  %s1589_s7 = inlined_call_operand.vmem [shape: bf16[2,16,64], index: 7, kind: output, shape index: {}]  }
   0x1   :  { %s1368_s26 = smov 0  }
   0x2 LB: > { %s36_s27 = sadd.s32 1, %s1312_s25  ;;  %p1109_p0 = scmp.ge.s32.totalorder %s1316_s26, 1  ;;  %s1316_s26 = sphi %s1368_s26, %s17_s26   ;;  %s1312_s25 = sphi %s1366_s25, %s1591_s25   ;;  %s1308_s24 = sphi %s1364_s24, %s1590_s24  }
   0x3   : > { %p38_p1 = scmp.ge.s32.totalorder %s36_s27, 2  ;;  %p343_p2 = scmp.lt.s32.totalorder %s1316_s26, 3 }
   0x5   : > { %s1593_s27 = smov (%p38_p1, %s36_s27), 0  ;;  %p344_p3 = pnand %p1109_p0, %p343_p2 }
   0x6   : > { %p422_p4 = scmp.lt.s32.totalorder (!%p344_p3), %s1308_s24, 1  ;;  %vm495_vm0 = vcmask (!%p344_p3), 523264   ;;  %v1318_v2 = vmov (!%p344_p3), 0.0   ;;  %s1319_s12 = smov (!%p344_p3), 96   ;;  %vm1321_vm1 = vmmov (!%p344_p3), 0   ;;  %v533_v25 = vld [vmem:[%s1587_s5] sm:$0xff] (!%p344_p3) }
   0x7   : > { %347 = sbr.rel (%p344_p3) target bundleno = 992 (0x3e0), region = 48  ;;  %1166 = vmatprep.subr.bf16.mxu0 (!%p344_p3), %v1318_v2  ;;  %496 = vst.msk [vmem:[#allocation4] sm:$0xff] (!%p344_p3), %vm495_vm0, %v1318_v2  ;;  %497 = vst.msk [vmem:[#allocation4 + $0x8] sm:$0xff] (!%p344_p3), %vm495_vm0, %v1318_v2  ;;  %1180 = vmatprep.subr.bf16.mxu1 (!%p344_p3), %v1318_v2  ;;  %s1320_s14 = smov (!%p344_p3), 32   ;;  %v534_v26 = vld [vmem:[%s1587_s5 + $0x8] sm:$0xff] (!%p344_p3)  ;;  %v535_v27 = vld [vmem:[%s1587_s5 + $0x10] sm:$0xff] (!%p344_p3) }
   0x8   : > { %1176 = vmatprep.mubr.msk.bf16.mxu0 (!%p344_p3), %vm1321_vm1, %v1318_v2  ;;  %1190 = vmatprep.mubr.msk.bf16.mxu1 (!%p344_p3), %vm1321_vm1, %v1318_v2  ;;  %vm567_vm2 = vcmask (!%p344_p3), 261120   ;;  %v536_v30 = vld [vmem:[%s1587_s5 + $0x18] sm:$0xff] (!%p344_p3)  ;;  %v537_v31 = vld [vmem:[%s1587_s5 + $0x20] sm:$0xff] (!%p344_p3)  ;;  %v538_v32 = vld [vmem:[%s1587_s5 + $0x28] sm:$0xff] (!%p344_p3)  ;;  %vm490_vm3 = vcmask (!%p344_p3), 7168   ;;  %vm741_vm4 = vcmask (!%p344_p3), 556032  }
   0x9   : > { %v544_v36 = vld [vmem:[%s1588_s6 + $0x10] sm:$0xff] (!%p344_p3)  ;;  %v545_v42 = vld [vmem:[%s1588_s6 + $0x18] sm:$0xff] (!%p344_p3)  ;;  %v542_v45 = vld [vmem:[%s1588_s6] sm:$0xff] (!%p344_p3)  ;;  %493 = vst.msk [vmem:[#allocation3] sm:$0xff] (!%p344_p3), %vm490_vm3, %v1318_v2  ;;  %vm832_vm5 = vcmask (!%p344_p3), 1041408   ;;  %vm912_vm6 = vcmask (!%p344_p3), 519168  }
   0xa   : > { %v543_v46 = vld [vmem:[%s1588_s6 + $0x8] sm:$0xff] (!%p344_p3)  ;;  %v539_v61 = vld [vmem:[%s1587_s5 + $0x30] sm:$0xff] (!%p344_p3)  ;;  %494 = vst.msk [vmem:[#allocation3 + $0x8] sm:$0xff] (!%p344_p3), %vm490_vm3, %v1318_v2 }
   0xe   : > { %s1595_s24 = smov (!%p422_p4, %s1308_s24), 1 }
   0xf   : > { %s1194_s28 = smul.u32 36, %s1595_s24  ;;  %s1127_s13 = sshll.u32 %s1595_s24, 3 }
  0x10   : > { %s429_s17 = scalar_lea.vmem %s1582_s0, %s1127_s13  ;;  %s483_s10 = scalar_lea.vmem %s1589_s7, %s1127_s13 }
  0x11   : > { %s1388_s8 = scalar_lea.vmem %s1583_s1, %s1194_s28  ;;  %s1405_s11 = scalar_lea.vmem %s1584_s2, %s1194_s28  ;;  %v1432_v18 = vld [vmem:[%s429_s17] sm:$0xff]  }
  0x12   : > { %v1391_v0 = vld [vmem:[%s1388_s8] sm:$0xff]   ;;  %v1394_v1 = vld [vmem:[%s1388_s8 + $0x8] sm:$0xff]   ;;  %v1412_v7 = vld [vmem:[%s1388_s8 + $0x10] sm:$0xff]   ;;  %v1133_v20 = vunpack.c.l.bf16 %v1432_v18  ;;  %v1134_v21 = vunpack.c.h.bf16 %v1432_v18 }
  0x13   : > { %v1137_v3 = vunpack.c.l.bf16 %v1391_v0  ;;  %v1138_v4 = vunpack.c.h.bf16 %v1391_v0  ;;  %v1141_v5 = vunpack.c.l.bf16 %v1394_v1  ;;  %v1142_v6 = vunpack.c.h.bf16 %v1394_v1  ;;  %v1417_v12 = vld [vmem:[%s1388_s8 + $0x18] sm:$0xff]   ;;  %v510_v17 = vld [vmem:[%s1388_s8 + $0x20] sm:$0x3]  ;;  %v547_v1 = vld [vmem:[%s1588_s6 + $0x28] sm:$0xff] }
  0x14   : > { %v1145_v10 = vunpack.c.l.bf16 %v1412_v7  ;;  %v1146_v11 = vunpack.c.h.bf16 %v1412_v7  ;;  %v1149_v14 = vunpack.c.l.bf16 %v1417_v12  ;;  %v1150_v15 = vunpack.c.h.bf16 %v1417_v12  ;;  %v546_v0 = vld [vmem:[%s1588_s6 + $0x20] sm:$0xff]  ;;  %v530_v12 = vld [vmem:[%s1585_s3 + $0x8] sm:$0xff] }
  0x15   : > { %v1225_v8 = vpack.i.bf16 %v1138_v4, %v1137_v3  ;;  %v1235_v9 = vpack.i.bf16 %v1142_v6, %v1141_v5  ;;  %v1434_v19 = vunpack.c.l.bf16 %v510_v17  ;;  %v1270_v22 = vpack.i.bf16 %v1134_v21, %v1133_v20 }
  0x16   : > { %v1250_v13 = vpack.i.bf16 %v1146_v11, %v1145_v10  ;;  %v1260_v16 = vpack.i.bf16 %v1150_v15, %v1149_v14  ;;  %v574_v38 = vmul.f32 %v1137_v3, %v533_v25  ;;  %v575_v39 = vmul.f32 %v1138_v4, %v534_v26 }
  0x17   : > { %1226 = vrot.lane.b32.xlu0 %v1225_v8, %s1319_s12  ;;  %1236 = vrot.lane.b32.xlu1 %v1235_v9, %s1319_s12  ;;  %v576_v47 = vmul.f32 %v1141_v5, %v535_v27  ;;  %v577_v48 = vmul.f32 %v1142_v6, %v536_v30  ;;  %v578_v49 = vmul.f32 %v1145_v10, %v537_v31 }
  0x18   : > { %v579_v50 = vmul.f32 %v1146_v11, %v538_v32  ;;  %v540_v11 = vld [vmem:[%s1587_s5 + $0x38] sm:$0xff] }
  0x1b   : > { %1231 = vrot.lane.b32.xlu0 %v1225_v8, %s1320_s14  ;;  %1241 = vrot.lane.b32.xlu1 %v1235_v9, %s1320_s14 }
  0x1f   : > { %1251 = vrot.lane.b32.xlu1 %v1250_v13, %s1320_s14  ;;  %1246 = vrot.lane.b32.xlu0 %v1250_v13, %s1319_s12  ;;  %v580_v13 = vmul.f32 %v1149_v14, %v539_v61 }
  0x23   : > { %1261 = vrot.lane.b32.xlu1 %v1260_v16, %s1320_s14  ;;  %1256 = vrot.lane.b32.xlu0 %v1260_v16, %s1319_s12 }
  0x27   : > { %635 = vrot.lane.b32.xlu1 %v1434_v19, %s1320_s14  ;;  %608 = vrot.lane.b32.xlu0 %v1434_v19, %s1319_s12 }
  0x2b   : > { %1271 = vrot.lane.b32.xlu1 %v1270_v22, %s1320_s14  ;;  %1266 = vrot.lane.b32.xlu0 %v1270_v22, %s1319_s12 }
  0x89   : > { %v1227_v23 = vpop.permute.xlu0 %1226  ;;  %v1237_v24 = vpop.permute.xlu1 %1236 }
  0x8a   : > { %v1239_v28 = vunpack.i.h.bf16 %v1237_v24  ;;  %v1238_v29 = vunpack.i.l.bf16 %v1237_v24  ;;  %v1229_v33 = vunpack.i.h.bf16 %v1227_v23  ;;  %v1228_v34 = vunpack.i.l.bf16 %v1227_v23 }
  0x8d   : > { %v1232_v35 = vpop.permute.xlu0 %1231  ;;  %v1242_v37 = vpop.permute.xlu1 %1241 }
  0x8e   : > { %v1234_v40 = vunpack.i.h.bf16 %v1232_v35  ;;  %v1233_v41 = vunpack.i.l.bf16 %v1232_v35  ;;  %v1244_v43 = vunpack.i.h.bf16 %v1242_v37  ;;  %v1243_v44 = vunpack.i.l.bf16 %v1242_v37 }
  0x90   : > { %v646_v51 = vsel %vm567_vm2, %v1228_v34, %v1233_v41  ;;  %v647_v52 = vsel %vm567_vm2, %v1229_v33, %v1234_v40  ;;  %v648_v53 = vsel %vm567_vm2, %v1238_v29, %v1243_v44  ;;  %v649_v54 = vsel %vm567_vm2, %v1239_v28, %v1244_v43  ;;  %v548_v28 = vld [vmem:[%s1588_s6 + $0x30] sm:$0xff]  ;;  %v549_v29 = vld [vmem:[%s1588_s6 + $0x38] sm:$0xff]  ;;  %v529_v44 = vld [vmem:[%s1585_s3] sm:$0xff] }
  0x91   : > { %v657_v55 = vmul.f32 %v648_v53, %v544_v36  ;;  %v658_v56 = vmul.f32 %v649_v54, %v545_v42  ;;  %v655_v57 = vmul.f32 %v646_v51, %v542_v45  ;;  %v656_v58 = vmul.f32 %v647_v52, %v543_v46  ;;  %v1252_v59 = vpop.permute.xlu1 %1251  ;;  %v1247_v60 = vpop.permute.xlu0 %1246 }
  0x92   : > { %v1254_v62 = vunpack.i.h.bf16 %v1252_v59  ;;  %v1253_v63 = vunpack.i.l.bf16 %v1252_v59  ;;  %v1249_v3 = vunpack.i.h.bf16 %v1247_v60  ;;  %v1248_v4 = vunpack.i.l.bf16 %v1247_v60 }
  0x93   : > { %v664_v5 = vadd.f32 %v655_v57, %v574_v38  ;;  %v665_v6 = vadd.f32 %v656_v58, %v575_v39  ;;  %v666_v7 = vadd.f32 %v657_v55, %v576_v47  ;;  %v667_v8 = vadd.f32 %v658_v56, %v577_v48 }
  0x94   : > { %v651_v9 = vsel %vm567_vm2, %v1249_v3, %v1254_v62  ;;  %v650_v10 = vsel %vm567_vm2, %v1248_v4, %v1253_v63  ;;  %v581_v34 = vmul.f32 %v1150_v15, %v540_v11  ;;  %v552_v54 = vmul.f32 %v1134_v21, %v530_v12  ;;  %v550_v21 = vld [vmem:[%s1588_s6 + $0x40] sm:$0xf] }
  0x95   : > { %v674_v16 = vpack.c.bf16 %v665_v6, %v664_v5  ;;  %v660_v17 = vmul.f32 %v651_v9, %v547_v1  ;;  %v659_v22 = vmul.f32 %v650_v10, %v546_v0  ;;  %v675_v23 = vpack.c.bf16 %v667_v8, %v666_v7  ;;  %v1262_v24 = vpop.permute.xlu1 %1261  ;;  %v1257_v25 = vpop.permute.xlu0 %1256 }
  0x96   : > { %v1264_v26 = vunpack.i.h.bf16 %v1262_v24  ;;  %v1263_v27 = vunpack.i.l.bf16 %v1262_v24  ;;  %v1259_v30 = vunpack.i.h.bf16 %v1257_v25  ;;  %v1258_v31 = vunpack.i.l.bf16 %v1257_v25  ;;  %v1277_v25 = vld [vmem:[%s1405_s11] sm:$0xff]  }
  0x97   : > { %v684_v14 = vsel %vm495_vm0, %v674_v16, 0  ;;  %v668_v32 = vadd.f32 %v659_v22, %v578_v49  ;;  %v669_v33 = vadd.f32 %v660_v17, %v579_v50  ;;  %v531_v49 = vld [vmem:[%s1586_s4] sm:$0xff]  ;;  %v532_v50 = vld [vmem:[%s1586_s4 + $0x8] sm:$0xff]  ;;  %v687_v53 = vsel %vm495_vm0, %v675_v23, 0  ;;  %1181 = vmatpush3.bf16.msra.mxu1 %v1277_v25 }
  0x98   : > { %1167 = vmatpush3.bf16.xpose.msra.mxu0 %v684_v14  ;;  %v653_v35 = vsel %vm567_vm2, %v1259_v30, %v1264_v26  ;;  %v652_v36 = vsel %vm567_vm2, %v1258_v31, %v1263_v27  ;;  %v551_v55 = vmul.f32 %v1133_v20, %v529_v44  ;;  %v541_v20 = vld [vmem:[%s1587_s5 + $0x40] sm:$0xf]  ;;  %v1322_v7 = vmov -inf   ;;  %1182 = vmatprep.subr.bf16.mxu1 %v1318_v2  ;;  %v1278_v30 = vld [vmem:[%s1405_s11 + $0x8] sm:$0xff]   ;;  %v1279_v31 = vld [vmem:[%s1405_s11 + $0x10] sm:$0xff]  }
  0x99   : > { %1168 = vmatprep.subr.bf16.mxu0 %v1318_v2  ;;  %v662_v37 = vmul.f32 %v653_v35, %v549_v29  ;;  %v661_v38 = vmul.f32 %v652_v36, %v548_v28  ;;  %v676_v39 = vpack.c.bf16 %v669_v33, %v668_v32  ;;  %v636_v40 = vpop.permute.xlu1 %635  ;;  %v609_v41 = vpop.permute.xlu0 %608  ;;  %v582_v1 = vmul.f32 %v541_v20, %v1434_v19  ;;  %v1280_v14 = vld [vmem:[%s1405_s11 + $0x18] sm:$0xff]   ;;  %v1281_v32 = vld [vmem:[%s1405_s11 + $0x20] ss:$0 sps:$4 sm:$0x33]  }
  0x9a   : > { %v654_v18 = vsel %vm567_vm2, %v609_v41, %v636_v40  ;;  %491 = vst.msk [vmem:[#allocation2] sm:$0xff] %vm490_vm3, %v1322_v7  ;;  %492 = vst.msk [vmem:[#allocation2 + $0x8] sm:$0xff] %vm490_vm3, %v1322_v7  ;;  %v1323_v16 = vmov 0   ;;  %v834_v33 = vsel %vm832_vm5, %v1281_v32, 0 }
  0x9b   : > { %v670_v42 = vadd.f32 %v661_v38, %v580_v13  ;;  %v671_v43 = vadd.f32 %v662_v37, %v581_v34  ;;  %v690_v62 = vsel %vm495_vm0, %v676_v39, 0  ;;  %v663_v0 = vmul.f32 %v654_v18, %v550_v21  ;;  %1275 = vset.pattern.permute.xlu0 %v1323_v16  ;;  %1276 = vset.pattern.permute.xlu1 %v1323_v16 }
  0x9c   : > { %1183 = vmatpush3.bf16.msra.mxu1 %v1278_v30 }
  0x9d   : > { %v677_v15 = vpack.c.bf16 %v671_v43, %v670_v42  ;;  %v1272_v45 = vpop.permute.xlu1 %1271  ;;  %v1267_v46 = vpop.permute.xlu0 %1266  ;;  %v672_v4 = vadd.f32 %v663_v0, %v582_v1  ;;  %1184 = vmatprep.subr.bf16.mxu1 %v1318_v2 }
  0x9e   : > { %v1274_v47 = vunpack.i.h.bf16 %v1272_v45  ;;  %v1273_v48 = vunpack.i.l.bf16 %v1272_v45  ;;  %v1269_v51 = vunpack.i.h.bf16 %v1267_v46  ;;  %v1268_v52 = vunpack.i.l.bf16 %v1267_v46  ;;  %v772_v46 = vld [vmem:[#allocation3] sm:$0xff] }
  0x9f   : > { %v693_v3 = vsel %vm495_vm0, %v677_v15, 0  ;;  %v678_v5 = vpack.c.bf16 %v672_v4, %v672_v4 }
  0xa0   : > { %1169 = vmatpush3.bf16.xpose.msra.mxu0 %v687_v53  ;;  %v569_v56 = vsel %vm567_vm2, %v1269_v51, %v1274_v47  ;;  %v568_v57 = vsel %vm567_vm2, %v1268_v52, %v1273_v48  ;;  %1185 = vmatpush3.bf16.msra.mxu1 %v1279_v31  ;;  %v773_v47 = vld [vmem:[#allocation3 + $0x8] sm:$0xff] }
  0xa1   : > { %1170 = vmatprep.subr.bf16.mxu0 %v1318_v2  ;;  %v571_v58 = vmul.f32 %v569_v56, %v532_v50  ;;  %v570_v59 = vmul.f32 %v568_v57, %v531_v49  ;;  %v696_v6 = vsel %vm495_vm0, %v678_v5, 0  ;;  %v739_v17 = vld [vmem:[#allocation2] sm:$0xff]  ;;  %v740_v23 = vld [vmem:[#allocation2 + $0x8] sm:$0xff]  ;;  %1186 = vmatprep.subr.bf16.mxu1 %v1318_v2 }
  0xa3   : > { %v573_v60 = vadd.f32 %v571_v58, %v552_v54  ;;  %v572_v61 = vadd.f32 %v570_v59, %v551_v55  ;;  %v787_v58 = vld [vmem:[#allocation4] sm:$0xff] }
  0xa4   : > { %1187 = vmatpush3.bf16.msra.mxu1 %v1280_v14 }
  0xa5   : > { %v673_v63 = vpack.c.bf16 %v573_v60, %v572_v61  ;;  %1188 = vmatprep.subr.bf16.mxu1 %v1318_v2  ;;  %v788_v60 = vld [vmem:[#allocation4 + $0x8] sm:$0xff] }
  0xa8   : > { %1171 = vmatpush3.bf16.xpose.msra.mxu0 %v690_v62  ;;  %1189 = vmatpush3.bf16.msra.mxu1 %v834_v33 }
  0xa9   : > { %1172 = vmatprep.subr.bf16.mxu0 %v1318_v2 }
  0xb0   : > { %1173 = vmatpush3.bf16.xpose.msra.mxu0 %v693_v3 }
  0xb1   : > { %1174 = vmatprep.subr.bf16.mxu0 %v1318_v2 }
  0xb8   : > { %1175 = vmatpush3.bf16.xpose.msra.mxu0 %v696_v6 }
  0xbf   : > { %1177 = vmatmul.mubr.msk.bf16.vlgmr.msra.gmra.mrb[0].mxu0 %vm495_vm0, %v673_v63 }
 0x192   : > { %v732_v19 = vpop.f32.mrb[0].mxu0 }
 0x193   : > { %v1178_v8 = vpop.f32.mrb[1].mxu0  ;;  %v742_v9 = vsel %vm741_vm4, %v732_v19, -inf }
 0x194   : > { %743 = vmax.xlane.f32.xlu0 %v742_v9  ;;  %v735_v10 = vpop.f32.mrb[2].mxu0 }
 0x195   : > { %v1179_v11 = vpop.f32.mrb[3].mxu0  ;;  %v745_v13 = vsel %vm741_vm4, %v735_v10, -inf }
 0x196   : > { %746 = vmax.xlane.f32.xlu1 %v745_v13 }
 0x221   : > { %v744_v22 = vpop.xlane.xlu0 %743 }
 0x222   : > { %v748_v24 = vmax.f32 %v739_v17, %v744_v22 }
 0x223   : > { %v747_v26 = vpop.xlane.xlu1 %746 }
 0x224   : > { %v750_v27 = vsub.f32 %v739_v17, %v748_v24  ;;  %881 = vst.msk [vmem:[#allocation2] sm:$0xff] %vm490_vm3, %v748_v24  ;;  %v749_v28 = vmax.f32 %v740_v23, %v747_v26  ;;  %758 = vperm.xlu0 %1275, %v748_v24  }
 0x226   : > { %v751_v29 = vsub.f32 %v740_v23, %v749_v28  ;;  %882 = vst.msk [vmem:[#allocation2 + $0x8] sm:$0xff] %vm490_vm3, %v749_v28  ;;  %763 = vperm.xlu1 %1276, %v749_v28   ;;  %v752_v12 = vmul.f32 1.442695, %v750_v27 }
 0x228   : > { %v754_v2 = vmul.f32 1.442695, %v751_v29 }
 0x2a3   : > { %v759_v34 = vpop.permute.xlu0 %758 }
 0x2a4   : > { %v766_v35 = vsub.f32 %v732_v19, %v759_v34 }
 0x2a5   : > { %v764_v36 = vpop.permute.xlu1 %763 }
 0x2a6   : > { %v768_v37 = vmul.f32 1.442695, %v766_v35  ;;  %v767_v38 = vsub.f32 %v735_v10, %v764_v36 }
 0x2a8   : > { %1282 = vpow2.f32 %v768_v37  ;;  %v770_v39 = vmul.f32 1.442695, %v767_v38 }
 0x2aa   : > { %1284 = vpow2.f32 %v770_v39 }
 0x2ab   : > { %1286 = vpow2.f32 %v752_v12 }
 0x2ac   : > { %1288 = vpow2.f32 %v754_v2 }
 0x2b2   : > { %v1283_v40 = vpop.eup %1282 }
 0x2b3   : > { %v776_v41 = vsel %vm741_vm4, %v1283_v40, 0.0 }
 0x2b4   : > { %v1285_v42 = vpop.eup %1284  ;;  %777 = vadd.xlane.f32.xlu1 %v776_v41 }
 0x2b5   : > { %v779_v43 = vsel %vm741_vm4, %v1285_v42, 0.0  ;;  %v801_v44 = vpack.c.bf16 %v1285_v42, %v1283_v40  ;;  %v1287_v15 = vpop.eup %1286 }
 0x2b6   : > { %780 = vadd.xlane.f32.xlu0 %v779_v43  ;;  %v1289_v45 = vpop.eup %1288  ;;  %v774_v48 = vmul.f32 %v1287_v15, %v772_v46 }
 0x2b7   : > { %1191 = vmatmul.mubr.msk.bf16.vlgmr.msra.gmra.mrb[0].mxu1 %vm741_vm4, %v801_v44  ;;  %v775_v51 = vmul.f32 %v1289_v45, %v773_v47 }
 0x2c5   : > { %791 = vperm.xlu1 %1276, %v1287_v15  }
 0x2cc   : > { %796 = vperm.xlu0 %1275, %v1289_v45  }
 0x341   : > { %v778_v49 = vpop.xlane.xlu1 %777 }
 0x342   : > { %v782_v50 = vadd.f32 %v778_v49, %v774_v48 }
 0x343   : > { %v781_v52 = vpop.xlane.xlu0 %780 }
 0x344   : > { %785 = vst.msk [vmem:[#allocation3] sm:$0xff] %vm490_vm3, %v782_v50  ;;  %v783_v53 = vadd.f32 %v781_v52, %v775_v51 }
 0x345   : > { %v792_v59 = vpop.permute.xlu1 %791 }
 0x346   : > { %786 = vst.msk [vmem:[#allocation3 + $0x8] sm:$0xff] %vm490_vm3, %v783_v53  ;;  %v799_v62 = vmul.f32 %v792_v59, %v787_v58 }
 0x34b   : > { %v886_v54 = vld [vmem:[#allocation3] sm:$0xff]  ;;  %v797_v61 = vpop.permute.xlu0 %796 }
 0x34c   : > { %1290 = vrcp.f32 %v886_v54  ;;  %v800_v21 = vmul.f32 %v797_v61, %v788_v60 }
 0x34d   : > { %v887_v55 = vld [vmem:[#allocation3 + $0x8] sm:$0xff] }
 0x34e   : > { %1292 = vrcp.f32 %v887_v55 }
 0x356   : > { %v1291_v56 = vpop.eup %1290 }
 0x357   : > { %894 = vperm.xlu1 %1276, %v1291_v56  }
 0x358   : > { %v1293_v57 = vpop.eup %1292 }
 0x35b   : > { %899 = vperm.xlu1 %1276, %v1293_v57  }
 0x38a   : > { %v870_v63 = vpop.f32.mrb[0].mxu1 }
 0x38b   : > { %v877_v18 = vadd.f32 %v870_v63, %v799_v62  ;;  %v1192_v20 = vpop.f32.mrb[1].mxu1 }
 0x38c   : > { %v873_v0 = vpop.f32.mrb[2].mxu1 }
 0x38d   : > { %879 = vst.msk [vmem:[#allocation4] sm:$0xff] %vm495_vm0, %v877_v18  ;;  %v878_v1 = vadd.f32 %v873_v0, %v800_v21  ;;  %v1193_v3 = vpop.f32.mrb[3].mxu1 }
 0x38f   : > { %880 = vst.msk [vmem:[#allocation4 + $0x8] sm:$0xff] %vm495_vm0, %v878_v1 }
 0x394   : > { %v890_v4 = vld [vmem:[#allocation4] sm:$0xff] }
 0x396   : > { %v891_v19 = vld [vmem:[#allocation4 + $0x8] sm:$0xff] }
 0x3d6   : > { %v895_v5 = vpop.permute.xlu1 %894 }
 0x3d7   : > { %v902_v6 = vmul.f32 %v895_v5, %v890_v4 }
 0x3d9   : > { %v1129_v7 = vpack.c.bf16 %v902_v6, %v902_v6 }
 0x3da   : > { %v900_v8 = vpop.permute.xlu1 %899 }
 0x3db   : > { %913 = vst.msk [vmem:[%s483_s10] sm:$0xf] %vm912_vm6, %v1129_v7  ;;  %v903_v9 = vmul.f32 %v900_v8, %v891_v19 }
 0x3dd   : > { %v1130_v10 = vpack.c.bf16 %v903_v9, %v903_v9 }
 0x3df   : > { %914 = vst.msk [vmem:[%s483_s10 + $0x4] sm:$0xf] %vm912_vm6, %v1130_v10 }
 0x3e0 PF: > { %s17_s26 = sadd.s32 1, %s1316_s26   ;;  %s1590_s24 = smov %s1312_s25 }
 0x3e1   : > { %p14_p5 = scmp.ge.s32.totalorder %s17_s26, 4   ;;  %s1591_s25 = smov %s1593_s27 }
 0x3e3   :  { %16 = sbr.rel (!%p14_p5) target bundleno = 2 (0x2), region = 104 }

// kernel: memory_attention_layer_forward.15
= control target key start
LH: loop header
LB: loop body
LE: loop exit
PB: predicated region body
PF: predicated region fallthrough
CT: control target
= control target key end

     0   :  { %vm33_vm0 = vcmask 523264   ;;  %s593_s0 = inlined_call_operand.vmem [shape: f32[32,64], index: 0, kind: input, shape index: {}, may-alias: {0,7}]   ;;  %s594_s3 = inlined_call_operand.vmem [shape: bf16[64,128], index: 3, kind: input, shape index: {}]   ;;  %s595_s5 = inlined_call_operand.vmem [shape: bf16[128,64], index: 5, kind: input, shape index: {}]   ;;  %s596_s1 = inlined_call_operand.vmem [shape: f32[1,64], index: 1, kind: input, shape index: {}]   ;;  %s597_s2 = inlined_call_operand.vmem [shape: f32[1,64], index: 2, kind: input, shape index: {}]   ;;  %s598_s4 = inlined_call_operand.vmem [shape: f32[1,128], index: 4, kind: input, shape index: {}]   ;;  %s599_s6 = inlined_call_operand.vmem [shape: f32[1,64], index: 6, kind: input, shape index: {}]   ;;  %s600_s7 = inlined_call_operand.vmem [shape: f32[32,64], index: 7, kind: output, shape index: {}, may-alias: {0,7}]  }
   0x1   :  { %v470_v0 = vld [vmem:[%s593_s0] sm:$0xff]  ;;  %v475_v1 = vld [vmem:[%s593_s0 + $0x10] sm:$0xff]  ;;  %v480_v2 = vld [vmem:[%s593_s0 + $0x8] sm:$0xff] }
   0x2   :  { %v34_v3 = vsel %vm33_vm0, %v470_v0, 0.0  ;;  %v40_v4 = vsel %vm33_vm0, %v475_v1, 0.0  ;;  %v489_v5 = vld [vmem:[%s593_s0 + $0x18] sm:$0xff]  ;;  %v37_v6 = vsel %vm33_vm0, %v480_v2, 0.0  ;;  %v407_v28 = vld [vmem:[%s594_s3] sm:$0xff]   ;;  %v408_v29 = vld [vmem:[%s594_s3 + $0x8] sm:$0xff]  }
   0x3   :  { %35 = vadd.xlane.f32.xlu0 %v34_v3  ;;  %41 = vadd.xlane.f32.xlu1 %v40_v4  ;;  %v43_v7 = vsel %vm33_vm0, %v489_v5, 0.0  ;;  %v409_v30 = vld [vmem:[%s594_s3 + $0x10] sm:$0xff]   ;;  %v410_v31 = vld [vmem:[%s594_s3 + $0x18] sm:$0xff]   ;;  %v411_v32 = vld [vmem:[%s595_s5] sm:$0xff]  }
   0x4   :  { %375 = vmatprep.subr.bf16.mxu0 %v407_v28  ;;  %v412_v33 = vld [vmem:[%s595_s5 + $0x8] sm:$0xff]   ;;  %387 = vmatprep.subr.bf16.mxu1 %v411_v32  ;;  %v413_v34 = vld [vmem:[%s595_s5 + $0x10] sm:$0xff]   ;;  %v414_v35 = vld [vmem:[%s595_s5 + $0x18] sm:$0xff]  }
   0x5   :  { %376 = vmatpush3.bf16.msra.mxu0 %v407_v28  ;;  %388 = vmatpush3.bf16.msra.mxu1 %v411_v32  ;;  %v415_v36 = vld [vmem:[%s595_s5 + $0x20] sm:$0xff]   ;;  %v416_v37 = vld [vmem:[%s595_s5 + $0x28] sm:$0xff]  }
   0x6   :  { %377 = vmatprep.subr.bf16.mxu0 %v408_v29  ;;  %389 = vmatprep.subr.bf16.mxu1 %v412_v33  ;;  %v341_v52 = vld [vmem:[%s596_s1] ss:$0 sm:$0xff] }
   0x7   :  { %38 = vadd.xlane.f32.xlu0 %v37_v6  ;;  %44 = vadd.xlane.f32.xlu1 %v43_v7  ;;  %v342_v58 = vld [vmem:[%s597_s2] ss:$0 sm:$0xff] }
   0x9   :  { %378 = vmatpush3.bf16.msra.mxu0 %v408_v29  ;;  %390 = vmatpush3.bf16.msra.mxu1 %v412_v33 }
   0xa   :  { %379 = vmatprep.subr.bf16.mxu0 %v409_v30  ;;  %391 = vmatprep.subr.bf16.mxu1 %v413_v34 }
   0xd   :  { %380 = vmatpush3.bf16.msra.mxu0 %v409_v30  ;;  %392 = vmatpush3.bf16.msra.mxu1 %v413_v34 }
   0xe   :  { %381 = vmatprep.subr.bf16.mxu0 %v410_v31  ;;  %393 = vmatprep.subr.bf16.mxu1 %v414_v35 }
  0x11   :  { %382 = vmatpush3.bf16.msra.mxu0 %v410_v31  ;;  %394 = vmatpush3.bf16.msra.mxu1 %v414_v35 }
  0x12   :  { %395 = vmatprep.subr.bf16.mxu1 %v415_v36 }
  0x15   :  { %396 = vmatpush3.bf16.msra.mxu1 %v415_v36 }
  0x16   :  { %397 = vmatprep.subr.bf16.mxu1 %v416_v37 }
  0x19   :  { %398 = vmatpush3.bf16.msra.mxu1 %v416_v37 }
  0x90   :  { %v36_v8 = vpop.xlane.xlu0 %35  ;;  %v42_v9 = vpop.xlane.xlu1 %41 }
  0x91   :  { %v47_v10 = vmul.f32 0.015625, %v36_v8  ;;  %v49_v11 = vmul.f32 0.015625, %v42_v9 }
  0x93   :  { %v496_v12 = vsub.f32 %v470_v0, %v47_v10  ;;  %v499_v13 = vsub.f32 %v475_v1, %v49_v11  ;;  %v417_v10 = vld [vmem:[%s595_s5 + $0x30] sm:$0xff]   ;;  %v418_v11 = vld [vmem:[%s595_s5 + $0x38] sm:$0xff]  }
  0x94   :  { %v39_v14 = vpop.xlane.xlu0 %38  ;;  %v45_v15 = vpop.xlane.xlu1 %44  ;;  %399 = vmatprep.subr.bf16.mxu1 %v417_v10 }
  0x95   :  { %v48_v16 = vmul.f32 0.015625, %v39_v14  ;;  %v50_v17 = vmul.f32 0.015625, %v45_v15  ;;  %v55_v18 = vmul.f32 %v496_v12, %v496_v12  ;;  %v57_v19 = vmul.f32 %v499_v13, %v499_v13  ;;  %400 = vmatpush3.bf16.msra.mxu1 %v417_v10 }
  0x96   :  { %401 = vmatprep.subr.bf16.mxu1 %v418_v11 }
  0x97   :  { %v506_v20 = vsub.f32 %v480_v2, %v48_v16  ;;  %v509_v21 = vsub.f32 %v489_v5, %v50_v17  ;;  %v59_v22 = vsel %vm33_vm0, %v55_v18, 0.0  ;;  %v65_v23 = vsel %vm33_vm0, %v57_v19, 0.0 }
  0x98   :  { %60 = vadd.xlane.f32.xlu0 %v59_v22 }
  0x99   :  { %v56_v24 = vmul.f32 %v506_v20, %v506_v20  ;;  %v58_v25 = vmul.f32 %v509_v21, %v509_v21  ;;  %402 = vmatpush3.bf16.msra.mxu1 %v418_v11 }
  0x9b   :  { %v62_v26 = vsel %vm33_vm0, %v56_v24, 0.0  ;;  %v68_v27 = vsel %vm33_vm0, %v58_v25, 0.0 }
  0x9c   :  { %66 = vadd.xlane.f32.xlu0 %v65_v23  ;;  %63 = vadd.xlane.f32.xlu1 %v62_v26 }
  0xa0   :  { %69 = vadd.xlane.f32.xlu1 %v68_v27  ;;  %v350_v27 = vld [vmem:[%s599_s6] ss:$0 sm:$0xff] }
 0x125   :  { %v61_v38 = vpop.xlane.xlu0 %60 }
 0x126   :  { %v71_v39 = vmul.f32 0.015625, %v61_v38 }
 0x128   :  { %v75_v40 = vadd.f32 1e-05, %v71_v39 }
 0x129   :  { %v64_v41 = vpop.xlane.xlu1 %63  ;;  %v67_v42 = vpop.xlane.xlu0 %66 }
 0x12a   :  { %419 = vrsqrt.f32 %v75_v40  ;;  %v72_v43 = vmul.f32 0.015625, %v64_v41  ;;  %v73_v44 = vmul.f32 0.015625, %v67_v42 }
 0x12c   :  { %v76_v45 = vadd.f32 1e-05, %v72_v43  ;;  %v77_v46 = vadd.f32 1e-05, %v73_v44 }
 0x12d   :  { %v70_v47 = vpop.xlane.xlu1 %69 }
 0x12e   :  { %421 = vrsqrt.f32 %v76_v45  ;;  %v74_v48 = vmul.f32 0.015625, %v70_v47 }
 0x12f   :  { %423 = vrsqrt.f32 %v77_v46 }
 0x130   :  { %v78_v49 = vadd.f32 1e-05, %v74_v48 }
 0x132   :  { %425 = vrsqrt.f32 %v78_v49 }
 0x134   :  { %v420_v50 = vpop.eup %419 }
 0x135   :  { %v83_v51 = vmul.f32 %v420_v50, %v496_v12  ;;  %v343_v12 = vld [vmem:[%s598_s4] ss:$0 sm:$0xff] }
 0x137   :  { %v93_v56 = vmul.f32 %v341_v52, %v83_v51 }
 0x138   :  { %v422_v53 = vpop.eup %421 }
 0x139   :  { %v424_v54 = vpop.eup %423  ;;  %v84_v55 = vmul.f32 %v422_v53, %v506_v20  ;;  %v103_v62 = vadd.f32 %v342_v58, %v93_v56 }
 0x13a   :  { %v85_v57 = vmul.f32 %v424_v54, %v499_v13 }
 0x13b   :  { %v94_v59 = vmul.f32 %v341_v52, %v84_v55 }
 0x13c   :  { %v426_v60 = vpop.eup %425  ;;  %v95_v3 = vmul.f32 %v341_v52, %v85_v57 }
 0x13d   :  { %v86_v61 = vmul.f32 %v426_v60, %v509_v21  ;;  %v104_v63 = vadd.f32 %v342_v58, %v94_v59 }
 0x13e   :  { %v105_v7 = vadd.f32 %v342_v58, %v95_v3 }
 0x13f   :  { %v107_v4 = vpack.c.bf16 %v104_v63, %v103_v62  ;;  %v96_v6 = vmul.f32 %v341_v52, %v86_v61 }
 0x141   :  { %383 = vmatprep.mubr.msk.bf16.mxu0 %vm33_vm0, %v107_v4  ;;  %v106_v8 = vadd.f32 %v342_v58, %v96_v6 }
 0x143   :  { %v108_v9 = vpack.c.bf16 %v106_v8, %v105_v7 }
 0x145   :  { %384 = vmatmul.mubr.msk.bf16.vlgmr.msra.gmra.mrb[0].mxu0 %vm33_vm0, %v108_v9 }
 0x218   :  { %v385_v13 = vpop.f32.mrb[0].mxu0 }
 0x219   :  { %v197_v14 = vadd.f32 %v385_v13, %v343_v12  ;;  %v188_v15 = vpop.f32.mrb[1].mxu0 }
 0x21a   :  { %v189_v16 = vadd.f32 %v343_v12, %v188_v15  ;;  %v386_v17 = vpop.f32.mrb[2].mxu0 }
 0x21b   :  { %v200_v18 = vadd.f32 %v386_v17, %v343_v12  ;;  %v191_v19 = vpop.f32.mrb[3].mxu0  ;;  %v205_v21 = vmax.f32 %v197_v14, 0.0 }
 0x21c   :  { %v192_v20 = vadd.f32 %v343_v12, %v191_v19  ;;  %v203_v23 = vmax.f32 %v189_v16, 0.0 }
 0x21d   :  { %v206_v22 = vmax.f32 %v200_v18, 0.0 }
 0x21e   :  { %v204_v24 = vmax.f32 %v192_v20, 0.0 }
 0x21f   :  { %v208_v25 = vpack.c.bf16 %v206_v22, %v205_v21 }
 0x220   :  { %v207_v26 = vpack.c.bf16 %v204_v24, %v203_v23 }
 0x222   :  { %403 = vmatprep.mubr.bf16.mxu1 %v207_v26 }
 0x223   :  { %404 = vmatmul.mubr.bf16.vlgmr.msra.gmra.mrb[0].mxu1 %v208_v25 }
 0x2f6   :  { %v405_v28 = vpop.f32.mrb[0].mxu1 }
 0x2f7   :  { %v323_v29 = vadd.f32 %v405_v28, %v350_v27  ;;  %v314_v30 = vpop.f32.mrb[1].mxu1 }
 0x2f8   :  { %v315_v31 = vadd.f32 %v350_v27, %v314_v30  ;;  %v406_v32 = vpop.f32.mrb[2].mxu1 }
 0x2f9   :  { %v331_v33 = vadd.f32 %v323_v29, %v475_v1  ;;  %v326_v34 = vadd.f32 %v406_v32, %v350_v27  ;;  %v317_v35 = vpop.f32.mrb[3].mxu1 }
 0x2fa   :  { %v329_v36 = vadd.f32 %v315_v31, %v470_v0  ;;  %v318_v37 = vadd.f32 %v350_v27, %v317_v35 }
 0x2fb   :  { %335 = vst.msk [vmem:[%s600_s7 + $0x10] sm:$0xff] %vm33_vm0, %v331_v33  ;;  %v332_v38 = vadd.f32 %v326_v34, %v489_v5 }
 0x2fc   :  { %333 = vst.msk [vmem:[%s600_s7] sm:$0xff] %vm33_vm0, %v329_v36  ;;  %v330_v39 = vadd.f32 %v318_v37, %v480_v2 }
 0x2fd   :  { %336 = vst.msk [vmem:[%s600_s7 + $0x18] sm:$0xff] %vm33_vm0, %v332_v38 }
 0x2fe   :  { %334 = vst.msk [vmem:[%s600_s7 + $0x8] sm:$0xff] %vm33_vm0, %v330_v39 }

</bundles_post_ra>
